<compile_context>
chip_gen: v7x
topology: tpu7x:2x2x1
jax: 0.10.0
libtpu: 0.0.40
codegen_flags: <defaults>
</compile_context>

<pallas_src>
import numpy as np
import jax
import jax.numpy as jnp
from jax.experimental import pallas as pl
from jax.experimental.pallas import tpu as pltpu

EMBEDDING_DIM = 32
HIDDEN_DIM = 64
HIDDEN_PAD = 128        # hidden dim zero-padded to one full lane width inside the kernel
VOCAB_SIZE = 3          # len({'<PAD>': 0, '<SOS>': 1}) + 1
HEAD_PAD = 128          # fused-head output columns padded to one full lane width


def _round_up(n, m):
    return ((n + m - 1) // m) * m


def _lstm_heads_kernel(x_ref, mask_ref, table_ref, whh_ref, wheads_ref, bheads_ref, out_ref):
    """LSTM recurrence over T steps (in-kernel gather) + masked-final-state fused heads.

    x_ref      : (Bb, T)      int32 token ids (vocab = 3)
    mask_ref   : (Bb, 1)      1.0 where lengths[b] == T (real last step), else 0.0
    table_ref  : (V, 4*Hp)    embedding @ W_ih + (b_ih + b_hh), gate-padded to Hp lanes
    whh_ref    : (Hp, 4*Hp)   recurrent weights, PyTorch gate order i,f,g,o, zero-padded
    wheads_ref : (Hp, 128)    [w1 | w2 | wg | zero-pad]
    bheads_ref : (1, 128)     [b1 | b2 | bg | zero-pad]
    out_ref    : (Bb, 128)    fused head logits (single lane-dense store)
    """
    Bb, T = x_ref.shape
    Bh = Bb // 2
    Hp = HIDDEN_PAD

    ids = x_ref[...]                       # (Bb, T) int32 — one load, reused per step
    row0 = table_ref[0:1, :]               # (1, 4*Hp)  vocab row 0 (<PAD>)
    row1 = table_ref[1:2, :]               # (1, 4*Hp)  vocab row 1 (<SOS>)
    row2 = table_ref[2:3, :]               # (1, 4*Hp)  vocab row 2
    whh = whh_ref[...]                     # (Hp, 4*Hp)

    def sig(v):                            # 1-pass EUP sigmoid: 0.5*(tanh(0.5*x)+1)
        return 0.5 * jnp.tanh(0.5 * v) + 0.5

    def gate_math(gates, c):
        i_g = sig(gates[:, 0 * Hp:1 * Hp])
        f_g = sig(gates[:, 1 * Hp:2 * Hp])
        g_g = jnp.tanh(gates[:, 2 * Hp:3 * Hp])
        o_g = sig(gates[:, 3 * Hp:4 * Hp])
        c_new = f_g * c + i_g * g_g
        h_new = o_g * jnp.tanh(c_new)
        return h_new, c_new

    # Two independent recurrent chains (block halves) so MXU / EUP / VALU work of one
    # chain overlaps the other's serial dependencies.
    h0 = jnp.zeros((Bh, Hp), jnp.float32)
    c0 = jnp.zeros((Bh, Hp), jnp.float32)
    h1 = jnp.zeros((Bb - Bh, Hp), jnp.float32)
    c1 = jnp.zeros((Bb - Bh, Hp), jnp.float32)

    # T is a static Python int (max(lengths) resolved in the wrapper) -> fully unrolled.
    for t in range(T):
        idt = ids[:, t:t + 1]                                   # (Bb, 1) static lane slice
        xp_t = jnp.where(idt == 0, row0,
                         jnp.where(idt == 1, row1, row2))       # (Bb, 4*Hp) vocab-3 gather
        g0 = xp_t[:Bh] + jnp.dot(h0, whh, preferred_element_type=jnp.float32)
        g1 = xp_t[Bh:] + jnp.dot(h1, whh, preferred_element_type=jnp.float32)
        h0, c0 = gate_math(g0, c0)
        h1, c1 = gate_math(g1, c1)

    # pad_packed_sequence zero-pads short sequences at position T-1 -> mask the state.
    feat = jnp.concatenate([h0, h1], axis=0) * mask_ref[...]    # (Bb, Hp)
    out_ref[...] = (jnp.dot(feat, wheads_ref[...],
                            preferred_element_type=jnp.float32)
                    + bheads_ref[...])


def name_analyzer_forward(params, x, lengths):
    """x: (B, T) int32 token ids; lengths: CPU numpy / python ints (as in PyTorch)."""
    lengths = np.asarray(lengths)
    t_out = int(lengths.max())                 # pad_packed_sequence output length
    B = x.shape[0]
    H, Hp, V = HIDDEN_DIM, HIDDEN_PAD, VOCAB_SIZE

    # --- weight prep (tiny, one-off XLA ops) -----------------------------------------
    # Fold embedding + input projection + both biases into a (V, 4H) table; pad each
    # gate's H columns to Hp so gate slices in the kernel are 128-lane aligned.
    table = (params["embedding"] @ params["w_ih"] + params["bias"]).astype(jnp.float32)
    table = jnp.pad(table.reshape(V, 4, H),
                    ((0, 0), (0, 0), (0, Hp - H))).reshape(V, 4 * Hp)

    whh = params["w_hh"].astype(jnp.float32)                                 # (H, 4H)
    whh = jnp.pad(whh.reshape(H, 4, H),
                  ((0, Hp - H), (0, 0), (0, Hp - H))).reshape(Hp, 4 * Hp)    # (Hp, 4Hp)

    # Fused heads: [w1 | w2 | wg] zero-padded to (Hp, 128) for one lane-dense store.
    w_heads = jnp.concatenate([params["w1"], params["w2"], params["wg"]], axis=1)  # (H, 8)
    b_heads = jnp.concatenate([params["b1"], params["b2"], params["bg"]], axis=1)  # (1, 8)
    n_out = w_heads.shape[1]
    w_heads = jnp.pad(w_heads, ((0, Hp - H), (0, HEAD_PAD - n_out))).astype(jnp.float32)
    b_heads = jnp.pad(b_heads, ((0, 0), (0, HEAD_PAD - n_out))).astype(jnp.float32)

    mask = jnp.asarray((lengths == t_out).astype(np.float32))[:, None]      # (B, 1)
    x_ids = x[:, :t_out].astype(jnp.int32)                                  # (B, T)

    # --- batch blocking ----------------------------------------------------------------
    # Bb multiple of 16 (two 8-sublane chains per block), ~ceil(B/2) so there are >= 2
    # grid blocks for moderate B (v7x dual-core), capped at 64 to bound vreg pressure.
    Bb = min(64, _round_up(max(1, -(-B // 2)), 16))
    B_pad = _round_up(B, Bb)
    if B_pad != B:
        x_ids = jnp.pad(x_ids, ((0, B_pad - B), (0, 0)))
        mask = jnp.pad(mask, ((0, B_pad - B), (0, 0)))
    grid = (B_pad // Bb,)

    out = pl.pallas_call(
        _lstm_heads_kernel,
        out_shape=jax.ShapeDtypeStruct((B_pad, HEAD_PAD), jnp.float32),
        grid_spec=pltpu.PrefetchScalarGridSpec(
            num_scalar_prefetch=0,
            grid=grid,
            in_specs=[
                pl.BlockSpec((Bb, t_out), lambda b: (b, 0)),              # token ids
                pl.BlockSpec((Bb, 1), lambda b: (b, 0)),                  # length mask
                pl.BlockSpec((V, 4 * Hp), lambda b: (0, 0)),              # folded table
                pl.BlockSpec((Hp, 4 * Hp), lambda b: (0, 0)),             # W_hh
                pl.BlockSpec((Hp, HEAD_PAD), lambda b: (0, 0)),           # fused head W
                pl.BlockSpec((1, HEAD_PAD), lambda b: (0, 0)),            # fused head b
            ],
            out_specs=pl.BlockSpec((Bb, HEAD_PAD), lambda b: (b, 0)),
        ),
        compiler_params=pltpu.CompilerParams(
            dimension_semantics=("parallel",),
        ),
    )(x_ids, mask, table, whh, w_heads, b_heads)

    out = out[:B]
    p1 = out[:, 0:VOCAB_SIZE]
    p2 = out[:, VOCAB_SIZE:2 * VOCAB_SIZE]
    g = out[:, 2 * VOCAB_SIZE:2 * VOCAB_SIZE + 2]
    return p1, p2, g


def init_params(key):
    ks = jax.random.split(key, 10)
    scale = 0.1

    def u(k, shape):
        return jax.random.uniform(k, shape, jnp.float32, -scale, scale)

    return {
        "embedding": u(ks[0], (VOCAB_SIZE, EMBEDDING_DIM)),
        "w_ih": u(ks[1], (EMBEDDING_DIM, 4 * HIDDEN_DIM)),   # transposed vs torch (4H, E)
        "w_hh": u(ks[2], (HIDDEN_DIM, 4 * HIDDEN_DIM)),      # transposed vs torch (4H, H)
        "bias": u(ks[3], (1, 4 * HIDDEN_DIM)),               # b_ih + b_hh combined
        "w1": u(ks[4], (HIDDEN_DIM, VOCAB_SIZE)),
        "b1": u(ks[5], (1, VOCAB_SIZE)),
        "w2": u(ks[6], (HIDDEN_DIM, VOCAB_SIZE)),
        "b2": u(ks[7], (1, VOCAB_SIZE)),
        "wg": u(ks[8], (HIDDEN_DIM, 2)),
        "bg": u(ks[9], (1, 2)),
    }


def reference_forward(params, x, lengths):
    """Pure-JAX mirror of the PyTorch packed-LSTM forward (for verification)."""
    lengths = np.asarray(lengths)
    t_out = int(lengths.max())
    B = x.shape[0]
    emb = params["embedding"][x]                                            # (B, T, E)
    h = jnp.zeros((B, HIDDEN_DIM), jnp.float32)
    c = jnp.zeros((B, HIDDEN_DIM), jnp.float32)
    H = HIDDEN_DIM
    for t in range(t_out):
        gates = emb[:, t, :] @ params["w_ih"] + h @ params["w_hh"] + params["bias"]
        i_g = jax.nn.sigmoid(gates[:, 0 * H:1 * H])
        f_g = jax.nn.sigmoid(gates[:, 1 * H:2 * H])
        g_g = jnp.tanh(gates[:, 2 * H:3 * H])
        o_g = jax.nn.sigmoid(gates[:, 3 * H:4 * H])
        c = f_g * c + i_g * g_g
        h = o_g * jnp.tanh(c)
    mask = jnp.asarray((lengths == t_out).astype(np.float32))[:, None]
    feat = h * mask
    return (feat @ params["w1"] + params["b1"],
            feat @ params["w2"] + params["b2"],
            feat @ params["wg"] + params["bg"])


if __name__ == "__main__":
    key = jax.random.PRNGKey(0)
    pk, xk = jax.random.split(key)
    params = init_params(pk)

    B, T = 2, 8
    x = jax.random.randint(xk, (B, T), 0, VOCAB_SIZE, dtype=jnp.int32)
    lengths = np.array([8, 5], dtype=np.int64)   # item 1 is shorter -> its logits = head bias

    p1, p2, g = name_analyzer_forward(params, x, lengths)
    jax.block_until_ready((p1, p2, g))

    r1, r2, rg = reference_forward(params, x, lengths)
    np.testing.assert_allclose(np.asarray(p1), np.asarray(r1), rtol=1e-3, atol=1e-3)
    np.testing.assert_allclose(np.asarray(p2), np.asarray(r2), rtol=1e-3, atol=1e-3)
    np.testing.assert_allclose(np.asarray(g), np.asarray(rg), rtol=1e-3, atol=1e-3)

    print("KERNEL_OK")
</pallas_src>

<mosaic_0001>
module attributes {stable_mosaic.version = 11 : i64} {
  func.func @_lstm_heads_kernel(%arg0: i32, %arg1: memref<16x8xi32, #tpu.memory_space<vmem>>, %arg2: memref<16x1xf32, #tpu.memory_space<vmem>>, %arg3: memref<3x512xf32, #tpu.memory_space<vmem>>, %arg4: memref<128x512xf32, #tpu.memory_space<vmem>>, %arg5: memref<128x128xf32, #tpu.memory_space<vmem>>, %arg6: memref<1x128xf32, #tpu.memory_space<vmem>>, %arg7: memref<16x128xf32, #tpu.memory_space<vmem>>) attributes {dimension_semantics = [#tpu.dimension_semantics<parallel>], iteration_bounds = array<i64: 1>, scalar_prefetch = 0 : i64, scratch_operands = 0 : i64, tpu.core_type = #tpu.core_type<tc>, window_params = [{transform_indices = @transform_0, window_bounds = array<i64: 16, 8>}, {transform_indices = @transform_1, window_bounds = array<i64: 16, 1>}, {pipeline_mode = #tpu.pipeline_mode<synchronous>, transform_indices = @transform_2, window_bounds = array<i64: 3, 512>}, {pipeline_mode = #tpu.pipeline_mode<synchronous>, transform_indices = @transform_3, window_bounds = array<i64: 128, 512>}, {pipeline_mode = #tpu.pipeline_mode<synchronous>, transform_indices = @transform_4, window_bounds = array<i64: 128, 128>}, {pipeline_mode = #tpu.pipeline_mode<synchronous>, transform_indices = @transform_5, window_bounds = array<i64: 1, 128>}, {transform_indices = @transform_6, window_bounds = array<i64: 16, 128>}]} {
    %c0 = arith.constant 0 : index
    %c0_0 = arith.constant 0 : index
    %0 = vector.load %arg1[%c0, %c0_0] : memref<16x8xi32, #tpu.memory_space<vmem>>, vector<16x8xi32>
    %c0_1 = arith.constant 0 : index
    %c0_2 = arith.constant 0 : index
    %1 = vector.load %arg3[%c0_1, %c0_2] : memref<3x512xf32, #tpu.memory_space<vmem>>, vector<1x512xf32>
    %c1 = arith.constant 1 : index
    %c0_3 = arith.constant 0 : index
    %2 = vector.load %arg3[%c1, %c0_3] : memref<3x512xf32, #tpu.memory_space<vmem>>, vector<1x512xf32>
    %c2 = arith.constant 2 : index
    %c0_4 = arith.constant 0 : index
    %3 = vector.load %arg3[%c2, %c0_4] : memref<3x512xf32, #tpu.memory_space<vmem>>, vector<1x512xf32>
    %c0_5 = arith.constant 0 : index
    %c0_6 = arith.constant 0 : index
    %4 = vector.load %arg4[%c0_5, %c0_6] : memref<128x512xf32, #tpu.memory_space<vmem>>, vector<128x512xf32>
    %cst = arith.constant 0.000000e+00 : f32
    %5 = vector.broadcast %cst : f32 to vector<8x128xf32>
    %cst_7 = arith.constant 0.000000e+00 : f32
    %6 = vector.broadcast %cst_7 : f32 to vector<8x128xf32>
    %cst_8 = arith.constant 0.000000e+00 : f32
    %7 = vector.broadcast %cst_8 : f32 to vector<8x128xf32>
    %cst_9 = arith.constant 0.000000e+00 : f32
    %8 = vector.broadcast %cst_9 : f32 to vector<8x128xf32>
    %9 = vector.extract_strided_slice %0 {offsets = [0, 0], sizes = [16, 1], strides = [1, 1]} : vector<16x8xi32> to vector<16x1xi32>
    %c0_i32 = arith.constant 0 : i32
    %10 = vector.broadcast %c0_i32 : i32 to vector<16x1xi32>
    %11 = arith.cmpi eq, %9, %10 : vector<16x1xi32>
    %c1_i32 = arith.constant 1 : i32
    %12 = vector.broadcast %c1_i32 : i32 to vector<16x1xi32>
    %13 = arith.cmpi eq, %9, %12 : vector<16x1xi32>
    %14 = vector.shape_cast %13 : vector<16x1xi1> to vector<16x1xi1>
    %15 = vector.broadcast %14 : vector<16x1xi1> to vector<16x512xi1>
    %16 = vector.shape_cast %2 : vector<1x512xf32> to vector<1x512xf32>
    %17 = vector.broadcast %16 : vector<1x512xf32> to vector<16x512xf32>
    %18 = vector.shape_cast %3 : vector<1x512xf32> to vector<1x512xf32>
    %19 = vector.broadcast %18 : vector<1x512xf32> to vector<16x512xf32>
    %20 = arith.select %15, %17, %19 : vector<16x512xi1>, vector<16x512xf32>
    %21 = vector.shape_cast %11 : vector<16x1xi1> to vector<16x1xi1>
    %22 = vector.broadcast %21 : vector<16x1xi1> to vector<16x512xi1>
    %23 = vector.shape_cast %1 : vector<1x512xf32> to vector<1x512xf32>
    %24 = vector.broadcast %23 : vector<1x512xf32> to vector<16x512xf32>
    %25 = arith.select %22, %24, %20 : vector<16x512xi1>, vector<16x512xf32>
    %26 = vector.extract_strided_slice %25 {offsets = [0, 0], sizes = [8, 512], strides = [1, 1]} : vector<16x512xf32> to vector<8x512xf32>
    %cst_10 = arith.constant dense<0.000000e+00> : vector<8x512xf32>
    %27 = tpu.matmul %5, %4, %cst_10 {dimension_numbers = #tpu.dot_dimension_numbers<[1], [0], [0], [1], [0, 0, 1, 1], [], []>} : vector<8x128xf32>, vector<128x512xf32>, vector<8x512xf32> -> vector<8x512xf32>
    %28 = arith.addf %26, %27 : vector<8x512xf32>
    %29 = vector.extract_strided_slice %25 {offsets = [8, 0], sizes = [8, 512], strides = [1, 1]} : vector<16x512xf32> to vector<8x512xf32>
    %cst_11 = arith.constant dense<0.000000e+00> : vector<8x512xf32>
    %30 = tpu.matmul %7, %4, %cst_11 {dimension_numbers = #tpu.dot_dimension_numbers<[1], [0], [0], [1], [0, 0, 1, 1], [], []>} : vector<8x128xf32>, vector<128x512xf32>, vector<8x512xf32> -> vector<8x512xf32>
    %31 = arith.addf %29, %30 : vector<8x512xf32>
    %32 = vector.extract_strided_slice %28 {offsets = [0, 0], sizes = [8, 128], strides = [1, 1]} : vector<8x512xf32> to vector<8x128xf32>
    %cst_12 = arith.constant 5.000000e-01 : f32
    %33 = vector.broadcast %cst_12 : f32 to vector<8x128xf32>
    %34 = arith.mulf %33, %32 : vector<8x128xf32>
    %35 = math.tanh %34 : vector<8x128xf32>
    %cst_13 = arith.constant 5.000000e-01 : f32
    %36 = vector.broadcast %cst_13 : f32 to vector<8x128xf32>
    %37 = arith.mulf %36, %35 : vector<8x128xf32>
    %cst_14 = arith.constant 5.000000e-01 : f32
    %38 = vector.broadcast %cst_14 : f32 to vector<8x128xf32>
    %39 = arith.addf %37, %38 : vector<8x128xf32>
    %40 = vector.extract_strided_slice %28 {offsets = [0, 128], sizes = [8, 128], strides = [1, 1]} : vector<8x512xf32> to vector<8x128xf32>
    %cst_15 = arith.constant 5.000000e-01 : f32
    %41 = vector.broadcast %cst_15 : f32 to vector<8x128xf32>
    %42 = arith.mulf %41, %40 : vector<8x128xf32>
    %43 = math.tanh %42 : vector<8x128xf32>
    %cst_16 = arith.constant 5.000000e-01 : f32
    %44 = vector.broadcast %cst_16 : f32 to vector<8x128xf32>
    %45 = arith.mulf %44, %43 : vector<8x128xf32>
    %cst_17 = arith.constant 5.000000e-01 : f32
    %46 = vector.broadcast %cst_17 : f32 to vector<8x128xf32>
    %47 = arith.addf %45, %46 : vector<8x128xf32>
    %48 = vector.extract_strided_slice %28 {offsets = [0, 256], sizes = [8, 128], strides = [1, 1]} : vector<8x512xf32> to vector<8x128xf32>
    %49 = math.tanh %48 : vector<8x128xf32>
    %50 = vector.extract_strided_slice %28 {offsets = [0, 384], sizes = [8, 128], strides = [1, 1]} : vector<8x512xf32> to vector<8x128xf32>
    %cst_18 = arith.constant 5.000000e-01 : f32
    %51 = vector.broadcast %cst_18 : f32 to vector<8x128xf32>
    %52 = arith.mulf %51, %50 : vector<8x128xf32>
    %53 = math.tanh %52 : vector<8x128xf32>
    %cst_19 = arith.constant 5.000000e-01 : f32
    %54 = vector.broadcast %cst_19 : f32 to vector<8x128xf32>
    %55 = arith.mulf %54, %53 : vector<8x128xf32>
    %cst_20 = arith.constant 5.000000e-01 : f32
    %56 = vector.broadcast %cst_20 : f32 to vector<8x128xf32>
    %57 = arith.addf %55, %56 : vector<8x128xf32>
    %58 = arith.mulf %47, %6 : vector<8x128xf32>
    %59 = arith.mulf %39, %49 : vector<8x128xf32>
    %60 = arith.addf %58, %59 : vector<8x128xf32>
    %61 = math.tanh %60 : vector<8x128xf32>
    %62 = arith.mulf %57, %61 : vector<8x128xf32>
    %63 = vector.extract_strided_slice %31 {offsets = [0, 0], sizes = [8, 128], strides = [1, 1]} : vector<8x512xf32> to vector<8x128xf32>
    %cst_21 = arith.constant 5.000000e-01 : f32
    %64 = vector.broadcast %cst_21 : f32 to vector<8x128xf32>
    %65 = arith.mulf %64, %63 : vector<8x128xf32>
    %66 = math.tanh %65 : vector<8x128xf32>
    %cst_22 = arith.constant 5.000000e-01 : f32
    %67 = vector.broadcast %cst_22 : f32 to vector<8x128xf32>
    %68 = arith.mulf %67, %66 : vector<8x128xf32>
    %cst_23 = arith.constant 5.000000e-01 : f32
    %69 = vector.broadcast %cst_23 : f32 to vector<8x128xf32>
    %70 = arith.addf %68, %69 : vector<8x128xf32>
    %71 = vector.extract_strided_slice %31 {offsets = [0, 128], sizes = [8, 128], strides = [1, 1]} : vector<8x512xf32> to vector<8x128xf32>
    %cst_24 = arith.constant 5.000000e-01 : f32
    %72 = vector.broadcast %cst_24 : f32 to vector<8x128xf32>
    %73 = arith.mulf %72, %71 : vector<8x128xf32>
    %74 = math.tanh %73 : vector<8x128xf32>
    %cst_25 = arith.constant 5.000000e-01 : f32
    %75 = vector.broadcast %cst_25 : f32 to vector<8x128xf32>
    %76 = arith.mulf %75, %74 : vector<8x128xf32>
    %cst_26 = arith.constant 5.000000e-01 : f32
    %77 = vector.broadcast %cst_26 : f32 to vector<8x128xf32>
    %78 = arith.addf %76, %77 : vector<8x128xf32>
    %79 = vector.extract_strided_slice %31 {offsets = [0, 256], sizes = [8, 128], strides = [1, 1]} : vector<8x512xf32> to vector<8x128xf32>
    %80 = math.tanh %79 : vector<8x128xf32>
    %81 = vector.extract_strided_slice %31 {offsets = [0, 384], sizes = [8, 128], strides = [1, 1]} : vector<8x512xf32> to vector<8x128xf32>
    %cst_27 = arith.constant 5.000000e-01 : f32
    %82 = vector.broadcast %cst_27 : f32 to vector<8x128xf32>
    %83 = arith.mulf %82, %81 : vector<8x128xf32>
    %84 = math.tanh %83 : vector<8x128xf32>
    %cst_28 = arith.constant 5.000000e-01 : f32
    %85 = vector.broadcast %cst_28 : f32 to vector<8x128xf32>
    %86 = arith.mulf %85, %84 : vector<8x128xf32>
    %cst_29 = arith.constant 5.000000e-01 : f32
    %87 = vector.broadcast %cst_29 : f32 to vector<8x128xf32>
    %88 = arith.addf %86, %87 : vector<8x128xf32>
    %89 = arith.mulf %78, %8 : vector<8x128xf32>
    %90 = arith.mulf %70, %80 : vector<8x128xf32>
    %91 = arith.addf %89, %90 : vector<8x128xf32>
    %92 = math.tanh %91 : vector<8x128xf32>
    %93 = arith.mulf %88, %92 : vector<8x128xf32>
    %94 = vector.extract_strided_slice %0 {offsets = [0, 1], sizes = [16, 1], strides = [1, 1]} : vector<16x8xi32> to vector<16x1xi32>
    %c0_i32_30 = arith.constant 0 : i32
    %95 = vector.broadcast %c0_i32_30 : i32 to vector<16x1xi32>
    %96 = arith.cmpi eq, %94, %95 : vector<16x1xi32>
    %c1_i32_31 = arith.constant 1 : i32
    %97 = vector.broadcast %c1_i32_31 : i32 to vector<16x1xi32>
    %98 = arith.cmpi eq, %94, %97 : vector<16x1xi32>
    %99 = vector.shape_cast %98 : vector<16x1xi1> to vector<16x1xi1>
    %100 = vector.broadcast %99 : vector<16x1xi1> to vector<16x512xi1>
    %101 = vector.shape_cast %2 : vector<1x512xf32> to vector<1x512xf32>
    %102 = vector.broadcast %101 : vector<1x512xf32> to vector<16x512xf32>
    %103 = vector.shape_cast %3 : vector<1x512xf32> to vector<1x512xf32>
    %104 = vector.broadcast %103 : vector<1x512xf32> to vector<16x512xf32>
    %105 = arith.select %100, %102, %104 : vector<16x512xi1>, vector<16x512xf32>
    %106 = vector.shape_cast %96 : vector<16x1xi1> to vector<16x1xi1>
    %107 = vector.broadcast %106 : vector<16x1xi1> to vector<16x512xi1>
    %108 = vector.shape_cast %1 : vector<1x512xf32> to vector<1x512xf32>
    %109 = vector.broadcast %108 : vector<1x512xf32> to vector<16x512xf32>
    %110 = arith.select %107, %109, %105 : vector<16x512xi1>, vector<16x512xf32>
    %111 = vector.extract_strided_slice %110 {offsets = [0, 0], sizes = [8, 512], strides = [1, 1]} : vector<16x512xf32> to vector<8x512xf32>
    %cst_32 = arith.constant dense<0.000000e+00> : vector<8x512xf32>
    %112 = tpu.matmul %62, %4, %cst_32 {dimension_numbers = #tpu.dot_dimension_numbers<[1], [0], [0], [1], [0, 0, 1, 1], [], []>} : vector<8x128xf32>, vector<128x512xf32>, vector<8x512xf32> -> vector<8x512xf32>
    %113 = arith.addf %111, %112 : vector<8x512xf32>
    %114 = vector.extract_strided_slice %110 {offsets = [8, 0], sizes = [8, 512], strides = [1, 1]} : vector<16x512xf32> to vector<8x512xf32>
    %cst_33 = arith.constant dense<0.000000e+00> : vector<8x512xf32>
    %115 = tpu.matmul %93, %4, %cst_33 {dimension_numbers = #tpu.dot_dimension_numbers<[1], [0], [0], [1], [0, 0, 1, 1], [], []>} : vector<8x128xf32>, vector<128x512xf32>, vector<8x512xf32> -> vector<8x512xf32>
    %116 = arith.addf %114, %115 : vector<8x512xf32>
    %117 = vector.extract_strided_slice %113 {offsets = [0, 0], sizes = [8, 128], strides = [1, 1]} : vector<8x512xf32> to vector<8x128xf32>
    %cst_34 = arith.constant 5.000000e-01 : f32
    %118 = vector.broadcast %cst_34 : f32 to vector<8x128xf32>
    %119 = arith.mulf %118, %117 : vector<8x128xf32>
    %120 = math.tanh %119 : vector<8x128xf32>
    %cst_35 = arith.constant 5.000000e-01 : f32
    %121 = vector.broadcast %cst_35 : f32 to vector<8x128xf32>
    %122 = arith.mulf %121, %120 : vector<8x128xf32>
    %cst_36 = arith.constant 5.000000e-01 : f32
    %123 = vector.broadcast %cst_36 : f32 to vector<8x128xf32>
    %124 = arith.addf %122, %123 : vector<8x128xf32>
    %125 = vector.extract_strided_slice %113 {offsets = [0, 128], sizes = [8, 128], strides = [1, 1]} : vector<8x512xf32> to vector<8x128xf32>
    %cst_37 = arith.constant 5.000000e-01 : f32
    %126 = vector.broadcast %cst_37 : f32 to vector<8x128xf32>
    %127 = arith.mulf %126, %125 : vector<8x128xf32>
    %128 = math.tanh %127 : vector<8x128xf32>
    %cst_38 = arith.constant 5.000000e-01 : f32
    %129 = vector.broadcast %cst_38 : f32 to vector<8x128xf32>
    %130 = arith.mulf %129, %128 : vector<8x128xf32>
    %cst_39 = arith.constant 5.000000e-01 : f32
    %131 = vector.broadcast %cst_39 : f32 to vector<8x128xf32>
    %132 = arith.addf %130, %131 : vector<8x128xf32>
    %133 = vector.extract_strided_slice %113 {offsets = [0, 256], sizes = [8, 128], strides = [1, 1]} : vector<8x512xf32> to vector<8x128xf32>
    %134 = math.tanh %133 : vector<8x128xf32>
    %135 = vector.extract_strided_slice %113 {offsets = [0, 384], sizes = [8, 128], strides = [1, 1]} : vector<8x512xf32> to vector<8x128xf32>
    %cst_40 = arith.constant 5.000000e-01 : f32
    %136 = vector.broadcast %cst_40 : f32 to vector<8x128xf32>
    %137 = arith.mulf %136, %135 : vector<8x128xf32>
    %138 = math.tanh %137 : vector<8x128xf32>
    %cst_41 = arith.constant 5.000000e-01 : f32
    %139 = vector.broadcast %cst_41 : f32 to vector<8x128xf32>
    %140 = arith.mulf %139, %138 : vector<8x128xf32>
    %cst_42 = arith.constant 5.000000e-01 : f32
    %141 = vector.broadcast %cst_42 : f32 to vector<8x128xf32>
    %142 = arith.addf %140, %141 : vector<8x128xf32>
    %143 = arith.mulf %132, %60 : vector<8x128xf32>
    %144 = arith.mulf %124, %134 : vector<8x128xf32>
    %145 = arith.addf %143, %144 : vector<8x128xf32>
    %146 = math.tanh %145 : vector<8x128xf32>
    %147 = arith.mulf %142, %146 : vector<8x128xf32>
    %148 = vector.extract_strided_slice %116 {offsets = [0, 0], sizes = [8, 128], strides = [1, 1]} : vector<8x512xf32> to vector<8x128xf32>
    %cst_43 = arith.constant 5.000000e-01 : f32
    %149 = vector.broadcast %cst_43 : f32 to vector<8x128xf32>
    %150 = arith.mulf %149, %148 : vector<8x128xf32>
    %151 = math.tanh %150 : vector<8x128xf32>
    %cst_44 = arith.constant 5.000000e-01 : f32
    %152 = vector.broadcast %cst_44 : f32 to vector<8x128xf32>
    %153 = arith.mulf %152, %151 : vector<8x128xf32>
    %cst_45 = arith.constant 5.000000e-01 : f32
    %154 = vector.broadcast %cst_45 : f32 to vector<8x128xf32>
    %155 = arith.addf %153, %154 : vector<8x128xf32>
    %156 = vector.extract_strided_slice %116 {offsets = [0, 128], sizes = [8, 128], strides = [1, 1]} : vector<8x512xf32> to vector<8x128xf32>
    %cst_46 = arith.constant 5.000000e-01 : f32
    %157 = vector.broadcast %cst_46 : f32 to vector<8x128xf32>
    %158 = arith.mulf %157, %156 : vector<8x128xf32>
    %159 = math.tanh %158 : vector<8x128xf32>
    %cst_47 = arith.constant 5.000000e-01 : f32
    %160 = vector.broadcast %cst_47 : f32 to vector<8x128xf32>
    %161 = arith.mulf %160, %159 : vector<8x128xf32>
    %cst_48 = arith.constant 5.000000e-01 : f32
    %162 = vector.broadcast %cst_48 : f32 to vector<8x128xf32>
    %163 = arith.addf %161, %162 : vector<8x128xf32>
    %164 = vector.extract_strided_slice %116 {offsets = [0, 256], sizes = [8, 128], strides = [1, 1]} : vector<8x512xf32> to vector<8x128xf32>
    %165 = math.tanh %164 : vector<8x128xf32>
    %166 = vector.extract_strided_slice %116 {offsets = [0, 384], sizes = [8, 128], strides = [1, 1]} : vector<8x512xf32> to vector<8x128xf32>
    %cst_49 = arith.constant 5.000000e-01 : f32
    %167 = vector.broadcast %cst_49 : f32 to vector<8x128xf32>
    %168 = arith.mulf %167, %166 : vector<8x128xf32>
    %169 = math.tanh %168 : vector<8x128xf32>
    %cst_50 = arith.constant 5.000000e-01 : f32
    %170 = vector.broadcast %cst_50 : f32 to vector<8x128xf32>
    %171 = arith.mulf %170, %169 : vector<8x128xf32>
    %cst_51 = arith.constant 5.000000e-01 : f32
    %172 = vector.broadcast %cst_51 : f32 to vector<8x128xf32>
    %173 = arith.addf %171, %172 : vector<8x128xf32>
    %174 = arith.mulf %163, %91 : vector<8x128xf32>
    %175 = arith.mulf %155, %165 : vector<8x128xf32>
    %176 = arith.addf %174, %175 : vector<8x128xf32>
    %177 = math.tanh %176 : vector<8x128xf32>
    %178 = arith.mulf %173, %177 : vector<8x128xf32>
    %179 = vector.extract_strided_slice %0 {offsets = [0, 2], sizes = [16, 1], strides = [1, 1]} : vector<16x8xi32> to vector<16x1xi32>
    %c0_i32_52 = arith.constant 0 : i32
    %180 = vector.broadcast %c0_i32_52 : i32 to vector<16x1xi32>
    %181 = arith.cmpi eq, %179, %180 : vector<16x1xi32>
    %c1_i32_53 = arith.constant 1 : i32
    %182 = vector.broadcast %c1_i32_53 : i32 to vector<16x1xi32>
    %183 = arith.cmpi eq, %179, %182 : vector<16x1xi32>
    %184 = vector.shape_cast %183 : vector<16x1xi1> to vector<16x1xi1>
    %185 = vector.broadcast %184 : vector<16x1xi1> to vector<16x512xi1>
    %186 = vector.shape_cast %2 : vector<1x512xf32> to vector<1x512xf32>
    %187 = vector.broadcast %186 : vector<1x512xf32> to vector<16x512xf32>
    %188 = vector.shape_cast %3 : vector<1x512xf32> to vector<1x512xf32>
    %189 = vector.broadcast %188 : vector<1x512xf32> to vector<16x512xf32>
    %190 = arith.select %185, %187, %189 : vector<16x512xi1>, vector<16x512xf32>
    %191 = vector.shape_cast %181 : vector<16x1xi1> to vector<16x1xi1>
    %192 = vector.broadcast %191 : vector<16x1xi1> to vector<16x512xi1>
    %193 = vector.shape_cast %1 : vector<1x512xf32> to vector<1x512xf32>
    %194 = vector.broadcast %193 : vector<1x512xf32> to vector<16x512xf32>
    %195 = arith.select %192, %194, %190 : vector<16x512xi1>, vector<16x512xf32>
    %196 = vector.extract_strided_slice %195 {offsets = [0, 0], sizes = [8, 512], strides = [1, 1]} : vector<16x512xf32> to vector<8x512xf32>
    %cst_54 = arith.constant dense<0.000000e+00> : vector<8x512xf32>
    %197 = tpu.matmul %147, %4, %cst_54 {dimension_numbers = #tpu.dot_dimension_numbers<[1], [0], [0], [1], [0, 0, 1, 1], [], []>} : vector<8x128xf32>, vector<128x512xf32>, vector<8x512xf32> -> vector<8x512xf32>
    %198 = arith.addf %196, %197 : vector<8x512xf32>
    %199 = vector.extract_strided_slice %195 {offsets = [8, 0], sizes = [8, 512], strides = [1, 1]} : vector<16x512xf32> to vector<8x512xf32>
    %cst_55 = arith.constant dense<0.000000e+00> : vector<8x512xf32>
    %200 = tpu.matmul %178, %4, %cst_55 {dimension_numbers = #tpu.dot_dimension_numbers<[1], [0], [0], [1], [0, 0, 1, 1], [], []>} : vector<8x128xf32>, vector<128x512xf32>, vector<8x512xf32> -> vector<8x512xf32>
    %201 = arith.addf %199, %200 : vector<8x512xf32>
    %202 = vector.extract_strided_slice %198 {offsets = [0, 0], sizes = [8, 128], strides = [1, 1]} : vector<8x512xf32> to vector<8x128xf32>
    %cst_56 = arith.constant 5.000000e-01 : f32
    %203 = vector.broadcast %cst_56 : f32 to vector<8x128xf32>
    %204 = arith.mulf %203, %202 : vector<8x128xf32>
    %205 = math.tanh %204 : vector<8x128xf32>
    %cst_57 = arith.constant 5.000000e-01 : f32
    %206 = vector.broadcast %cst_57 : f32 to vector<8x128xf32>
    %207 = arith.mulf %206, %205 : vector<8x128xf32>
    %cst_58 = arith.constant 5.000000e-01 : f32
    %208 = vector.broadcast %cst_58 : f32 to vector<8x128xf32>
    %209 = arith.addf %207, %208 : vector<8x128xf32>
    %210 = vector.extract_strided_slice %198 {offsets = [0, 128], sizes = [8, 128], strides = [1, 1]} : vector<8x512xf32> to vector<8x128xf32>
    %cst_59 = arith.constant 5.000000e-01 : f32
    %211 = vector.broadcast %cst_59 : f32 to vector<8x128xf32>
    %212 = arith.mulf %211, %210 : vector<8x128xf32>
    %213 = math.tanh %212 : vector<8x128xf32>
    %cst_60 = arith.constant 5.000000e-01 : f32
    %214 = vector.broadcast %cst_60 : f32 to vector<8x128xf32>
    %215 = arith.mulf %214, %213 : vector<8x128xf32>
    %cst_61 = arith.constant 5.000000e-01 : f32
    %216 = vector.broadcast %cst_61 : f32 to vector<8x128xf32>
    %217 = arith.addf %215, %216 : vector<8x128xf32>
    %218 = vector.extract_strided_slice %198 {offsets = [0, 256], sizes = [8, 128], strides = [1, 1]} : vector<8x512xf32> to vector<8x128xf32>
    %219 = math.tanh %218 : vector<8x128xf32>
    %220 = vector.extract_strided_slice %198 {offsets = [0, 384], sizes = [8, 128], strides = [1, 1]} : vector<8x512xf32> to vector<8x128xf32>
    %cst_62 = arith.constant 5.000000e-01 : f32
    %221 = vector.broadcast %cst_62 : f32 to vector<8x128xf32>
    %222 = arith.mulf %221, %220 : vector<8x128xf32>
    %223 = math.tanh %222 : vector<8x128xf32>
    %cst_63 = arith.constant 5.000000e-01 : f32
    %224 = vector.broadcast %cst_63 : f32 to vector<8x128xf32>
    %225 = arith.mulf %224, %223 : vector<8x128xf32>
    %cst_64 = arith.constant 5.000000e-01 : f32
    %226 = vector.broadcast %cst_64 : f32 to vector<8x128xf32>
    %227 = arith.addf %225, %226 : vector<8x128xf32>
    %228 = arith.mulf %217, %145 : vector<8x128xf32>
    %229 = arith.mulf %209, %219 : vector<8x128xf32>
    %230 = arith.addf %228, %229 : vector<8x128xf32>
    %231 = math.tanh %230 : vector<8x128xf32>
    %232 = arith.mulf %227, %231 : vector<8x128xf32>
    %233 = vector.extract_strided_slice %201 {offsets = [0, 0], sizes = [8, 128], strides = [1, 1]} : vector<8x512xf32> to vector<8x128xf32>
    %cst_65 = arith.constant 5.000000e-01 : f32
    %234 = vector.broadcast %cst_65 : f32 to vector<8x128xf32>
    %235 = arith.mulf %234, %233 : vector<8x128xf32>
    %236 = math.tanh %235 : vector<8x128xf32>
    %cst_66 = arith.constant 5.000000e-01 : f32
    %237 = vector.broadcast %cst_66 : f32 to vector<8x128xf32>
    %238 = arith.mulf %237, %236 : vector<8x128xf32>
    %cst_67 = arith.constant 5.000000e-01 : f32
    %239 = vector.broadcast %cst_67 : f32 to vector<8x128xf32>
    %240 = arith.addf %238, %239 : vector<8x128xf32>
    %241 = vector.extract_strided_slice %201 {offsets = [0, 128], sizes = [8, 128], strides = [1, 1]} : vector<8x512xf32> to vector<8x128xf32>
    %cst_68 = arith.constant 5.000000e-01 : f32
    %242 = vector.broadcast %cst_68 : f32 to vector<8x128xf32>
    %243 = arith.mulf %242, %241 : vector<8x128xf32>
    %244 = math.tanh %243 : vector<8x128xf32>
    %cst_69 = arith.constant 5.000000e-01 : f32
    %245 = vector.broadcast %cst_69 : f32 to vector<8x128xf32>
    %246 = arith.mulf %245, %244 : vector<8x128xf32>
    %cst_70 = arith.constant 5.000000e-01 : f32
    %247 = vector.broadcast %cst_70 : f32 to vector<8x128xf32>
    %248 = arith.addf %246, %247 : vector<8x128xf32>
    %249 = vector.extract_strided_slice %201 {offsets = [0, 256], sizes = [8, 128], strides = [1, 1]} : vector<8x512xf32> to vector<8x128xf32>
    %250 = math.tanh %249 : vector<8x128xf32>
    %251 = vector.extract_strided_slice %201 {offsets = [0, 384], sizes = [8, 128], strides = [1, 1]} : vector<8x512xf32> to vector<8x128xf32>
    %cst_71 = arith.constant 5.000000e-01 : f32
    %252 = vector.broadcast %cst_71 : f32 to vector<8x128xf32>
    %253 = arith.mulf %252, %251 : vector<8x128xf32>
    %254 = math.tanh %253 : vector<8x128xf32>
    %cst_72 = arith.constant 5.000000e-01 : f32
    %255 = vector.broadcast %cst_72 : f32 to vector<8x128xf32>
    %256 = arith.mulf %255, %254 : vector<8x128xf32>
    %cst_73 = arith.constant 5.000000e-01 : f32
    %257 = vector.broadcast %cst_73 : f32 to vector<8x128xf32>
    %258 = arith.addf %256, %257 : vector<8x128xf32>
    %259 = arith.mulf %248, %176 : vector<8x128xf32>
    %260 = arith.mulf %240, %250 : vector<8x128xf32>
    %261 = arith.addf %259, %260 : vector<8x128xf32>
    %262 = math.tanh %261 : vector<8x128xf32>
    %263 = arith.mulf %258, %262 : vector<8x128xf32>
    %264 = vector.extract_strided_slice %0 {offsets = [0, 3], sizes = [16, 1], strides = [1, 1]} : vector<16x8xi32> to vector<16x1xi32>
    %c0_i32_74 = arith.constant 0 : i32
    %265 = vector.broadcast %c0_i32_74 : i32 to vector<16x1xi32>
    %266 = arith.cmpi eq, %264, %265 : vector<16x1xi32>
    %c1_i32_75 = arith.constant 1 : i32
    %267 = vector.broadcast %c1_i32_75 : i32 to vector<16x1xi32>
    %268 = arith.cmpi eq, %264, %267 : vector<16x1xi32>
    %269 = vector.shape_cast %268 : vector<16x1xi1> to vector<16x1xi1>
    %270 = vector.broadcast %269 : vector<16x1xi1> to vector<16x512xi1>
    %271 = vector.shape_cast %2 : vector<1x512xf32> to vector<1x512xf32>
    %272 = vector.broadcast %271 : vector<1x512xf32> to vector<16x512xf32>
    %273 = vector.shape_cast %3 : vector<1x512xf32> to vector<1x512xf32>
    %274 = vector.broadcast %273 : vector<1x512xf32> to vector<16x512xf32>
    %275 = arith.select %270, %272, %274 : vector<16x512xi1>, vector<16x512xf32>
    %276 = vector.shape_cast %266 : vector<16x1xi1> to vector<16x1xi1>
    %277 = vector.broadcast %276 : vector<16x1xi1> to vector<16x512xi1>
    %278 = vector.shape_cast %1 : vector<1x512xf32> to vector<1x512xf32>
    %279 = vector.broadcast %278 : vector<1x512xf32> to vector<16x512xf32>
    %280 = arith.select %277, %279, %275 : vector<16x512xi1>, vector<16x512xf32>
    %281 = vector.extract_strided_slice %280 {offsets = [0, 0], sizes = [8, 512], strides = [1, 1]} : vector<16x512xf32> to vector<8x512xf32>
    %cst_76 = arith.constant dense<0.000000e+00> : vector<8x512xf32>
    %282 = tpu.matmul %232, %4, %cst_76 {dimension_numbers = #tpu.dot_dimension_numbers<[1], [0], [0], [1], [0, 0, 1, 1], [], []>} : vector<8x128xf32>, vector<128x512xf32>, vector<8x512xf32> -> vector<8x512xf32>
    %283 = arith.addf %281, %282 : vector<8x512xf32>
    %284 = vector.extract_strided_slice %280 {offsets = [8, 0], sizes = [8, 512], strides = [1, 1]} : vector<16x512xf32> to vector<8x512xf32>
    %cst_77 = arith.constant dense<0.000000e+00> : vector<8x512xf32>
    %285 = tpu.matmul %263, %4, %cst_77 {dimension_numbers = #tpu.dot_dimension_numbers<[1], [0], [0], [1], [0, 0, 1, 1], [], []>} : vector<8x128xf32>, vector<128x512xf32>, vector<8x512xf32> -> vector<8x512xf32>
    %286 = arith.addf %284, %285 : vector<8x512xf32>
    %287 = vector.extract_strided_slice %283 {offsets = [0, 0], sizes = [8, 128], strides = [1, 1]} : vector<8x512xf32> to vector<8x128xf32>
    %cst_78 = arith.constant 5.000000e-01 : f32
    %288 = vector.broadcast %cst_78 : f32 to vector<8x128xf32>
    %289 = arith.mulf %288, %287 : vector<8x128xf32>
    %290 = math.tanh %289 : vector<8x128xf32>
    %cst_79 = arith.constant 5.000000e-01 : f32
    %291 = vector.broadcast %cst_79 : f32 to vector<8x128xf32>
    %292 = arith.mulf %291, %290 : vector<8x128xf32>
    %cst_80 = arith.constant 5.000000e-01 : f32
    %293 = vector.broadcast %cst_80 : f32 to vector<8x128xf32>
    %294 = arith.addf %292, %293 : vector<8x128xf32>
    %295 = vector.extract_strided_slice %283 {offsets = [0, 128], sizes = [8, 128], strides = [1, 1]} : vector<8x512xf32> to vector<8x128xf32>
    %cst_81 = arith.constant 5.000000e-01 : f32
    %296 = vector.broadcast %cst_81 : f32 to vector<8x128xf32>
    %297 = arith.mulf %296, %295 : vector<8x128xf32>
    %298 = math.tanh %297 : vector<8x128xf32>
    %cst_82 = arith.constant 5.000000e-01 : f32
    %299 = vector.broadcast %cst_82 : f32 to vector<8x128xf32>
    %300 = arith.mulf %299, %298 : vector<8x128xf32>
    %cst_83 = arith.constant 5.000000e-01 : f32
    %301 = vector.broadcast %cst_83 : f32 to vector<8x128xf32>
    %302 = arith.addf %300, %301 : vector<8x128xf32>
    %303 = vector.extract_strided_slice %283 {offsets = [0, 256], sizes = [8, 128], strides = [1, 1]} : vector<8x512xf32> to vector<8x128xf32>
    %304 = math.tanh %303 : vector<8x128xf32>
    %305 = vector.extract_strided_slice %283 {offsets = [0, 384], sizes = [8, 128], strides = [1, 1]} : vector<8x512xf32> to vector<8x128xf32>
    %cst_84 = arith.constant 5.000000e-01 : f32
    %306 = vector.broadcast %cst_84 : f32 to vector<8x128xf32>
    %307 = arith.mulf %306, %305 : vector<8x128xf32>
    %308 = math.tanh %307 : vector<8x128xf32>
    %cst_85 = arith.constant 5.000000e-01 : f32
    %309 = vector.broadcast %cst_85 : f32 to vector<8x128xf32>
    %310 = arith.mulf %309, %308 : vector<8x128xf32>
    %cst_86 = arith.constant 5.000000e-01 : f32
    %311 = vector.broadcast %cst_86 : f32 to vector<8x128xf32>
    %312 = arith.addf %310, %311 : vector<8x128xf32>
    %313 = arith.mulf %302, %230 : vector<8x128xf32>
    %314 = arith.mulf %294, %304 : vector<8x128xf32>
    %315 = arith.addf %313, %314 : vector<8x128xf32>
    %316 = math.tanh %315 : vector<8x128xf32>
    %317 = arith.mulf %312, %316 : vector<8x128xf32>
    %318 = vector.extract_strided_slice %286 {offsets = [0, 0], sizes = [8, 128], strides = [1, 1]} : vector<8x512xf32> to vector<8x128xf32>
    %cst_87 = arith.constant 5.000000e-01 : f32
    %319 = vector.broadcast %cst_87 : f32 to vector<8x128xf32>
    %320 = arith.mulf %319, %318 : vector<8x128xf32>
    %321 = math.tanh %320 : vector<8x128xf32>
    %cst_88 = arith.constant 5.000000e-01 : f32
    %322 = vector.broadcast %cst_88 : f32 to vector<8x128xf32>
    %323 = arith.mulf %322, %321 : vector<8x128xf32>
    %cst_89 = arith.constant 5.000000e-01 : f32
    %324 = vector.broadcast %cst_89 : f32 to vector<8x128xf32>
    %325 = arith.addf %323, %324 : vector<8x128xf32>
    %326 = vector.extract_strided_slice %286 {offsets = [0, 128], sizes = [8, 128], strides = [1, 1]} : vector<8x512xf32> to vector<8x128xf32>
    %cst_90 = arith.constant 5.000000e-01 : f32
    %327 = vector.broadcast %cst_90 : f32 to vector<8x128xf32>
    %328 = arith.mulf %327, %326 : vector<8x128xf32>
    %329 = math.tanh %328 : vector<8x128xf32>
    %cst_91 = arith.constant 5.000000e-01 : f32
    %330 = vector.broadcast %cst_91 : f32 to vector<8x128xf32>
    %331 = arith.mulf %330, %329 : vector<8x128xf32>
    %cst_92 = arith.constant 5.000000e-01 : f32
    %332 = vector.broadcast %cst_92 : f32 to vector<8x128xf32>
    %333 = arith.addf %331, %332 : vector<8x128xf32>
    %334 = vector.extract_strided_slice %286 {offsets = [0, 256], sizes = [8, 128], strides = [1, 1]} : vector<8x512xf32> to vector<8x128xf32>
    %335 = math.tanh %334 : vector<8x128xf32>
    %336 = vector.extract_strided_slice %286 {offsets = [0, 384], sizes = [8, 128], strides = [1, 1]} : vector<8x512xf32> to vector<8x128xf32>
    %cst_93 = arith.constant 5.000000e-01 : f32
    %337 = vector.broadcast %cst_93 : f32 to vector<8x128xf32>
    %338 = arith.mulf %337, %336 : vector<8x128xf32>
    %339 = math.tanh %338 : vector<8x128xf32>
    %cst_94 = arith.constant 5.000000e-01 : f32
    %340 = vector.broadcast %cst_94 : f32 to vector<8x128xf32>
    %341 = arith.mulf %340, %339 : vector<8x128xf32>
    %cst_95 = arith.constant 5.000000e-01 : f32
    %342 = vector.broadcast %cst_95 : f32 to vector<8x128xf32>
    %343 = arith.addf %341, %342 : vector<8x128xf32>
    %344 = arith.mulf %333, %261 : vector<8x128xf32>
    %345 = arith.mulf %325, %335 : vector<8x128xf32>
    %346 = arith.addf %344, %345 : vector<8x128xf32>
    %347 = math.tanh %346 : vector<8x128xf32>
    %348 = arith.mulf %343, %347 : vector<8x128xf32>
    %349 = vector.extract_strided_slice %0 {offsets = [0, 4], sizes = [16, 1], strides = [1, 1]} : vector<16x8xi32> to vector<16x1xi32>
    %c0_i32_96 = arith.constant 0 : i32
    %350 = vector.broadcast %c0_i32_96 : i32 to vector<16x1xi32>
    %351 = arith.cmpi eq, %349, %350 : vector<16x1xi32>
    %c1_i32_97 = arith.constant 1 : i32
    %352 = vector.broadcast %c1_i32_97 : i32 to vector<16x1xi32>
    %353 = arith.cmpi eq, %349, %352 : vector<16x1xi32>
    %354 = vector.shape_cast %353 : vector<16x1xi1> to vector<16x1xi1>
    %355 = vector.broadcast %354 : vector<16x1xi1> to vector<16x512xi1>
    %356 = vector.shape_cast %2 : vector<1x512xf32> to vector<1x512xf32>
    %357 = vector.broadcast %356 : vector<1x512xf32> to vector<16x512xf32>
    %358 = vector.shape_cast %3 : vector<1x512xf32> to vector<1x512xf32>
    %359 = vector.broadcast %358 : vector<1x512xf32> to vector<16x512xf32>
    %360 = arith.select %355, %357, %359 : vector<16x512xi1>, vector<16x512xf32>
    %361 = vector.shape_cast %351 : vector<16x1xi1> to vector<16x1xi1>
    %362 = vector.broadcast %361 : vector<16x1xi1> to vector<16x512xi1>
    %363 = vector.shape_cast %1 : vector<1x512xf32> to vector<1x512xf32>
    %364 = vector.broadcast %363 : vector<1x512xf32> to vector<16x512xf32>
    %365 = arith.select %362, %364, %360 : vector<16x512xi1>, vector<16x512xf32>
    %366 = vector.extract_strided_slice %365 {offsets = [0, 0], sizes = [8, 512], strides = [1, 1]} : vector<16x512xf32> to vector<8x512xf32>
    %cst_98 = arith.constant dense<0.000000e+00> : vector<8x512xf32>
    %367 = tpu.matmul %317, %4, %cst_98 {dimension_numbers = #tpu.dot_dimension_numbers<[1], [0], [0], [1], [0, 0, 1, 1], [], []>} : vector<8x128xf32>, vector<128x512xf32>, vector<8x512xf32> -> vector<8x512xf32>
    %368 = arith.addf %366, %367 : vector<8x512xf32>
    %369 = vector.extract_strided_slice %365 {offsets = [8, 0], sizes = [8, 512], strides = [1, 1]} : vector<16x512xf32> to vector<8x512xf32>
    %cst_99 = arith.constant dense<0.000000e+00> : vector<8x512xf32>
    %370 = tpu.matmul %348, %4, %cst_99 {dimension_numbers = #tpu.dot_dimension_numbers<[1], [0], [0], [1], [0, 0, 1, 1], [], []>} : vector<8x128xf32>, vector<128x512xf32>, vector<8x512xf32> -> vector<8x512xf32>
    %371 = arith.addf %369, %370 : vector<8x512xf32>
    %372 = vector.extract_strided_slice %368 {offsets = [0, 0], sizes = [8, 128], strides = [1, 1]} : vector<8x512xf32> to vector<8x128xf32>
    %cst_100 = arith.constant 5.000000e-01 : f32
    %373 = vector.broadcast %cst_100 : f32 to vector<8x128xf32>
    %374 = arith.mulf %373, %372 : vector<8x128xf32>
    %375 = math.tanh %374 : vector<8x128xf32>
    %cst_101 = arith.constant 5.000000e-01 : f32
    %376 = vector.broadcast %cst_101 : f32 to vector<8x128xf32>
    %377 = arith.mulf %376, %375 : vector<8x128xf32>
    %cst_102 = arith.constant 5.000000e-01 : f32
    %378 = vector.broadcast %cst_102 : f32 to vector<8x128xf32>
    %379 = arith.addf %377, %378 : vector<8x128xf32>
    %380 = vector.extract_strided_slice %368 {offsets = [0, 128], sizes = [8, 128], strides = [1, 1]} : vector<8x512xf32> to vector<8x128xf32>
    %cst_103 = arith.constant 5.000000e-01 : f32
    %381 = vector.broadcast %cst_103 : f32 to vector<8x128xf32>
    %382 = arith.mulf %381, %380 : vector<8x128xf32>
    %383 = math.tanh %382 : vector<8x128xf32>
    %cst_104 = arith.constant 5.000000e-01 : f32
    %384 = vector.broadcast %cst_104 : f32 to vector<8x128xf32>
    %385 = arith.mulf %384, %383 : vector<8x128xf32>
    %cst_105 = arith.constant 5.000000e-01 : f32
    %386 = vector.broadcast %cst_105 : f32 to vector<8x128xf32>
    %387 = arith.addf %385, %386 : vector<8x128xf32>
    %388 = vector.extract_strided_slice %368 {offsets = [0, 256], sizes = [8, 128], strides = [1, 1]} : vector<8x512xf32> to vector<8x128xf32>
    %389 = math.tanh %388 : vector<8x128xf32>
    %390 = vector.extract_strided_slice %368 {offsets = [0, 384], sizes = [8, 128], strides = [1, 1]} : vector<8x512xf32> to vector<8x128xf32>
    %cst_106 = arith.constant 5.000000e-01 : f32
    %391 = vector.broadcast %cst_106 : f32 to vector<8x128xf32>
    %392 = arith.mulf %391, %390 : vector<8x128xf32>
    %393 = math.tanh %392 : vector<8x128xf32>
    %cst_107 = arith.constant 5.000000e-01 : f32
    %394 = vector.broadcast %cst_107 : f32 to vector<8x128xf32>
    %395 = arith.mulf %394, %393 : vector<8x128xf32>
    %cst_108 = arith.constant 5.000000e-01 : f32
    %396 = vector.broadcast %cst_108 : f32 to vector<8x128xf32>
    %397 = arith.addf %395, %396 : vector<8x128xf32>
    %398 = arith.mulf %387, %315 : vector<8x128xf32>
    %399 = arith.mulf %379, %389 : vector<8x128xf32>
    %400 = arith.addf %398, %399 : vector<8x128xf32>
    %401 = math.tanh %400 : vector<8x128xf32>
    %402 = arith.mulf %397, %401 : vector<8x128xf32>
    %403 = vector.extract_strided_slice %371 {offsets = [0, 0], sizes = [8, 128], strides = [1, 1]} : vector<8x512xf32> to vector<8x128xf32>
    %cst_109 = arith.constant 5.000000e-01 : f32
    %404 = vector.broadcast %cst_109 : f32 to vector<8x128xf32>
    %405 = arith.mulf %404, %403 : vector<8x128xf32>
    %406 = math.tanh %405 : vector<8x128xf32>
    %cst_110 = arith.constant 5.000000e-01 : f32
    %407 = vector.broadcast %cst_110 : f32 to vector<8x128xf32>
    %408 = arith.mulf %407, %406 : vector<8x128xf32>
    %cst_111 = arith.constant 5.000000e-01 : f32
    %409 = vector.broadcast %cst_111 : f32 to vector<8x128xf32>
    %410 = arith.addf %408, %409 : vector<8x128xf32>
    %411 = vector.extract_strided_slice %371 {offsets = [0, 128], sizes = [8, 128], strides = [1, 1]} : vector<8x512xf32> to vector<8x128xf32>
    %cst_112 = arith.constant 5.000000e-01 : f32
    %412 = vector.broadcast %cst_112 : f32 to vector<8x128xf32>
    %413 = arith.mulf %412, %411 : vector<8x128xf32>
    %414 = math.tanh %413 : vector<8x128xf32>
    %cst_113 = arith.constant 5.000000e-01 : f32
    %415 = vector.broadcast %cst_113 : f32 to vector<8x128xf32>
    %416 = arith.mulf %415, %414 : vector<8x128xf32>
    %cst_114 = arith.constant 5.000000e-01 : f32
    %417 = vector.broadcast %cst_114 : f32 to vector<8x128xf32>
    %418 = arith.addf %416, %417 : vector<8x128xf32>
    %419 = vector.extract_strided_slice %371 {offsets = [0, 256], sizes = [8, 128], strides = [1, 1]} : vector<8x512xf32> to vector<8x128xf32>
    %420 = math.tanh %419 : vector<8x128xf32>
    %421 = vector.extract_strided_slice %371 {offsets = [0, 384], sizes = [8, 128], strides = [1, 1]} : vector<8x512xf32> to vector<8x128xf32>
    %cst_115 = arith.constant 5.000000e-01 : f32
    %422 = vector.broadcast %cst_115 : f32 to vector<8x128xf32>
    %423 = arith.mulf %422, %421 : vector<8x128xf32>
    %424 = math.tanh %423 : vector<8x128xf32>
    %cst_116 = arith.constant 5.000000e-01 : f32
    %425 = vector.broadcast %cst_116 : f32 to vector<8x128xf32>
    %426 = arith.mulf %425, %424 : vector<8x128xf32>
    %cst_117 = arith.constant 5.000000e-01 : f32
    %427 = vector.broadcast %cst_117 : f32 to vector<8x128xf32>
    %428 = arith.addf %426, %427 : vector<8x128xf32>
    %429 = arith.mulf %418, %346 : vector<8x128xf32>
    %430 = arith.mulf %410, %420 : vector<8x128xf32>
    %431 = arith.addf %429, %430 : vector<8x128xf32>
    %432 = math.tanh %431 : vector<8x128xf32>
    %433 = arith.mulf %428, %432 : vector<8x128xf32>
    %434 = vector.extract_strided_slice %0 {offsets = [0, 5], sizes = [16, 1], strides = [1, 1]} : vector<16x8xi32> to vector<16x1xi32>
    %c0_i32_118 = arith.constant 0 : i32
    %435 = vector.broadcast %c0_i32_118 : i32 to vector<16x1xi32>
    %436 = arith.cmpi eq, %434, %435 : vector<16x1xi32>
    %c1_i32_119 = arith.constant 1 : i32
    %437 = vector.broadcast %c1_i32_119 : i32 to vector<16x1xi32>
    %438 = arith.cmpi eq, %434, %437 : vector<16x1xi32>
    %439 = vector.shape_cast %438 : vector<16x1xi1> to vector<16x1xi1>
    %440 = vector.broadcast %439 : vector<16x1xi1> to vector<16x512xi1>
    %441 = vector.shape_cast %2 : vector<1x512xf32> to vector<1x512xf32>
    %442 = vector.broadcast %441 : vector<1x512xf32> to vector<16x512xf32>
    %443 = vector.shape_cast %3 : vector<1x512xf32> to vector<1x512xf32>
    %444 = vector.broadcast %443 : vector<1x512xf32> to vector<16x512xf32>
    %445 = arith.select %440, %442, %444 : vector<16x512xi1>, vector<16x512xf32>
    %446 = vector.shape_cast %436 : vector<16x1xi1> to vector<16x1xi1>
    %447 = vector.broadcast %446 : vector<16x1xi1> to vector<16x512xi1>
    %448 = vector.shape_cast %1 : vector<1x512xf32> to vector<1x512xf32>
    %449 = vector.broadcast %448 : vector<1x512xf32> to vector<16x512xf32>
    %450 = arith.select %447, %449, %445 : vector<16x512xi1>, vector<16x512xf32>
    %451 = vector.extract_strided_slice %450 {offsets = [0, 0], sizes = [8, 512], strides = [1, 1]} : vector<16x512xf32> to vector<8x512xf32>
    %cst_120 = arith.constant dense<0.000000e+00> : vector<8x512xf32>
    %452 = tpu.matmul %402, %4, %cst_120 {dimension_numbers = #tpu.dot_dimension_numbers<[1], [0], [0], [1], [0, 0, 1, 1], [], []>} : vector<8x128xf32>, vector<128x512xf32>, vector<8x512xf32> -> vector<8x512xf32>
    %453 = arith.addf %451, %452 : vector<8x512xf32>
    %454 = vector.extract_strided_slice %450 {offsets = [8, 0], sizes = [8, 512], strides = [1, 1]} : vector<16x512xf32> to vector<8x512xf32>
    %cst_121 = arith.constant dense<0.000000e+00> : vector<8x512xf32>
    %455 = tpu.matmul %433, %4, %cst_121 {dimension_numbers = #tpu.dot_dimension_numbers<[1], [0], [0], [1], [0, 0, 1, 1], [], []>} : vector<8x128xf32>, vector<128x512xf32>, vector<8x512xf32> -> vector<8x512xf32>
    %456 = arith.addf %454, %455 : vector<8x512xf32>
    %457 = vector.extract_strided_slice %453 {offsets = [0, 0], sizes = [8, 128], strides = [1, 1]} : vector<8x512xf32> to vector<8x128xf32>
    %cst_122 = arith.constant 5.000000e-01 : f32
    %458 = vector.broadcast %cst_122 : f32 to vector<8x128xf32>
    %459 = arith.mulf %458, %457 : vector<8x128xf32>
    %460 = math.tanh %459 : vector<8x128xf32>
    %cst_123 = arith.constant 5.000000e-01 : f32
    %461 = vector.broadcast %cst_123 : f32 to vector<8x128xf32>
    %462 = arith.mulf %461, %460 : vector<8x128xf32>
    %cst_124 = arith.constant 5.000000e-01 : f32
    %463 = vector.broadcast %cst_124 : f32 to vector<8x128xf32>
    %464 = arith.addf %462, %463 : vector<8x128xf32>
    %465 = vector.extract_strided_slice %453 {offsets = [0, 128], sizes = [8, 128], strides = [1, 1]} : vector<8x512xf32> to vector<8x128xf32>
    %cst_125 = arith.constant 5.000000e-01 : f32
    %466 = vector.broadcast %cst_125 : f32 to vector<8x128xf32>
    %467 = arith.mulf %466, %465 : vector<8x128xf32>
    %468 = math.tanh %467 : vector<8x128xf32>
    %cst_126 = arith.constant 5.000000e-01 : f32
    %469 = vector.broadcast %cst_126 : f32 to vector<8x128xf32>
    %470 = arith.mulf %469, %468 : vector<8x128xf32>
    %cst_127 = arith.constant 5.000000e-01 : f32
    %471 = vector.broadcast %cst_127 : f32 to vector<8x128xf32>
    %472 = arith.addf %470, %471 : vector<8x128xf32>
    %473 = vector.extract_strided_slice %453 {offsets = [0, 256], sizes = [8, 128], strides = [1, 1]} : vector<8x512xf32> to vector<8x128xf32>
    %474 = math.tanh %473 : vector<8x128xf32>
    %475 = vector.extract_strided_slice %453 {offsets = [0, 384], sizes = [8, 128], strides = [1, 1]} : vector<8x512xf32> to vector<8x128xf32>
    %cst_128 = arith.constant 5.000000e-01 : f32
    %476 = vector.broadcast %cst_128 : f32 to vector<8x128xf32>
    %477 = arith.mulf %476, %475 : vector<8x128xf32>
    %478 = math.tanh %477 : vector<8x128xf32>
    %cst_129 = arith.constant 5.000000e-01 : f32
    %479 = vector.broadcast %cst_129 : f32 to vector<8x128xf32>
    %480 = arith.mulf %479, %478 : vector<8x128xf32>
    %cst_130 = arith.constant 5.000000e-01 : f32
    %481 = vector.broadcast %cst_130 : f32 to vector<8x128xf32>
    %482 = arith.addf %480, %481 : vector<8x128xf32>
    %483 = arith.mulf %472, %400 : vector<8x128xf32>
    %484 = arith.mulf %464, %474 : vector<8x128xf32>
    %485 = arith.addf %483, %484 : vector<8x128xf32>
    %486 = math.tanh %485 : vector<8x128xf32>
    %487 = arith.mulf %482, %486 : vector<8x128xf32>
    %488 = vector.extract_strided_slice %456 {offsets = [0, 0], sizes = [8, 128], strides = [1, 1]} : vector<8x512xf32> to vector<8x128xf32>
    %cst_131 = arith.constant 5.000000e-01 : f32
    %489 = vector.broadcast %cst_131 : f32 to vector<8x128xf32>
    %490 = arith.mulf %489, %488 : vector<8x128xf32>
    %491 = math.tanh %490 : vector<8x128xf32>
    %cst_132 = arith.constant 5.000000e-01 : f32
    %492 = vector.broadcast %cst_132 : f32 to vector<8x128xf32>
    %493 = arith.mulf %492, %491 : vector<8x128xf32>
    %cst_133 = arith.constant 5.000000e-01 : f32
    %494 = vector.broadcast %cst_133 : f32 to vector<8x128xf32>
    %495 = arith.addf %493, %494 : vector<8x128xf32>
    %496 = vector.extract_strided_slice %456 {offsets = [0, 128], sizes = [8, 128], strides = [1, 1]} : vector<8x512xf32> to vector<8x128xf32>
    %cst_134 = arith.constant 5.000000e-01 : f32
    %497 = vector.broadcast %cst_134 : f32 to vector<8x128xf32>
    %498 = arith.mulf %497, %496 : vector<8x128xf32>
    %499 = math.tanh %498 : vector<8x128xf32>
    %cst_135 = arith.constant 5.000000e-01 : f32
    %500 = vector.broadcast %cst_135 : f32 to vector<8x128xf32>
    %501 = arith.mulf %500, %499 : vector<8x128xf32>
    %cst_136 = arith.constant 5.000000e-01 : f32
    %502 = vector.broadcast %cst_136 : f32 to vector<8x128xf32>
    %503 = arith.addf %501, %502 : vector<8x128xf32>
    %504 = vector.extract_strided_slice %456 {offsets = [0, 256], sizes = [8, 128], strides = [1, 1]} : vector<8x512xf32> to vector<8x128xf32>
    %505 = math.tanh %504 : vector<8x128xf32>
    %506 = vector.extract_strided_slice %456 {offsets = [0, 384], sizes = [8, 128], strides = [1, 1]} : vector<8x512xf32> to vector<8x128xf32>
    %cst_137 = arith.constant 5.000000e-01 : f32
    %507 = vector.broadcast %cst_137 : f32 to vector<8x128xf32>
    %508 = arith.mulf %507, %506 : vector<8x128xf32>
    %509 = math.tanh %508 : vector<8x128xf32>
    %cst_138 = arith.constant 5.000000e-01 : f32
    %510 = vector.broadcast %cst_138 : f32 to vector<8x128xf32>
    %511 = arith.mulf %510, %509 : vector<8x128xf32>
    %cst_139 = arith.constant 5.000000e-01 : f32
    %512 = vector.broadcast %cst_139 : f32 to vector<8x128xf32>
    %513 = arith.addf %511, %512 : vector<8x128xf32>
    %514 = arith.mulf %503, %431 : vector<8x128xf32>
    %515 = arith.mulf %495, %505 : vector<8x128xf32>
    %516 = arith.addf %514, %515 : vector<8x128xf32>
    %517 = math.tanh %516 : vector<8x128xf32>
    %518 = arith.mulf %513, %517 : vector<8x128xf32>
    %519 = vector.extract_strided_slice %0 {offsets = [0, 6], sizes = [16, 1], strides = [1, 1]} : vector<16x8xi32> to vector<16x1xi32>
    %c0_i32_140 = arith.constant 0 : i32
    %520 = vector.broadcast %c0_i32_140 : i32 to vector<16x1xi32>
    %521 = arith.cmpi eq, %519, %520 : vector<16x1xi32>
    %c1_i32_141 = arith.constant 1 : i32
    %522 = vector.broadcast %c1_i32_141 : i32 to vector<16x1xi32>
    %523 = arith.cmpi eq, %519, %522 : vector<16x1xi32>
    %524 = vector.shape_cast %523 : vector<16x1xi1> to vector<16x1xi1>
    %525 = vector.broadcast %524 : vector<16x1xi1> to vector<16x512xi1>
    %526 = vector.shape_cast %2 : vector<1x512xf32> to vector<1x512xf32>
    %527 = vector.broadcast %526 : vector<1x512xf32> to vector<16x512xf32>
    %528 = vector.shape_cast %3 : vector<1x512xf32> to vector<1x512xf32>
    %529 = vector.broadcast %528 : vector<1x512xf32> to vector<16x512xf32>
    %530 = arith.select %525, %527, %529 : vector<16x512xi1>, vector<16x512xf32>
    %531 = vector.shape_cast %521 : vector<16x1xi1> to vector<16x1xi1>
    %532 = vector.broadcast %531 : vector<16x1xi1> to vector<16x512xi1>
    %533 = vector.shape_cast %1 : vector<1x512xf32> to vector<1x512xf32>
    %534 = vector.broadcast %533 : vector<1x512xf32> to vector<16x512xf32>
    %535 = arith.select %532, %534, %530 : vector<16x512xi1>, vector<16x512xf32>
    %536 = vector.extract_strided_slice %535 {offsets = [0, 0], sizes = [8, 512], strides = [1, 1]} : vector<16x512xf32> to vector<8x512xf32>
    %cst_142 = arith.constant dense<0.000000e+00> : vector<8x512xf32>
    %537 = tpu.matmul %487, %4, %cst_142 {dimension_numbers = #tpu.dot_dimension_numbers<[1], [0], [0], [1], [0, 0, 1, 1], [], []>} : vector<8x128xf32>, vector<128x512xf32>, vector<8x512xf32> -> vector<8x512xf32>
    %538 = arith.addf %536, %537 : vector<8x512xf32>
    %539 = vector.extract_strided_slice %535 {offsets = [8, 0], sizes = [8, 512], strides = [1, 1]} : vector<16x512xf32> to vector<8x512xf32>
    %cst_143 = arith.constant dense<0.000000e+00> : vector<8x512xf32>
    %540 = tpu.matmul %518, %4, %cst_143 {dimension_numbers = #tpu.dot_dimension_numbers<[1], [0], [0], [1], [0, 0, 1, 1], [], []>} : vector<8x128xf32>, vector<128x512xf32>, vector<8x512xf32> -> vector<8x512xf32>
    %541 = arith.addf %539, %540 : vector<8x512xf32>
    %542 = vector.extract_strided_slice %538 {offsets = [0, 0], sizes = [8, 128], strides = [1, 1]} : vector<8x512xf32> to vector<8x128xf32>
    %cst_144 = arith.constant 5.000000e-01 : f32
    %543 = vector.broadcast %cst_144 : f32 to vector<8x128xf32>
    %544 = arith.mulf %543, %542 : vector<8x128xf32>
    %545 = math.tanh %544 : vector<8x128xf32>
    %cst_145 = arith.constant 5.000000e-01 : f32
    %546 = vector.broadcast %cst_145 : f32 to vector<8x128xf32>
    %547 = arith.mulf %546, %545 : vector<8x128xf32>
    %cst_146 = arith.constant 5.000000e-01 : f32
    %548 = vector.broadcast %cst_146 : f32 to vector<8x128xf32>
    %549 = arith.addf %547, %548 : vector<8x128xf32>
    %550 = vector.extract_strided_slice %538 {offsets = [0, 128], sizes = [8, 128], strides = [1, 1]} : vector<8x512xf32> to vector<8x128xf32>
    %cst_147 = arith.constant 5.000000e-01 : f32
    %551 = vector.broadcast %cst_147 : f32 to vector<8x128xf32>
    %552 = arith.mulf %551, %550 : vector<8x128xf32>
    %553 = math.tanh %552 : vector<8x128xf32>
    %cst_148 = arith.constant 5.000000e-01 : f32
    %554 = vector.broadcast %cst_148 : f32 to vector<8x128xf32>
    %555 = arith.mulf %554, %553 : vector<8x128xf32>
    %cst_149 = arith.constant 5.000000e-01 : f32
    %556 = vector.broadcast %cst_149 : f32 to vector<8x128xf32>
    %557 = arith.addf %555, %556 : vector<8x128xf32>
    %558 = vector.extract_strided_slice %538 {offsets = [0, 256], sizes = [8, 128], strides = [1, 1]} : vector<8x512xf32> to vector<8x128xf32>
    %559 = math.tanh %558 : vector<8x128xf32>
    %560 = vector.extract_strided_slice %538 {offsets = [0, 384], sizes = [8, 128], strides = [1, 1]} : vector<8x512xf32> to vector<8x128xf32>
    %cst_150 = arith.constant 5.000000e-01 : f32
    %561 = vector.broadcast %cst_150 : f32 to vector<8x128xf32>
    %562 = arith.mulf %561, %560 : vector<8x128xf32>
    %563 = math.tanh %562 : vector<8x128xf32>
    %cst_151 = arith.constant 5.000000e-01 : f32
    %564 = vector.broadcast %cst_151 : f32 to vector<8x128xf32>
    %565 = arith.mulf %564, %563 : vector<8x128xf32>
    %cst_152 = arith.constant 5.000000e-01 : f32
    %566 = vector.broadcast %cst_152 : f32 to vector<8x128xf32>
    %567 = arith.addf %565, %566 : vector<8x128xf32>
    %568 = arith.mulf %557, %485 : vector<8x128xf32>
    %569 = arith.mulf %549, %559 : vector<8x128xf32>
    %570 = arith.addf %568, %569 : vector<8x128xf32>
    %571 = math.tanh %570 : vector<8x128xf32>
    %572 = arith.mulf %567, %571 : vector<8x128xf32>
    %573 = vector.extract_strided_slice %541 {offsets = [0, 0], sizes = [8, 128], strides = [1, 1]} : vector<8x512xf32> to vector<8x128xf32>
    %cst_153 = arith.constant 5.000000e-01 : f32
    %574 = vector.broadcast %cst_153 : f32 to vector<8x128xf32>
    %575 = arith.mulf %574, %573 : vector<8x128xf32>
    %576 = math.tanh %575 : vector<8x128xf32>
    %cst_154 = arith.constant 5.000000e-01 : f32
    %577 = vector.broadcast %cst_154 : f32 to vector<8x128xf32>
    %578 = arith.mulf %577, %576 : vector<8x128xf32>
    %cst_155 = arith.constant 5.000000e-01 : f32
    %579 = vector.broadcast %cst_155 : f32 to vector<8x128xf32>
    %580 = arith.addf %578, %579 : vector<8x128xf32>
    %581 = vector.extract_strided_slice %541 {offsets = [0, 128], sizes = [8, 128], strides = [1, 1]} : vector<8x512xf32> to vector<8x128xf32>
    %cst_156 = arith.constant 5.000000e-01 : f32
    %582 = vector.broadcast %cst_156 : f32 to vector<8x128xf32>
    %583 = arith.mulf %582, %581 : vector<8x128xf32>
    %584 = math.tanh %583 : vector<8x128xf32>
    %cst_157 = arith.constant 5.000000e-01 : f32
    %585 = vector.broadcast %cst_157 : f32 to vector<8x128xf32>
    %586 = arith.mulf %585, %584 : vector<8x128xf32>
    %cst_158 = arith.constant 5.000000e-01 : f32
    %587 = vector.broadcast %cst_158 : f32 to vector<8x128xf32>
    %588 = arith.addf %586, %587 : vector<8x128xf32>
    %589 = vector.extract_strided_slice %541 {offsets = [0, 256], sizes = [8, 128], strides = [1, 1]} : vector<8x512xf32> to vector<8x128xf32>
    %590 = math.tanh %589 : vector<8x128xf32>
    %591 = vector.extract_strided_slice %541 {offsets = [0, 384], sizes = [8, 128], strides = [1, 1]} : vector<8x512xf32> to vector<8x128xf32>
    %cst_159 = arith.constant 5.000000e-01 : f32
    %592 = vector.broadcast %cst_159 : f32 to vector<8x128xf32>
    %593 = arith.mulf %592, %591 : vector<8x128xf32>
    %594 = math.tanh %593 : vector<8x128xf32>
    %cst_160 = arith.constant 5.000000e-01 : f32
    %595 = vector.broadcast %cst_160 : f32 to vector<8x128xf32>
    %596 = arith.mulf %595, %594 : vector<8x128xf32>
    %cst_161 = arith.constant 5.000000e-01 : f32
    %597 = vector.broadcast %cst_161 : f32 to vector<8x128xf32>
    %598 = arith.addf %596, %597 : vector<8x128xf32>
    %599 = arith.mulf %588, %516 : vector<8x128xf32>
    %600 = arith.mulf %580, %590 : vector<8x128xf32>
    %601 = arith.addf %599, %600 : vector<8x128xf32>
    %602 = math.tanh %601 : vector<8x128xf32>
    %603 = arith.mulf %598, %602 : vector<8x128xf32>
    %604 = vector.extract_strided_slice %0 {offsets = [0, 7], sizes = [16, 1], strides = [1, 1]} : vector<16x8xi32> to vector<16x1xi32>
    %c0_i32_162 = arith.constant 0 : i32
    %605 = vector.broadcast %c0_i32_162 : i32 to vector<16x1xi32>
    %606 = arith.cmpi eq, %604, %605 : vector<16x1xi32>
    %c1_i32_163 = arith.constant 1 : i32
    %607 = vector.broadcast %c1_i32_163 : i32 to vector<16x1xi32>
    %608 = arith.cmpi eq, %604, %607 : vector<16x1xi32>
    %609 = vector.shape_cast %608 : vector<16x1xi1> to vector<16x1xi1>
    %610 = vector.broadcast %609 : vector<16x1xi1> to vector<16x512xi1>
    %611 = vector.shape_cast %2 : vector<1x512xf32> to vector<1x512xf32>
    %612 = vector.broadcast %611 : vector<1x512xf32> to vector<16x512xf32>
    %613 = vector.shape_cast %3 : vector<1x512xf32> to vector<1x512xf32>
    %614 = vector.broadcast %613 : vector<1x512xf32> to vector<16x512xf32>
    %615 = arith.select %610, %612, %614 : vector<16x512xi1>, vector<16x512xf32>
    %616 = vector.shape_cast %606 : vector<16x1xi1> to vector<16x1xi1>
    %617 = vector.broadcast %616 : vector<16x1xi1> to vector<16x512xi1>
    %618 = vector.shape_cast %1 : vector<1x512xf32> to vector<1x512xf32>
    %619 = vector.broadcast %618 : vector<1x512xf32> to vector<16x512xf32>
    %620 = arith.select %617, %619, %615 : vector<16x512xi1>, vector<16x512xf32>
    %621 = vector.extract_strided_slice %620 {offsets = [0, 0], sizes = [8, 512], strides = [1, 1]} : vector<16x512xf32> to vector<8x512xf32>
    %cst_164 = arith.constant dense<0.000000e+00> : vector<8x512xf32>
    %622 = tpu.matmul %572, %4, %cst_164 {dimension_numbers = #tpu.dot_dimension_numbers<[1], [0], [0], [1], [0, 0, 1, 1], [], []>} : vector<8x128xf32>, vector<128x512xf32>, vector<8x512xf32> -> vector<8x512xf32>
    %623 = arith.addf %621, %622 : vector<8x512xf32>
    %624 = vector.extract_strided_slice %620 {offsets = [8, 0], sizes = [8, 512], strides = [1, 1]} : vector<16x512xf32> to vector<8x512xf32>
    %cst_165 = arith.constant dense<0.000000e+00> : vector<8x512xf32>
    %625 = tpu.matmul %603, %4, %cst_165 {dimension_numbers = #tpu.dot_dimension_numbers<[1], [0], [0], [1], [0, 0, 1, 1], [], []>} : vector<8x128xf32>, vector<128x512xf32>, vector<8x512xf32> -> vector<8x512xf32>
    %626 = arith.addf %624, %625 : vector<8x512xf32>
    %627 = vector.extract_strided_slice %623 {offsets = [0, 0], sizes = [8, 128], strides = [1, 1]} : vector<8x512xf32> to vector<8x128xf32>
    %cst_166 = arith.constant 5.000000e-01 : f32
    %628 = vector.broadcast %cst_166 : f32 to vector<8x128xf32>
    %629 = arith.mulf %628, %627 : vector<8x128xf32>
    %630 = math.tanh %629 : vector<8x128xf32>
    %cst_167 = arith.constant 5.000000e-01 : f32
    %631 = vector.broadcast %cst_167 : f32 to vector<8x128xf32>
    %632 = arith.mulf %631, %630 : vector<8x128xf32>
    %cst_168 = arith.constant 5.000000e-01 : f32
    %633 = vector.broadcast %cst_168 : f32 to vector<8x128xf32>
    %634 = arith.addf %632, %633 : vector<8x128xf32>
    %635 = vector.extract_strided_slice %623 {offsets = [0, 128], sizes = [8, 128], strides = [1, 1]} : vector<8x512xf32> to vector<8x128xf32>
    %cst_169 = arith.constant 5.000000e-01 : f32
    %636 = vector.broadcast %cst_169 : f32 to vector<8x128xf32>
    %637 = arith.mulf %636, %635 : vector<8x128xf32>
    %638 = math.tanh %637 : vector<8x128xf32>
    %cst_170 = arith.constant 5.000000e-01 : f32
    %639 = vector.broadcast %cst_170 : f32 to vector<8x128xf32>
    %640 = arith.mulf %639, %638 : vector<8x128xf32>
    %cst_171 = arith.constant 5.000000e-01 : f32
    %641 = vector.broadcast %cst_171 : f32 to vector<8x128xf32>
    %642 = arith.addf %640, %641 : vector<8x128xf32>
    %643 = vector.extract_strided_slice %623 {offsets = [0, 256], sizes = [8, 128], strides = [1, 1]} : vector<8x512xf32> to vector<8x128xf32>
    %644 = math.tanh %643 : vector<8x128xf32>
    %645 = vector.extract_strided_slice %623 {offsets = [0, 384], sizes = [8, 128], strides = [1, 1]} : vector<8x512xf32> to vector<8x128xf32>
    %cst_172 = arith.constant 5.000000e-01 : f32
    %646 = vector.broadcast %cst_172 : f32 to vector<8x128xf32>
    %647 = arith.mulf %646, %645 : vector<8x128xf32>
    %648 = math.tanh %647 : vector<8x128xf32>
    %cst_173 = arith.constant 5.000000e-01 : f32
    %649 = vector.broadcast %cst_173 : f32 to vector<8x128xf32>
    %650 = arith.mulf %649, %648 : vector<8x128xf32>
    %cst_174 = arith.constant 5.000000e-01 : f32
    %651 = vector.broadcast %cst_174 : f32 to vector<8x128xf32>
    %652 = arith.addf %650, %651 : vector<8x128xf32>
    %653 = arith.mulf %642, %570 : vector<8x128xf32>
    %654 = arith.mulf %634, %644 : vector<8x128xf32>
    %655 = arith.addf %653, %654 : vector<8x128xf32>
    %656 = math.tanh %655 : vector<8x128xf32>
    %657 = arith.mulf %652, %656 : vector<8x128xf32>
    %658 = vector.extract_strided_slice %626 {offsets = [0, 0], sizes = [8, 128], strides = [1, 1]} : vector<8x512xf32> to vector<8x128xf32>
    %cst_175 = arith.constant 5.000000e-01 : f32
    %659 = vector.broadcast %cst_175 : f32 to vector<8x128xf32>
    %660 = arith.mulf %659, %658 : vector<8x128xf32>
    %661 = math.tanh %660 : vector<8x128xf32>
    %cst_176 = arith.constant 5.000000e-01 : f32
    %662 = vector.broadcast %cst_176 : f32 to vector<8x128xf32>
    %663 = arith.mulf %662, %661 : vector<8x128xf32>
    %cst_177 = arith.constant 5.000000e-01 : f32
    %664 = vector.broadcast %cst_177 : f32 to vector<8x128xf32>
    %665 = arith.addf %663, %664 : vector<8x128xf32>
    %666 = vector.extract_strided_slice %626 {offsets = [0, 128], sizes = [8, 128], strides = [1, 1]} : vector<8x512xf32> to vector<8x128xf32>
    %cst_178 = arith.constant 5.000000e-01 : f32
    %667 = vector.broadcast %cst_178 : f32 to vector<8x128xf32>
    %668 = arith.mulf %667, %666 : vector<8x128xf32>
    %669 = math.tanh %668 : vector<8x128xf32>
    %cst_179 = arith.constant 5.000000e-01 : f32
    %670 = vector.broadcast %cst_179 : f32 to vector<8x128xf32>
    %671 = arith.mulf %670, %669 : vector<8x128xf32>
    %cst_180 = arith.constant 5.000000e-01 : f32
    %672 = vector.broadcast %cst_180 : f32 to vector<8x128xf32>
    %673 = arith.addf %671, %672 : vector<8x128xf32>
    %674 = vector.extract_strided_slice %626 {offsets = [0, 256], sizes = [8, 128], strides = [1, 1]} : vector<8x512xf32> to vector<8x128xf32>
    %675 = math.tanh %674 : vector<8x128xf32>
    %676 = vector.extract_strided_slice %626 {offsets = [0, 384], sizes = [8, 128], strides = [1, 1]} : vector<8x512xf32> to vector<8x128xf32>
    %cst_181 = arith.constant 5.000000e-01 : f32
    %677 = vector.broadcast %cst_181 : f32 to vector<8x128xf32>
    %678 = arith.mulf %677, %676 : vector<8x128xf32>
    %679 = math.tanh %678 : vector<8x128xf32>
    %cst_182 = arith.constant 5.000000e-01 : f32
    %680 = vector.broadcast %cst_182 : f32 to vector<8x128xf32>
    %681 = arith.mulf %680, %679 : vector<8x128xf32>
    %cst_183 = arith.constant 5.000000e-01 : f32
    %682 = vector.broadcast %cst_183 : f32 to vector<8x128xf32>
    %683 = arith.addf %681, %682 : vector<8x128xf32>
    %684 = arith.mulf %673, %601 : vector<8x128xf32>
    %685 = arith.mulf %665, %675 : vector<8x128xf32>
    %686 = arith.addf %684, %685 : vector<8x128xf32>
    %687 = math.tanh %686 : vector<8x128xf32>
    %688 = arith.mulf %683, %687 : vector<8x128xf32>
    %689 = tpu.concatenate %657, %688 in 0 : vector<8x128xf32>, vector<8x128xf32> -> vector<16x128xf32>
    %c0_184 = arith.constant 0 : index
    %c0_185 = arith.constant 0 : index
    %690 = vector.load %arg2[%c0_184, %c0_185] : memref<16x1xf32, #tpu.memory_space<vmem>>, vector<16x1xf32>
    %691 = vector.broadcast %690 : vector<16x1xf32> to vector<16x128xf32>
    %692 = arith.mulf %689, %691 : vector<16x128xf32>
    %c0_186 = arith.constant 0 : index
    %c0_187 = arith.constant 0 : index
    %693 = vector.load %arg5[%c0_186, %c0_187] : memref<128x128xf32, #tpu.memory_space<vmem>>, vector<128x128xf32>
    %cst_188 = arith.constant dense<0.000000e+00> : vector<16x128xf32>
    %694 = tpu.matmul %692, %693, %cst_188 {dimension_numbers = #tpu.dot_dimension_numbers<[1], [0], [0], [1], [0, 0, 1, 1], [], []>} : vector<16x128xf32>, vector<128x128xf32>, vector<16x128xf32> -> vector<16x128xf32>
    %c0_189 = arith.constant 0 : index
    %c0_190 = arith.constant 0 : index
    %695 = vector.load %arg6[%c0_189, %c0_190] : memref<1x128xf32, #tpu.memory_space<vmem>>, vector<1x128xf32>
    %696 = vector.broadcast %695 : vector<1x128xf32> to vector<16x128xf32>
    %697 = arith.addf %694, %696 : vector<16x128xf32>
    %c0_191 = arith.constant 0 : index
    %c0_192 = arith.constant 0 : index
    %698 = vector.load %arg7[%c0_191, %c0_192] : memref<16x128xf32, #tpu.memory_space<vmem>>, vector<16x128xf32>
    tpu.vector_store %arg7[%c0_191, %c0_192], %697 {strides = array<i32>} : memref<16x128xf32, #tpu.memory_space<vmem>>, vector<16x128xf32>,
    return
  }
  func.func @transform_0(%arg0: i32) -> (i32, i32) {
    %c0_i32 = arith.constant 0 : i32
    %c0_i32_0 = arith.constant 0 : i32
    return %arg0, %c0_i32 : i32, i32
  }
  func.func @transform_1(%arg0: i32) -> (i32, i32) {
    %c0_i32 = arith.constant 0 : i32
    %c0_i32_0 = arith.constant 0 : i32
    return %arg0, %c0_i32 : i32, i32
  }
  func.func @transform_2(%arg0: i32) -> (i32, i32) {
    %c0_i32 = arith.constant 0 : i32
    %c0_i32_0 = arith.constant 0 : i32
    %c0_i32_1 = arith.constant 0 : i32
    return %c0_i32, %c0_i32_0 : i32, i32
  }
  func.func @transform_3(%arg0: i32) -> (i32, i32) {
    %c0_i32 = arith.constant 0 : i32
    %c0_i32_0 = arith.constant 0 : i32
    %c0_i32_1 = arith.constant 0 : i32
    return %c0_i32, %c0_i32_0 : i32, i32
  }
  func.func @transform_4(%arg0: i32) -> (i32, i32) {
    %c0_i32 = arith.constant 0 : i32
    %c0_i32_0 = arith.constant 0 : i32
    %c0_i32_1 = arith.constant 0 : i32
    return %c0_i32, %c0_i32_0 : i32, i32
  }
  func.func @transform_5(%arg0: i32) -> (i32, i32) {
    %c0_i32 = arith.constant 0 : i32
    %c0_i32_0 = arith.constant 0 : i32
    %c0_i32_1 = arith.constant 0 : i32
    return %c0_i32, %c0_i32_0 : i32, i32
  }
  func.func @transform_6(%arg0: i32) -> (i32, i32) {
    %c0_i32 = arith.constant 0 : i32
    %c0_i32_0 = arith.constant 0 : i32
    return %arg0, %c0_i32 : i32, i32
  }
}

</mosaic_0001>

<bundles_post_ra>
// kernel: tpu_custom_call.1
= control target key start
LH: loop header
LB: loop body
LE: loop exit
PB: predicated region body
PF: predicated region fallthrough
CT: control target
= control target key end

     0   :  { %11 = vsyncpa [#allocation3], 0  ;;  %s5540_s0 = inlined_call_operand.vmem [shape: s32[16,8], index: 0, kind: input, shape index: {}]   ;;  %s5541_s1 = inlined_call_operand.vmem [shape: f32[16,1], index: 1, kind: input, shape index: {}]   ;;  %s5542_s2 = inlined_call_operand.vmem [shape: f32[3,512], index: 2, kind: input, shape index: {}]   ;;  %s5543_s3 = inlined_call_operand.hbm [shape: f32[128,512], index: 3, kind: input, shape index: {}]   ;;  %s5544_s4 = inlined_call_operand.hbm [shape: f32[128,128], index: 4, kind: input, shape index: {}]   ;;  %s5545_s5 = inlined_call_operand.vmem [shape: f32[1,128], index: 5, kind: input, shape index: {}]   ;;  %s5546_s6 = inlined_call_operand.hbm [shape: f32[16,128], index: 6, kind: output, shape index: {}]  }
   0x1   :  { %12 = vsyncpa [#allocation6], 0 }
   0x2   :  { %13 = vsyncpa [#allocation4], 0  ;;  %s4378_s21 = smov [#allocation2]   ;;  %s4306_s25 = scalar_lea.hbm %s5543_s3, 8192 }
   0x3   :  { %s25_s22 = sshll.u32 %s4378_s21, 4  ;;  %p4307_p0 = scmp.ne.s32.totalorder %s5543_s3, %s4306_s25  ;;  %s26_s22 = int_to_ptr.vmem [resolvable:$true] %s25_s22 }
   0x4   :  { %p4310_p1 = scmp.lt.u32.totalorder %s4306_s25, %s5543_s3 }
   0x6   :  { %p4312_p2 = pnand %p4310_p1, %p4307_p0 }
   0x8   :  { %4315 = shalt.err (!%p4312_p2)
}
   0x9   :  { %s4316_s30 = scalar_lea.vmem %s26_s22, 8192  ;;  %p4321_p4 = scmp.lt.s32.totalorder %s26_s22, %s26_s22 }
   0xa   :  { %p4317_p3 = scmp.ne.s32.totalorder %s26_s22, %s4316_s30  ;;  %p4322_p5 = scmp.lt.s32.totalorder %s4316_s30, %s4316_s30 }
   0xc   :  { %p4323_p6 = por %p4322_p5, %p4321_p4 }
   0xe   :  { %p4324_p7 = pnand %p4323_p6, %p4317_p3 }
  0x10   :  { %4327 = shalt.err (!%p4324_p7)
}
  0x11   :  { %s4379_s7 = smov 512   ;;  %s4380_s8 = smov 32  }
  0x12   :  { %31 = dma.hbm_to_vmem [thread:$0]  %s5543_s3, 8192, %s26_s22, [#allocation3], %s4379_s7, %s4379_s7, %s4380_s8  }
  0x13   :  { %s4381_s11 = smov [#allocation5]   ;;  %s4328_s15 = scalar_lea.hbm %s5544_s4, 2048 }
  0x14   :  { %s37_s12 = sshll.u32 %s4381_s11, 4  ;;  %p4329_p8 = scmp.ne.s32.totalorder %s5544_s4, %s4328_s15  ;;  %s38_s12 = int_to_ptr.vmem [resolvable:$true] %s37_s12 }
  0x15   :  { %p4332_p9 = scmp.lt.u32.totalorder %s4328_s15, %s5544_s4 }
  0x17   :  { %p4334_p10 = pnand %p4332_p9, %p4329_p8 }
  0x19   :  { %4337 = shalt.err (!%p4334_p10)
}
  0x1a   :  { %s4338_s20 = scalar_lea.vmem %s38_s12, 2048  ;;  %p4343_p12 = scmp.lt.s32.totalorder %s38_s12, %s38_s12 }
  0x1b   :  { %p4339_p11 = scmp.ne.s32.totalorder %s38_s12, %s4338_s20  ;;  %p4344_p13 = scmp.lt.s32.totalorder %s4338_s20, %s4338_s20 }
  0x1d   :  { %p4345_p0 = por %p4344_p13, %p4343_p12 }
  0x1f   :  { %p4346_p1 = pnand %p4345_p0, %p4339_p11 }
  0x21   :  { %4349 = shalt.err (!%p4346_p1)
}
  0x22   :  { %s4382_s3 = smov 128   ;;  %s4383_s21 = smov 8  }
  0x23   :  { %43 = dma.hbm_to_vmem [thread:$0]  %s5544_s4, 2048, %s38_s12, [#allocation6], %s4382_s3, %s4382_s3, %s4383_s21  }
  0x24   :  { %4372 = dma.done.wait [#allocation3], 8192  }
  0x25   :  { %4373 = vsyncadd [#allocation3], 4294959104 }
  0x26   :  { %4374 = dma.done.wait [#allocation6], 2048  }
  0x27   :  { %4375 = vsyncadd [#allocation6], 4294965248  ;;  %v5549_v0 = vmov 0.0   ;;  %v5547_v1 = vmov 0   ;;  %v60_v2 = vld [vmem:[#allocation2 + $0x8] sm:$0xff]  ;;  %v62_v4 = vld [vmem:[#allocation2 + $0x18] sm:$0xff] }
  0x28   :  { %290 = vmatprep.mubr.f32.mxu0 %v5549_v0  ;;  %361 = vmatprep.mubr.f32.mxu1 %v5549_v0  ;;  %v64_v3 = vld [vmem:[#allocation2 + $0x28] sm:$0xff]  ;;  %v66_v6 = vld [vmem:[#allocation2 + $0x38] sm:$0xff]  ;;  %v59_v7 = vld [vmem:[#allocation2] sm:$0xff]  ;;  %s4393_s12 = smov [#allocation7]  }
  0x29   :  { %4128 = vset.pattern.permute.xlu0 %v5547_v1  ;;  %4129 = vset.pattern.permute.xlu1 %v5547_v1  ;;  %v4460_v5 = vpack.c.bf16 %v64_v3, %v60_v2  ;;  %v63_v8 = vld [vmem:[#allocation2 + $0x20] sm:$0xff]  ;;  %v4462_v9 = vpack.c.bf16 %v66_v6, %v62_v4  ;;  %v61_v11 = vld [vmem:[#allocation2 + $0x10] sm:$0xff]  ;;  %v68_v13 = vld [vmem:[#allocation2 + $0x48] sm:$0xff]  ;;  %s3051_s13 = sshll.u32 %s4393_s12, 4  ;;  %s3052_s13 = int_to_ptr.vmem [resolvable:$true] %s3051_s13 }
  0x2a   :  { %v4464_v10 = vpack.c.bf16 %v63_v8, %v59_v7  ;;  %v65_v12 = vld [vmem:[#allocation2 + $0x30] sm:$0xff]  ;;  %v72_v15 = vld [vmem:[#allocation2 + $0x68] sm:$0xff]  ;;  %v70_v16 = vld [vmem:[#allocation2 + $0x58] sm:$0xff]  ;;  %s4350_s14 = scalar_lea.vmem %s3052_s13, 256  ;;  %p4355_p3 = scmp.lt.s32.totalorder %s3052_s13, %s3052_s13 }
  0x2b   :  { %5596 = vst [vmem:[#allocation11_spill] sm:$0xff] %v4460_v5  ;;  %5597 = vst [vmem:[#allocation12_spill] sm:$0xff] %v4462_v9  ;;  %3121 = vmatprep.subr.bf16.mxu0 %v4460_v5  ;;  %v4467_v14 = vpack.c.bf16 %v65_v12, %v61_v11  ;;  %v74_v17 = vld [vmem:[#allocation2 + $0x78] sm:$0xff]  ;;  %3153 = vmatprep.subr.bf16.mxu1 %v4462_v9  ;;  %v4471_v18 = vpack.c.bf16 %v72_v15, %v68_v13  ;;  %v67_v20 = vld [vmem:[#allocation2 + $0x40] sm:$0xff]  ;;  %p4351_p2 = scmp.ne.s32.totalorder %s3052_s13, %s4350_s14  ;;  %p4356_p4 = scmp.lt.s32.totalorder %s4350_s14, %s4350_s14 }
  0x2c   :  { %3123 = vmatpush1.bf16.msra.mxu0 %v4464_v10  ;;  %v4473_v19 = vpack.c.bf16 %v74_v17, %v70_v16  ;;  %v71_v21 = vld [vmem:[#allocation2 + $0x60] sm:$0xff]  ;;  %v69_v22 = vld [vmem:[#allocation2 + $0x50] sm:$0xff]  ;;  %v76_v25 = vld [vmem:[#allocation2 + $0x88] sm:$0xff] }
  0x2d   :  { %3155 = vmatpush1.bf16.msra.mxu1 %v4467_v14  ;;  %v4476_v23 = vpack.c.bf16 %v71_v21, %v67_v20  ;;  %v73_v24 = vld [vmem:[#allocation2 + $0x70] sm:$0xff]  ;;  %v80_v26 = vld [vmem:[#allocation2 + $0xa8] sm:$0xff]  ;;  %3125 = vmatprep.subr.bf16.mxu0 %v4471_v18  ;;  %v78_v29 = vld [vmem:[#allocation2 + $0x98] sm:$0xff]  ;;  %p4357_p5 = por %p4356_p4, %p4355_p3 }
  0x2e   :  { %3157 = vmatprep.subr.bf16.mxu1 %v4473_v19  ;;  %v4480_v27 = vpack.c.bf16 %v73_v24, %v69_v22  ;;  %v4482_v28 = vpack.c.bf16 %v80_v26, %v76_v25  ;;  %v82_v30 = vld [vmem:[#allocation2 + $0xb8] sm:$0xff]  ;;  %v75_v31 = vld [vmem:[#allocation2 + $0x80] sm:$0xff]  ;;  %v77_v34 = vld [vmem:[#allocation2 + $0x90] sm:$0xff] }
  0x2f   :  { %v4484_v32 = vpack.c.bf16 %v82_v30, %v78_v29  ;;  %v79_v33 = vld [vmem:[#allocation2 + $0xa0] sm:$0xff]  ;;  %v81_v35 = vld [vmem:[#allocation2 + $0xb0] sm:$0xff]  ;;  %v84_v37 = vld [vmem:[#allocation2 + $0xc8] sm:$0xff]  ;;  %p4358_p6 = pnand %p4357_p5, %p4351_p2 }
  0x30   :  { %3127 = vmatpush1.bf16.msra.mxu0 %v4476_v23  ;;  %v4487_v36 = vpack.c.bf16 %v79_v33, %v75_v31  ;;  %v88_v38 = vld [vmem:[#allocation2 + $0xe8] sm:$0xff]  ;;  %v86_v39 = vld [vmem:[#allocation2 + $0xd8] sm:$0xff]  ;;  %v4491_v40 = vpack.c.bf16 %v81_v35, %v77_v34  ;;  %v83_v43 = vld [vmem:[#allocation2 + $0xc0] sm:$0xff] }
  0x31   :  { %3159 = vmatpush1.bf16.msra.mxu1 %v4480_v27  ;;  %3129 = vmatprep.subr.bf16.mxu0 %v4482_v28  ;;  %v4493_v41 = vpack.c.bf16 %v88_v38, %v84_v37  ;;  %v90_v42 = vld [vmem:[#allocation2 + $0xf8] sm:$0xff]  ;;  %v87_v44 = vld [vmem:[#allocation2 + $0xe0] sm:$0xff]  ;;  %v85_v46 = vld [vmem:[#allocation2 + $0xd0] sm:$0xff] }
  0x32   :  { %3161 = vmatprep.subr.bf16.mxu1 %v4484_v32  ;;  %v4496_v45 = vpack.c.bf16 %v90_v42, %v86_v39  ;;  %v89_v47 = vld [vmem:[#allocation2 + $0xf0] sm:$0xff]  ;;  %v92_v48 = vld [vmem:[#allocation2 + $0x108] sm:$0xff]  ;;  %v94_v50 = vld [vmem:[#allocation2 + $0x118] sm:$0xff]  ;;  %v4499_v52 = vpack.c.bf16 %v87_v44, %v83_v43 }
  0x33   :  { %v96_v49 = vld [vmem:[#allocation2 + $0x128] sm:$0xff]  ;;  %v98_v51 = vld [vmem:[#allocation2 + $0x138] sm:$0xff]  ;;  %v4503_v53 = vpack.c.bf16 %v89_v47, %v85_v46  ;;  %v91_v55 = vld [vmem:[#allocation2 + $0x100] sm:$0xff] }
  0x34   :  { %3131 = vmatpush1.bf16.msra.mxu0 %v4487_v36  ;;  %v4505_v54 = vpack.c.bf16 %v96_v49, %v92_v48  ;;  %v95_v56 = vld [vmem:[#allocation2 + $0x120] sm:$0xff]  ;;  %v93_v57 = vld [vmem:[#allocation2 + $0x110] sm:$0xff]  ;;  %v4508_v58 = vpack.c.bf16 %v98_v51, %v94_v50  ;;  %v100_v60 = vld [vmem:[#allocation2 + $0x148] sm:$0xff] }
  0x35   :  { %3163 = vmatpush1.bf16.msra.mxu1 %v4491_v40  ;;  %3133 = vmatprep.subr.bf16.mxu0 %v4493_v41  ;;  %v97_v59 = vld [vmem:[#allocation2 + $0x130] sm:$0xff]  ;;  %v104_v61 = vld [vmem:[#allocation2 + $0x168] sm:$0xff]  ;;  %v102_v62 = vld [vmem:[#allocation2 + $0x158] sm:$0xff]  ;;  %v4511_v2 = vpack.c.bf16 %v95_v56, %v91_v55 }
  0x36   :  { %3165 = vmatprep.subr.bf16.mxu1 %v4496_v45  ;;  %v106_v63 = vld [vmem:[#allocation2 + $0x178] sm:$0xff]  ;;  %v4515_v3 = vpack.c.bf16 %v97_v59, %v93_v57  ;;  %v4517_v4 = vpack.c.bf16 %v104_v61, %v100_v60  ;;  %v99_v6 = vld [vmem:[#allocation2 + $0x140] sm:$0xff]  ;;  %v101_v8 = vld [vmem:[#allocation2 + $0x150] sm:$0xff]  ;;  %v4386_v60 = vmov 1   ;;  %v138_v61 = vlaneseq }
  0x37   :  { %v103_v7 = vld [vmem:[#allocation2 + $0x160] sm:$0xff]  ;;  %v4520_v11 = vpack.c.bf16 %v106_v63, %v102_v62  ;;  %v105_v12 = vld [vmem:[#allocation2 + $0x170] sm:$0xff]  ;;  %v108_v13 = vld [vmem:[#allocation2 + $0x188] sm:$0xff] }
  0x38   :  { %3135 = vmatpush1.bf16.msra.mxu0 %v4499_v52  ;;  %v112_v15 = vld [vmem:[#allocation2 + $0x1a8] sm:$0xff]  ;;  %v110_v16 = vld [vmem:[#allocation2 + $0x198] sm:$0xff]  ;;  %v4523_v20 = vpack.c.bf16 %v103_v7, %v99_v6  ;;  %v107_v21 = vld [vmem:[#allocation2 + $0x180] sm:$0xff]  ;;  %v4527_v24 = vpack.c.bf16 %v105_v12, %v101_v8  ;;  %v139_v62 = vshrl.u32 %v138_v61, 7 }
  0x39   :  { %3167 = vmatpush1.bf16.msra.mxu1 %v4503_v53  ;;  %3137 = vmatprep.subr.bf16.mxu0 %v4505_v54  ;;  %v114_v17 = vld [vmem:[#allocation2 + $0x1b8] sm:$0xff]  ;;  %v111_v22 = vld [vmem:[#allocation2 + $0x1a0] sm:$0xff]  ;;  %v4529_v25 = vpack.c.bf16 %v112_v15, %v108_v13  ;;  %v109_v26 = vld [vmem:[#allocation2 + $0x190] sm:$0xff] }
  0x3a   :  { %3169 = vmatprep.subr.bf16.mxu1 %v4508_v58  ;;  %v52_v29 = vld [vmem:[%s5540_s0] sm:$0xff]  ;;  %v53_v30 = vld [vmem:[%s5540_s0 + $0x8] sm:$0xff]  ;;  %v4538_v31 = vpack.c.bf16 %v114_v17, %v110_v16  ;;  %v113_v33 = vld [vmem:[#allocation2 + $0x1b0] sm:$0xff]  ;;  %v4547_v43 = vpack.c.bf16 %v111_v22, %v107_v21  ;;  %v140_v7 = vsub.s32 0, %v139_v62  ;;  %v144_v8 = vsub.s32 1, %v139_v62 }
  0x3b   :  { %v116_v34 = vld [vmem:[#allocation2 + $0x1c8] sm:$0xff]  ;;  %vm125_vm0 = vcmp.eq.s32.totalorder %v52_v29, 1  ;;  %vm126_vm1 = vcmp.eq.s32.totalorder %v53_v30, 1  ;;  %vm123_vm2 = vcmp.eq.s32.totalorder %v52_v29, 0  ;;  %v118_v37 = vld [vmem:[#allocation2 + $0x1d8] sm:$0xff]  ;;  %vm124_vm3 = vcmp.eq.s32.totalorder %v53_v30, 0 }
  0x3c   :  { %3139 = vmatpush1.bf16.msra.mxu0 %v4511_v2  ;;  %v120_v35 = vld [vmem:[#allocation2 + $0x1e8] sm:$0xff]  ;;  %v122_v38 = vld [vmem:[#allocation2 + $0x1f8] sm:$0xff]  ;;  %v4541_v39 = vsel %vm125_vm0, 1, %v5547_v1  ;;  %v4544_v42 = vsel %vm126_vm1, 1, %v5547_v1  ;;  %v4552_v44 = vpack.c.bf16 %v113_v33, %v109_v26  ;;  %v115_v47 = vld [vmem:[#allocation2 + $0x1c0] sm:$0xff]  ;;  %v4557_v49 = vsel %vm123_vm2, 1, %v5547_v1 }
  0x3d   :  { %3171 = vmatpush1.bf16.msra.mxu1 %v4515_v3  ;;  %3141 = vmatprep.subr.bf16.mxu0 %v4517_v4  ;;  %5598 = vst [vmem:[#allocation13_spill] sm:$0xff] %v4541_v39  ;;  %5599 = vst [vmem:[#allocation14_spill] sm:$0xff] %v4544_v42  ;;  %v4554_v46 = vpack.c.bf16 %v120_v35, %v116_v34  ;;  %v119_v48 = vld [vmem:[#allocation2 + $0x1e0] sm:$0xff]  ;;  %v4560_v50 = vpack.c.bf16 %v122_v38, %v118_v37  ;;  %v117_v51 = vld [vmem:[#allocation2 + $0x1d0] sm:$0xff]  ;;  %v4564_v56 = vsel %vm124_vm3, 1, %v5547_v1 }
  0x3e   :  { %3173 = vmatprep.subr.bf16.mxu1 %v4520_v11  ;;  %130 = vperm.xlu0 %4128, %v4541_v39   ;;  %5600 = vst [vmem:[#allocation15_spill] sm:$0xff] %v4557_v49  ;;  %v121_v55 = vld [vmem:[#allocation2 + $0x1f0] sm:$0xff]  ;;  %5601 = vst [vmem:[#allocation16_spill] sm:$0xff] %v4564_v56  ;;  %v4567_v57 = vpack.c.bf16 %v119_v48, %v115_v47  ;;  %v148_v12 = vsub.s32 2, %v139_v62 }
  0x3f   :  { %133 = vperm.xlu1 %4129, %v4544_v42   ;;  %v4572_v59 = vpack.c.bf16 %v121_v55, %v117_v51  ;;  %v3064_v13 = vld [vmem:[%s5542_s2 + $0x1] ss:$4 sm:$0xf]  ;;  %v3065_v15 = vld [vmem:[%s5542_s2 + $0x2] ss:$4 sm:$0xf] }
  0x40   :  { %3143 = vmatpush1.bf16.msra.mxu0 %v4523_v20  ;;  %5602 = vst [vmem:[#allocation17_spill] sm:$0xff] %v4567_v57  ;;  %v4631_v17 = vrot.slane %v3064_v13, %v140_v7  ;;  %v4633_v21 = vrot.slane %v3064_v13, %v144_v8  ;;  %v4635_v22 = vrot.slane %v3065_v15, %v140_v7  ;;  %v54_v26 = vld [vmem:[%s5542_s2] ss:$4 sm:$0xf] }
  0x41   :  { %3175 = vmatpush1.bf16.msra.mxu1 %v4527_v24  ;;  %3145 = vmatprep.subr.bf16.mxu0 %v4529_v25  ;;  %5603 = vst [vmem:[#allocation18_spill] sm:$0xff] %v4572_v59  ;;  %v4640_v29 = vrot.slane %v3064_v13, %v148_v12  ;;  %v4642_v30 = vrot.slane %v3065_v15, %v144_v8 }
  0x42   :  { %3177 = vmatprep.subr.bf16.mxu1 %v4538_v31  ;;  %190 = vperm.xlu0 %4128, %v4557_v49   ;;  %5604 = vst [vmem:[#allocation19_spill] sm:$0xff] %v4631_v17  ;;  %5605 = vst [vmem:[#allocation20_spill] sm:$0xff] %v4633_v21  ;;  %v4644_v33 = vrot.slane %v3065_v15, %v148_v12  ;;  %v4655_v38 = vrot.slane %v54_v26, %v140_v7 }
  0x43   :  { %193 = vperm.xlu1 %4129, %v4564_v56   ;;  %5606 = vst [vmem:[#allocation21_spill] sm:$0xff] %v4635_v22  ;;  %5607 = vst [vmem:[#allocation22_spill] sm:$0xff] %v4640_v29  ;;  %v4657_v47 = vrot.slane %v54_v26, %v148_v12  ;;  %v4666_v55 = vrot.slane %v54_v26, %v144_v8 }
  0x44   :  { %3147 = vmatpush1.bf16.msra.mxu0 %v4547_v43  ;;  %5608 = vst [vmem:[#allocation23_spill] sm:$0xff] %v4642_v30  ;;  %5609 = vst [vmem:[#allocation24_spill] sm:$0xff] %v4644_v33 }
  0x45   :  { %3179 = vmatpush1.bf16.msra.mxu1 %v4552_v44  ;;  %3149 = vmatprep.subr.bf16.mxu0 %v4554_v46  ;;  %5610 = vst [vmem:[#allocation25_spill] sm:$0xff] %v4655_v38 }
  0x46   :  { %3181 = vmatprep.subr.bf16.mxu1 %v4560_v50  ;;  %4130 = vset.pattern.permute.xlu0 %v4386_v60 }
  0x47   :  { %4131 = vset.pattern.permute.xlu1 %v4386_v60  ;;  %413 = vperm.xlu0 %4130, %v4541_v39   ;;  %v152_v60 = vsub.s32 3, %v139_v62 }
  0x48   :  { %3151 = vmatpush1.bf16.msra.mxu0 %v4567_v57  ;;  %429 = vperm.xlu1 %4131, %v4557_v49  }
  0x49   :  { %3183 = vmatpush1.bf16.msra.mxu1 %v4572_v59  ;;  %3185 = vmatprep.subr.bf16.mxu0 %v4460_v5 }
  0x4a   :  { %3217 = vmatprep.subr.bf16.mxu1 %v4462_v9 }
  0x4b   :  { %291 = vmatmul.mubr.f32.vlgmr.msra.gmra.mrb[0].mxu0 %v5549_v0  ;;  %432 = vperm.xlu0 %4130, %v4564_v56  }
  0x4c   :  { %362 = vmatmul.mubr.f32.vlgmr.msra.gmra.mrb[0].mxu1 %v5549_v0  ;;  %3187 = vmatpush1.bf16.msra.mxu0 %v4464_v10 }
  0x4d   :  { %3219 = vmatpush1.bf16.msra.mxu1 %v4467_v14  ;;  %3189 = vmatprep.subr.bf16.mxu0 %v4471_v18 }
  0x4e   :  { %3221 = vmatprep.subr.bf16.mxu1 %v4473_v19  ;;  %508 = vmatprep.mubr.f32.mxu0 %v5549_v0 }
  0x4f   :  { %579 = vmatprep.mubr.f32.mxu1 %v5549_v0  ;;  %416 = vperm.xlu1 %4131, %v4544_v42   ;;  %v4691_v42 = vrot.slane %v3065_v15, %v152_v60 }
  0x50   :  { %3191 = vmatpush1.bf16.msra.mxu0 %v4476_v23 }
  0x51   :  { %3223 = vmatpush1.bf16.msra.mxu1 %v4480_v27  ;;  %3193 = vmatprep.subr.bf16.mxu0 %v4482_v28 }
  0x52   :  { %3225 = vmatprep.subr.bf16.mxu1 %v4484_v32 }
  0x54   :  { %3195 = vmatpush1.bf16.msra.mxu0 %v4487_v36 }
  0x55   :  { %3227 = vmatpush1.bf16.msra.mxu1 %v4491_v40  ;;  %3197 = vmatprep.subr.bf16.mxu0 %v4493_v41 }
  0x56   :  { %3229 = vmatprep.subr.bf16.mxu1 %v4496_v45 }
  0x58   :  { %3199 = vmatpush1.bf16.msra.mxu0 %v4499_v52 }
  0x59   :  { %3231 = vmatpush1.bf16.msra.mxu1 %v4503_v53  ;;  %3201 = vmatprep.subr.bf16.mxu0 %v4505_v54 }
  0x5a   :  { %3233 = vmatprep.subr.bf16.mxu1 %v4508_v58 }
  0x5c   :  { %3203 = vmatpush1.bf16.msra.mxu0 %v4511_v2 }
  0x5d   :  { %3235 = vmatpush1.bf16.msra.mxu1 %v4515_v3  ;;  %3205 = vmatprep.subr.bf16.mxu0 %v4517_v4 }
  0x5e   :  { %3237 = vmatprep.subr.bf16.mxu1 %v4520_v11 }
  0x60   :  { %3207 = vmatpush1.bf16.msra.mxu0 %v4523_v20 }
  0x61   :  { %3239 = vmatpush1.bf16.msra.mxu1 %v4527_v24  ;;  %3209 = vmatprep.subr.bf16.mxu0 %v4529_v25 }
  0x62   :  { %3241 = vmatprep.subr.bf16.mxu1 %v4538_v31 }
  0x64   :  { %3211 = vmatpush1.bf16.msra.mxu0 %v4547_v43 }
  0x65   :  { %3243 = vmatpush1.bf16.msra.mxu1 %v4552_v44  ;;  %3213 = vmatprep.subr.bf16.mxu0 %v4554_v46 }
  0x66   :  { %3245 = vmatprep.subr.bf16.mxu1 %v4560_v50 }
  0x68   :  { %3215 = vmatpush1.bf16.msra.mxu0 %v4567_v57 }
  0x69   :  { %3247 = vmatpush1.bf16.msra.mxu1 %v4572_v59  ;;  %3249 = vmatprep.subr.bf16.mxu0 %v4460_v5 }
  0x6a   :  { %3281 = vmatprep.subr.bf16.mxu1 %v4462_v9 }
  0xbd   :  { %v131_v6 = vpop.permute.xlu0 %130 }
  0xbe   :  { %v4620_v63 = vpop.permute.xlu1 %133  ;;  %vm135_vm5 = vcmp.eq.s32.totalorder %v131_v6, 1 }
  0xbf   :  { %vm136_vm4 = vcmp.eq.s32.totalorder %v4620_v63, 1  ;;  %v179_v48 = vsel %vm135_vm5, %v4631_v17, %v4635_v22  ;;  %v180_v61 = vsel %vm135_vm5, %v4633_v21, %v4642_v30  ;;  %v181_v7 = vsel %vm135_vm5, %v4640_v29, %v4644_v33 }
  0xc0   :  { %v183_v35 = vsel %vm136_vm4, %v4631_v17, %v4635_v22  ;;  %v184_v37 = vsel %vm136_vm4, %v4633_v21, %v4642_v30  ;;  %v185_v51 = vsel %vm136_vm4, %v4640_v29, %v4644_v33  ;;  %v4689_v22 = vrot.slane %v3064_v13, %v152_v60 }
  0xc1   :  { %v191_v34 = vpop.permute.xlu0 %190 }
  0xc2   :  { %v4629_v16 = vpop.permute.xlu1 %193  ;;  %vm195_vm7 = vcmp.eq.s32.totalorder %v191_v34, 1  ;;  %v182_v13 = vsel %vm135_vm5, %v4689_v22, %v4691_v42 }
  0xc3   :  { %vm196_vm6 = vcmp.eq.s32.totalorder %v4629_v16, 1  ;;  %v218_v8 = vsel %vm195_vm7, %v4655_v38, %v179_v48  ;;  %v220_v29 = vsel %vm195_vm7, %v4657_v47, %v181_v7 }
  0xc4   :  { %v222_v12 = vsel %vm196_vm6, %v4655_v38, %v183_v35  ;;  %v223_v1 = vsel %vm196_vm6, %v4666_v55, %v184_v37  ;;  %v224_v0 = vsel %vm196_vm6, %v4657_v47, %v185_v51  ;;  %v219_v35 = vsel %vm195_vm7, %v4666_v55, %v180_v61 }
 0x11e   :  { %v292_v62 = vpop.f32.mrb[0].mxu0 }
 0x11f   :  { %v368_v21 = vadd.f32 %v292_v62, %v218_v8  ;;  %v372_v30 = vadd.f32 %v292_v62, %v222_v12  ;;  %v363_v33 = vpop.f32.mrb[0].mxu1  ;;  %v294_v17 = vpop.f32.mrb[1].mxu0  ;;  %v4693_v62 = vrot.slane %v54_v26, %v152_v60 }
 0x120   :  { %v370_v37 = vadd.f32 %v363_v33, %v220_v29  ;;  %v369_v56 = vadd.f32 %v294_v17, %v219_v35  ;;  %v373_v48 = vadd.f32 %v294_v17, %v223_v1  ;;  %v365_v38 = vpop.f32.mrb[1].mxu1  ;;  %v374_v8 = vadd.f32 %v363_v33, %v224_v0 }
 0x121   :  { %v376_v49 = vmul.f32 0.5, %v368_v21  ;;  %v394_v51 = vmul.f32 0.5, %v372_v30  ;;  %v221_v1 = vsel %vm195_vm7, %v4693_v62, %v182_v13 }
 0x122   :  { %4146 = vtanh.f32 %v370_v37  ;;  %v380_v12 = vmul.f32 0.5, %v369_v56  ;;  %v398_v7 = vmul.f32 0.5, %v373_v48  ;;  %v371_v15 = vadd.f32 %v365_v38, %v221_v1 }
 0x123   :  { %4148 = vtanh.f32 %v376_v49 }
 0x124   :  { %4150 = vtanh.f32 %v394_v51  ;;  %v385_v21 = vmul.f32 0.5, %v371_v15 }
 0x125   :  { %4152 = vtanh.f32 %v374_v8 }
 0x126   :  { %4154 = vtanh.f32 %v380_v12 }
 0x127   :  { %4156 = vtanh.f32 %v398_v7 }
 0x128   :  { %4158 = vtanh.f32 %v385_v21 }
 0x12c   :  { %v4147_v17 = vpop.eup %4146 }
 0x12d   :  { %v4149_v0 = vpop.eup %4148 }
 0x12e   :  { %v4151_v56 = vpop.eup %4150  ;;  %v378_v49 = vmul.f32 0.5, %v4149_v0 }
 0x12f   :  { %v4153_v29 = vpop.eup %4152  ;;  %v396_v30 = vmul.f32 0.5, %v4151_v56 }
 0x130   :  { %v4155_v26 = vpop.eup %4154  ;;  %v379_v33 = vadd.f32 0.5, %v378_v49 }
 0x131   :  { %v4157_v60 = vpop.eup %4156  ;;  %v397_v61 = vadd.f32 0.5, %v396_v30  ;;  %v382_v6 = vmul.f32 0.5, %v4155_v26  ;;  %v5611_v30 = vmov 0.0  }
 0x132   :  { %v390_v35 = vmul.f32 %v4147_v17, %v379_v33  ;;  %v400_v37 = vmul.f32 0.5, %v4157_v60  ;;  %v4159_v1 = vpop.eup %4158  ;;  %v186_v17 = vsel %vm136_vm4, %v4689_v22, %v4691_v42 }
 0x133   :  { %v383_v48 = vadd.f32 0.5, %v382_v6  ;;  %v408_v51 = vmul.f32 %v4153_v29, %v397_v61  ;;  %v387_v15 = vmul.f32 0.5, %v4159_v1  ;;  %v225_v49 = vsel %vm196_vm6, %v4693_v62, %v186_v17  ;;  %v5612_v6 = vld [vmem:[#allocation15_spill] sm:$0xff] }
 0x134   :  { %v401_v34 = vadd.f32 0.5, %v400_v37  ;;  %v375_v29 = vadd.f32 %v365_v38, %v225_v49  ;;  %v4387_v61 = vmov 2   ;;  %v5614_v37 = vld [vmem:[#allocation16_spill] sm:$0xff]  ;;  %v5617_v1 = vld [vmem:[#allocation23_spill] sm:$0xff]  ;;  %v5621_v49 = vld [vmem:[#allocation22_spill] sm:$0xff] }
 0x135   :  { %v389_v8 = vmul.f32 0.0, %v383_v48  ;;  %v388_v0 = vadd.f32 0.5, %v387_v15  ;;  %4132 = vset.pattern.permute.xlu1 %v4387_v61  ;;  %4133 = vset.pattern.permute.xlu0 %v4387_v61  ;;  %v414_v48 = vpop.permute.xlu0 %413  ;;  %v5618_v15 = vld [vmem:[#allocation20_spill] sm:$0xff] }
 0x136   :  { %v407_v12 = vmul.f32 0.0, %v401_v34  ;;  %v403_v63 = vmul.f32 0.5, %v375_v29  ;;  %773 = vperm.xlu1 %4132, %v4541_v39   ;;  %789 = vperm.xlu0 %4133, %v5612_v6   ;;  %vm418_vm8 = vcmp.eq.s32.totalorder %v414_v48, 1  ;;  %v5615_v34 = vld [vmem:[#allocation21_spill] sm:$0xff] }
 0x137   :  { %v4700_v7 = vadd.f32 %v390_v35, %v389_v8  ;;  %v5613_v35 = vld [vmem:[#allocation14_spill] sm:$0xff]  ;;  %v5616_v8 = vld [vmem:[#allocation19_spill] sm:$0xff] }
 0x138   :  { %v4702_v13 = vadd.f32 %v408_v51, %v407_v12  ;;  %v430_v51 = vpop.permute.xlu1 %429  ;;  %v420_v12 = vsel %vm418_vm8, %v5616_v8, %v5615_v34 }
 0x139   :  { %4160 = vtanh.f32 %v4700_v7  ;;  %vm434_vm9 = vcmp.eq.s32.totalorder %v430_v51, 1 }
 0x13a   :  { %4162 = vtanh.f32 %v403_v63  ;;  %776 = vperm.xlu1 %4132, %v5613_v35  }
 0x13b   :  { %4164 = vtanh.f32 %v4702_v13 }
 0x13e   :  { %792 = vperm.xlu1 %4132, %v5614_v37  }
 0x143   :  { %v4161_v56 = vpop.eup %4160 }
 0x144   :  { %v393_v21 = vmul.f32 %v4161_v56, %v388_v0  ;;  %v4163_v16 = vpop.eup %4162  ;;  %v421_v0 = vsel %vm418_vm8, %v5618_v15, %v5617_v1  ;;  %v5619_v56 = vld [vmem:[#allocation25_spill] sm:$0xff] }
 0x145   :  { %v405_v38 = vmul.f32 0.5, %v4163_v16  ;;  %v4165_v26 = vpop.eup %4164  ;;  %v436_v17 = vsel %vm434_vm9, %v5619_v56, %v420_v12  ;;  %v437_v63 = vsel %vm434_vm9, %v4666_v55, %v421_v0  ;;  %v423_v12 = vsel %vm418_vm8, %v4689_v22, %v4691_v42 }
 0x146   :  { %509 = vmatmul.mubr.f32.vlgmr.msra.gmra.mrb[2].mxu0 %v393_v21  ;;  %580 = vmatmul.mubr.f32.vlgmr.msra.gmra.mrb[2].mxu1 %v393_v21  ;;  %v5620_v21 = vld [vmem:[#allocation24_spill] sm:$0xff]  ;;  %v439_v0 = vsel %vm434_vm9, %v4693_v62, %v423_v12 }
 0x147   :  { %3251 = vmatpush1.bf16.msra.mxu0 %v4464_v10  ;;  %3283 = vmatpush1.bf16.msra.mxu1 %v4467_v14  ;;  %v406_v33 = vadd.f32 0.5, %v405_v38  ;;  %v422_v29 = vsel %vm418_vm8, %v5621_v49, %v5620_v21 }
 0x148   :  { %3253 = vmatprep.subr.bf16.mxu0 %v4471_v18  ;;  %3285 = vmatprep.subr.bf16.mxu1 %v4473_v19  ;;  %v438_v61 = vsel %vm434_vm9, %v4657_v47, %v422_v29 }
 0x149   :  { %654 = vmatprep.mubr.f32.mxu0 %v5611_v30  ;;  %725 = vmatprep.mubr.f32.mxu1 %v5611_v30  ;;  %v411_v60 = vmul.f32 %v4165_v26, %v406_v33 }
 0x14b   :  { %3255 = vmatpush1.bf16.msra.mxu0 %v4476_v23  ;;  %3287 = vmatpush1.bf16.msra.mxu1 %v4480_v27 }
 0x14c   :  { %3257 = vmatprep.subr.bf16.mxu0 %v4482_v28  ;;  %3289 = vmatprep.subr.bf16.mxu1 %v4484_v32 }
 0x14f   :  { %3259 = vmatpush1.bf16.msra.mxu0 %v4487_v36  ;;  %3291 = vmatpush1.bf16.msra.mxu1 %v4491_v40 }
 0x150   :  { %3261 = vmatprep.subr.bf16.mxu0 %v4493_v41  ;;  %3293 = vmatprep.subr.bf16.mxu1 %v4496_v45 }
 0x153   :  { %3263 = vmatpush1.bf16.msra.mxu0 %v4499_v52  ;;  %3295 = vmatpush1.bf16.msra.mxu1 %v4503_v53 }
 0x154   :  { %3265 = vmatprep.subr.bf16.mxu0 %v4505_v54  ;;  %3297 = vmatprep.subr.bf16.mxu1 %v4508_v58 }
 0x157   :  { %3267 = vmatpush1.bf16.msra.mxu0 %v4511_v2  ;;  %3299 = vmatpush1.bf16.msra.mxu1 %v4515_v3 }
 0x158   :  { %3269 = vmatprep.subr.bf16.mxu0 %v4517_v4  ;;  %3301 = vmatprep.subr.bf16.mxu1 %v4520_v11 }
 0x15b   :  { %3271 = vmatpush1.bf16.msra.mxu0 %v4523_v20  ;;  %3303 = vmatpush1.bf16.msra.mxu1 %v4527_v24 }
 0x15c   :  { %3273 = vmatprep.subr.bf16.mxu0 %v4529_v25  ;;  %3305 = vmatprep.subr.bf16.mxu1 %v4538_v31 }
 0x15f   :  { %3275 = vmatpush1.bf16.msra.mxu0 %v4547_v43  ;;  %3307 = vmatpush1.bf16.msra.mxu1 %v4552_v44 }
 0x160   :  { %3277 = vmatprep.subr.bf16.mxu0 %v4554_v46  ;;  %3309 = vmatprep.subr.bf16.mxu1 %v4560_v50 }
 0x163   :  { %3279 = vmatpush1.bf16.msra.mxu0 %v4567_v57  ;;  %3311 = vmatpush1.bf16.msra.mxu1 %v4572_v59 }
 0x164   :  { %3313 = vmatprep.subr.bf16.mxu0 %v4460_v5  ;;  %3345 = vmatprep.subr.bf16.mxu1 %v4462_v9 }
 0x166   :  { %655 = vmatmul.mubr.f32.vlgmr.msra.gmra.mrb[4].mxu0 %v411_v60  ;;  %726 = vmatmul.mubr.f32.vlgmr.msra.gmra.mrb[4].mxu1 %v411_v60 }
 0x167   :  { %3315 = vmatpush1.bf16.msra.mxu0 %v4464_v10  ;;  %3347 = vmatpush1.bf16.msra.mxu1 %v4467_v14 }
 0x168   :  { %3317 = vmatprep.subr.bf16.mxu0 %v4471_v18  ;;  %3349 = vmatprep.subr.bf16.mxu1 %v4473_v19 }
 0x169   :  { %868 = vmatprep.mubr.f32.mxu0 %v5611_v30  ;;  %939 = vmatprep.mubr.f32.mxu1 %v5611_v30 }
 0x16b   :  { %3319 = vmatpush1.bf16.msra.mxu0 %v4476_v23  ;;  %3351 = vmatpush1.bf16.msra.mxu1 %v4480_v27 }
 0x16c   :  { %3321 = vmatprep.subr.bf16.mxu0 %v4482_v28  ;;  %3353 = vmatprep.subr.bf16.mxu1 %v4484_v32 }
 0x16f   :  { %3323 = vmatpush1.bf16.msra.mxu0 %v4487_v36  ;;  %3355 = vmatpush1.bf16.msra.mxu1 %v4491_v40 }
 0x170   :  { %3325 = vmatprep.subr.bf16.mxu0 %v4493_v41  ;;  %3357 = vmatprep.subr.bf16.mxu1 %v4496_v45 }
 0x173   :  { %3327 = vmatpush1.bf16.msra.mxu0 %v4499_v52  ;;  %3359 = vmatpush1.bf16.msra.mxu1 %v4503_v53 }
 0x174   :  { %3329 = vmatprep.subr.bf16.mxu0 %v4505_v54  ;;  %3361 = vmatprep.subr.bf16.mxu1 %v4508_v58 }
 0x177   :  { %3331 = vmatpush1.bf16.msra.mxu0 %v4511_v2  ;;  %3363 = vmatpush1.bf16.msra.mxu1 %v4515_v3 }
 0x178   :  { %3333 = vmatprep.subr.bf16.mxu0 %v4517_v4  ;;  %3365 = vmatprep.subr.bf16.mxu1 %v4520_v11 }
 0x17b   :  { %3335 = vmatpush1.bf16.msra.mxu0 %v4523_v20  ;;  %3367 = vmatpush1.bf16.msra.mxu1 %v4527_v24 }
 0x17c   :  { %3337 = vmatprep.subr.bf16.mxu0 %v4529_v25  ;;  %3369 = vmatprep.subr.bf16.mxu1 %v4538_v31 }
 0x17f   :  { %3339 = vmatpush1.bf16.msra.mxu0 %v4547_v43  ;;  %3371 = vmatpush1.bf16.msra.mxu1 %v4552_v44 }
 0x180   :  { %3341 = vmatprep.subr.bf16.mxu0 %v4554_v46  ;;  %3373 = vmatprep.subr.bf16.mxu1 %v4560_v50 }
 0x183   :  { %3343 = vmatpush1.bf16.msra.mxu0 %v4567_v57  ;;  %3375 = vmatpush1.bf16.msra.mxu1 %v4572_v59 }
 0x184   :  { %3377 = vmatprep.subr.bf16.mxu0 %v4460_v5  ;;  %3409 = vmatprep.subr.bf16.mxu1 %v4462_v9 }
 0x219   :  { %v510_v16 = vpop.f32.mrb[2].mxu0  ;;  %v581_v38 = vpop.f32.mrb[2].mxu1 }
 0x21a   :  { %v586_v26 = vadd.f32 %v510_v16, %v436_v17  ;;  %v512_v33 = vpop.f32.mrb[3].mxu0  ;;  %v583_v60 = vpop.f32.mrb[3].mxu1  ;;  %v588_v6 = vadd.f32 %v581_v38, %v438_v61 }
 0x21b   :  { %v587_v37 = vadd.f32 %v512_v33, %v437_v63  ;;  %v589_v17 = vadd.f32 %v583_v60, %v439_v0 }
 0x21c   :  { %v736_v35 = vmul.f32 0.5, %v586_v26 }
 0x21d   :  { %v740_v39 = vmul.f32 0.5, %v587_v37  ;;  %v745_v16 = vmul.f32 0.5, %v589_v17 }
 0x21e   :  { %4166 = vtanh.f32 %v736_v35  ;;  %v417_v35 = vpop.permute.xlu1 %416 }
 0x21f   :  { %4168 = vtanh.f32 %v740_v39  ;;  %vm419_vm10 = vcmp.eq.s32.totalorder %v417_v35, 1  ;;  %v433_v39 = vpop.permute.xlu0 %432 }
 0x220   :  { %4170 = vtanh.f32 %v588_v6  ;;  %vm435_vm11 = vcmp.eq.s32.totalorder %v433_v39, 1  ;;  %v426_v12 = vsel %vm419_vm10, %v5621_v49, %v5620_v21 }
 0x221   :  { %4172 = vtanh.f32 %v745_v16 }
 0x228   :  { %v4167_v9 = vpop.eup %4166 }
 0x229   :  { %v4169_v5 = vpop.eup %4168  ;;  %v738_v59 = vmul.f32 0.5, %v4167_v9 }
 0x22a   :  { %v742_v29 = vmul.f32 0.5, %v4169_v5  ;;  %v4171_v26 = vpop.eup %4170  ;;  %v424_v5 = vsel %vm419_vm10, %v5616_v8, %v5615_v34 }
 0x22b   :  { %v739_v63 = vadd.f32 0.5, %v738_v59  ;;  %v4173_v6 = vpop.eup %4172  ;;  %v425_v59 = vsel %vm419_vm10, %v5618_v15, %v5617_v1 }
 0x22c   :  { %v743_v33 = vadd.f32 0.5, %v742_v29  ;;  %v747_v9 = vmul.f32 0.5, %v4173_v6  ;;  %v441_v0 = vsel %vm435_vm11, %v4666_v55, %v425_v59 }
 0x22d   :  { %v750_v48 = vmul.f32 %v4171_v26, %v739_v63 }
 0x22e   :  { %v749_v37 = vmul.f32 %v743_v33, %v4700_v7  ;;  %v440_v7 = vsel %vm435_vm11, %v5619_v56, %v424_v5  ;;  %v748_v29 = vadd.f32 0.5, %v747_v9 }
 0x230   :  { %v4806_v38 = vadd.f32 %v750_v48, %v749_v37  ;;  %v442_v37 = vsel %vm435_vm11, %v4657_v47, %v426_v12 }
 0x232   :  { %4174 = vtanh.f32 %v4806_v38 }
 0x239   :  { %v656_v51 = vpop.f32.mrb[4].mxu0  ;;  %v727_v60 = vpop.f32.mrb[4].mxu1 }
 0x23a   :  { %v732_v61 = vadd.f32 %v656_v51, %v440_v7  ;;  %v658_v17 = vpop.f32.mrb[5].mxu0  ;;  %v729_v16 = vpop.f32.mrb[5].mxu1  ;;  %v734_v5 = vadd.f32 %v727_v60, %v442_v37  ;;  %v427_v7 = vsel %vm419_vm10, %v4689_v22, %v4691_v42  ;;  %v5622_v37 = vld [vmem:[#allocation18_spill] sm:$0xff] }
 0x23b   :  { %v733_v63 = vadd.f32 %v658_v17, %v441_v0  ;;  %v443_v9 = vsel %vm435_vm11, %v4693_v62, %v427_v7  ;;  %v5624_v7 = vld [vmem:[#allocation12_spill] sm:$0xff] }
 0x23c   :  { %v4175_v26 = vpop.eup %4174  ;;  %v754_v33 = vmul.f32 0.5, %v732_v61  ;;  %v735_v59 = vadd.f32 %v729_v16, %v443_v9  ;;  %v4388_v9 = vmov 3  }
 0x23d   :  { %v753_v48 = vmul.f32 %v4175_v26, %v748_v29  ;;  %v758_v6 = vmul.f32 0.5, %v733_v63  ;;  %4135 = vset.pattern.permute.xlu1 %v4388_v9  ;;  %4134 = vset.pattern.permute.xlu0 %v4388_v9 }
 0x23e   :  { %4176 = vtanh.f32 %v754_v33  ;;  %v763_v35 = vmul.f32 0.5, %v735_v59  ;;  %v5625_v59 = vld [vmem:[#allocation15_spill] sm:$0xff] }
 0x23f   :  { %4178 = vtanh.f32 %v758_v6  ;;  %869 = vmatmul.mubr.f32.vlgmr.msra.gmra.mrb[6].mxu0 %v753_v48  ;;  %940 = vmatmul.mubr.f32.vlgmr.msra.gmra.mrb[6].mxu1 %v753_v48 }
 0x240   :  { %3379 = vmatpush1.bf16.msra.mxu0 %v4464_v10  ;;  %3411 = vmatpush1.bf16.msra.mxu1 %v4467_v14  ;;  %4180 = vtanh.f32 %v734_v5  ;;  %v5623_v5 = vld [vmem:[#allocation11_spill] sm:$0xff] }
 0x241   :  { %3381 = vmatprep.subr.bf16.mxu0 %v4471_v18  ;;  %3413 = vmatprep.subr.bf16.mxu1 %v4473_v19  ;;  %4182 = vtanh.f32 %v763_v35  ;;  %v5626_v35 = vld [vmem:[#allocation13_spill] sm:$0xff] }
 0x242   :  { %1014 = vmatprep.mubr.f32.mxu0 %v5611_v30  ;;  %1085 = vmatprep.mubr.f32.mxu1 %v5611_v30 }
 0x243   :  { %1149 = vperm.xlu1 %4135, %v5625_v59   ;;  %1133 = vperm.xlu0 %4134, %v5626_v35  }
 0x244   :  { %3383 = vmatpush1.bf16.msra.mxu0 %v4476_v23  ;;  %3415 = vmatpush1.bf16.msra.mxu1 %v4480_v27 }
 0x245   :  { %3385 = vmatprep.subr.bf16.mxu0 %v4482_v28  ;;  %3417 = vmatprep.subr.bf16.mxu1 %v4484_v32 }
 0x248   :  { %v4177_v39 = vpop.eup %4176  ;;  %3387 = vmatpush1.bf16.msra.mxu0 %v4487_v36  ;;  %3419 = vmatpush1.bf16.msra.mxu1 %v4491_v40 }
 0x249   :  { %v4179_v51 = vpop.eup %4178  ;;  %v756_v60 = vmul.f32 0.5, %v4177_v39  ;;  %3389 = vmatprep.subr.bf16.mxu0 %v4493_v41  ;;  %3421 = vmatprep.subr.bf16.mxu1 %v4496_v45  ;;  %v5627_v39 = vld [vmem:[#allocation14_spill] sm:$0xff] }
 0x24a   :  { %v760_v61 = vmul.f32 0.5, %v4179_v51  ;;  %v4181_v0 = vpop.eup %4180  ;;  %1136 = vperm.xlu1 %4135, %v5627_v39   ;;  %v5628_v51 = vld [vmem:[#allocation16_spill] sm:$0xff] }
 0x24b   :  { %v757_v12 = vadd.f32 0.5, %v756_v60  ;;  %v4183_v26 = vpop.eup %4182  ;;  %1152 = vperm.xlu0 %4134, %v5628_v51   ;;  %v774_v60 = vpop.permute.xlu1 %773 }
 0x24c   :  { %v761_v17 = vadd.f32 0.5, %v760_v61  ;;  %3391 = vmatpush1.bf16.msra.mxu0 %v4499_v52  ;;  %3423 = vmatpush1.bf16.msra.mxu1 %v4503_v53  ;;  %vm778_vm12 = vcmp.eq.s32.totalorder %v774_v60, 1  ;;  %v790_v61 = vpop.permute.xlu0 %789 }
 0x24d   :  { %v768_v16 = vmul.f32 %v4181_v0, %v757_v12  ;;  %3393 = vmatprep.subr.bf16.mxu0 %v4505_v54  ;;  %3425 = vmatprep.subr.bf16.mxu1 %v4508_v58  ;;  %vm794_vm13 = vcmp.eq.s32.totalorder %v790_v61, 1  ;;  %v780_v12 = vsel %vm778_vm12, %v5616_v8, %v5615_v34  ;;  %v781_v0 = vsel %vm778_vm12, %v5618_v15, %v5617_v1 }
 0x24e   :  { %v767_v29 = vmul.f32 %v761_v17, %v4702_v13  ;;  %v765_v13 = vmul.f32 0.5, %v4183_v26  ;;  %v796_v17 = vsel %vm794_vm13, %v5619_v56, %v780_v12  ;;  %v783_v12 = vsel %vm778_vm12, %v4689_v22, %v4691_v42 }
 0x24f   :  { %v777_v60 = vpop.permute.xlu1 %776 }
 0x250   :  { %v4848_v63 = vadd.f32 %v768_v16, %v767_v29  ;;  %3395 = vmatpush1.bf16.msra.mxu0 %v4511_v2  ;;  %3427 = vmatpush1.bf16.msra.mxu1 %v4515_v3  ;;  %v766_v33 = vadd.f32 0.5, %v765_v13  ;;  %v782_v16 = vsel %vm778_vm12, %v5621_v49, %v5620_v21  ;;  %v797_v29 = vsel %vm794_vm13, %v4666_v55, %v781_v0 }
 0x251   :  { %3397 = vmatprep.subr.bf16.mxu0 %v4517_v4  ;;  %3429 = vmatprep.subr.bf16.mxu1 %v4520_v11  ;;  %v798_v9 = vsel %vm794_vm13, %v4657_v47, %v782_v16  ;;  %v799_v0 = vsel %vm794_vm13, %v4693_v62, %v783_v12  ;;  %vm779_vm14 = vcmp.eq.s32.totalorder %v777_v60, 1 }
 0x252   :  { %4184 = vtanh.f32 %v4848_v63 }
 0x254   :  { %3399 = vmatpush1.bf16.msra.mxu0 %v4523_v20  ;;  %3431 = vmatpush1.bf16.msra.mxu1 %v4527_v24 }
 0x255   :  { %3401 = vmatprep.subr.bf16.mxu0 %v4529_v25  ;;  %3433 = vmatprep.subr.bf16.mxu1 %v4538_v31 }
 0x258   :  { %3403 = vmatpush1.bf16.msra.mxu0 %v4547_v43  ;;  %3435 = vmatpush1.bf16.msra.mxu1 %v4552_v44 }
 0x259   :  { %3405 = vmatprep.subr.bf16.mxu0 %v4554_v46  ;;  %3437 = vmatprep.subr.bf16.mxu1 %v4560_v50 }
 0x25c   :  { %v4185_v48 = vpop.eup %4184  ;;  %3407 = vmatpush1.bf16.msra.mxu0 %v4567_v57  ;;  %3439 = vmatpush1.bf16.msra.mxu1 %v5622_v37 }
 0x25d   :  { %v771_v6 = vmul.f32 %v4185_v48, %v766_v33  ;;  %3441 = vmatprep.subr.bf16.mxu0 %v5623_v5  ;;  %3473 = vmatprep.subr.bf16.mxu1 %v5624_v7 }
 0x25f   :  { %1015 = vmatmul.mubr.f32.vlgmr.msra.gmra.mrb[8].mxu0 %v771_v6  ;;  %1086 = vmatmul.mubr.f32.vlgmr.msra.gmra.mrb[8].mxu1 %v771_v6 }
 0x260   :  { %3443 = vmatpush1.bf16.msra.mxu0 %v4464_v10  ;;  %3475 = vmatpush1.bf16.msra.mxu1 %v4467_v14 }
 0x261   :  { %3445 = vmatprep.subr.bf16.mxu0 %v4471_v18  ;;  %3477 = vmatprep.subr.bf16.mxu1 %v4473_v19 }
 0x262   :  { %1228 = vmatprep.mubr.f32.mxu0 %v5611_v30  ;;  %1299 = vmatprep.mubr.f32.mxu1 %v5611_v30 }
 0x264   :  { %3447 = vmatpush1.bf16.msra.mxu0 %v4476_v23  ;;  %3479 = vmatpush1.bf16.msra.mxu1 %v4480_v27 }
 0x265   :  { %3449 = vmatprep.subr.bf16.mxu0 %v4482_v28  ;;  %3481 = vmatprep.subr.bf16.mxu1 %v4484_v32 }
 0x268   :  { %3451 = vmatpush1.bf16.msra.mxu0 %v4487_v36  ;;  %3483 = vmatpush1.bf16.msra.mxu1 %v4491_v40 }
 0x269   :  { %3453 = vmatprep.subr.bf16.mxu0 %v4493_v41  ;;  %3485 = vmatprep.subr.bf16.mxu1 %v4496_v45 }
 0x26c   :  { %3455 = vmatpush1.bf16.msra.mxu0 %v4499_v52  ;;  %3487 = vmatpush1.bf16.msra.mxu1 %v4503_v53 }
 0x26d   :  { %3457 = vmatprep.subr.bf16.mxu0 %v4505_v54  ;;  %3489 = vmatprep.subr.bf16.mxu1 %v4508_v58 }
 0x270   :  { %3459 = vmatpush1.bf16.msra.mxu0 %v4511_v2  ;;  %3491 = vmatpush1.bf16.msra.mxu1 %v4515_v3 }
 0x271   :  { %3461 = vmatprep.subr.bf16.mxu0 %v4517_v4  ;;  %3493 = vmatprep.subr.bf16.mxu1 %v4520_v11 }
 0x274   :  { %3463 = vmatpush1.bf16.msra.mxu0 %v4523_v20  ;;  %3495 = vmatpush1.bf16.msra.mxu1 %v4527_v24 }
 0x275   :  { %3465 = vmatprep.subr.bf16.mxu0 %v4529_v25  ;;  %3497 = vmatprep.subr.bf16.mxu1 %v4538_v31 }
 0x278   :  { %3467 = vmatpush1.bf16.msra.mxu0 %v4547_v43  ;;  %3499 = vmatpush1.bf16.msra.mxu1 %v4552_v44 }
 0x279   :  { %3469 = vmatprep.subr.bf16.mxu0 %v4554_v46  ;;  %3501 = vmatprep.subr.bf16.mxu1 %v4560_v50 }
 0x27c   :  { %3471 = vmatpush1.bf16.msra.mxu0 %v4567_v57  ;;  %3503 = vmatpush1.bf16.msra.mxu1 %v5622_v37 }
 0x27d   :  { %3505 = vmatprep.subr.bf16.mxu0 %v5623_v5  ;;  %3537 = vmatprep.subr.bf16.mxu1 %v5624_v7 }
 0x312   :  { %v870_v26 = vpop.f32.mrb[6].mxu0  ;;  %v941_v13 = vpop.f32.mrb[6].mxu1 }
 0x313   :  { %v946_v33 = vadd.f32 %v870_v26, %v796_v17  ;;  %v872_v48 = vpop.f32.mrb[7].mxu0  ;;  %v943_v6 = vpop.f32.mrb[7].mxu1  ;;  %v948_v35 = vadd.f32 %v941_v13, %v798_v9 }
 0x314   :  { %v947_v51 = vadd.f32 %v872_v48, %v797_v29  ;;  %v949_v17 = vadd.f32 %v943_v6, %v799_v0  ;;  %v786_v6 = vsel %vm779_vm14, %v5621_v49, %v5620_v21 }
 0x315   :  { %v1096_v39 = vmul.f32 0.5, %v946_v33 }
 0x316   :  { %v1100_v59 = vmul.f32 0.5, %v947_v51  ;;  %v1105_v26 = vmul.f32 0.5, %v949_v17 }
 0x317   :  { %4186 = vtanh.f32 %v1096_v39 }
 0x318   :  { %4188 = vtanh.f32 %v1100_v59  ;;  %v793_v59 = vpop.permute.xlu1 %792 }
 0x319   :  { %4190 = vtanh.f32 %v948_v35  ;;  %vm795_vm15 = vcmp.eq.s32.totalorder %v793_v59, 1 }
 0x31a   :  { %4192 = vtanh.f32 %v1105_v26 }
 0x321   :  { %v4187_v7 = vpop.eup %4186 }
 0x322   :  { %v4189_v5 = vpop.eup %4188  ;;  %v1098_v37 = vmul.f32 0.5, %v4187_v7 }
 0x323   :  { %v1102_v16 = vmul.f32 0.5, %v4189_v5  ;;  %v4191_v33 = vpop.eup %4190  ;;  %v784_v5 = vsel %vm779_vm14, %v5616_v8, %v5615_v34 }
 0x324   :  { %v1099_v29 = vadd.f32 0.5, %v1098_v37  ;;  %v4193_v35 = vpop.eup %4192  ;;  %v785_v37 = vsel %vm779_vm14, %v5618_v15, %v5617_v1 }
 0x325   :  { %v1103_v48 = vadd.f32 0.5, %v1102_v16  ;;  %v1107_v7 = vmul.f32 0.5, %v4193_v35  ;;  %v801_v9 = vsel %vm795_vm15, %v4666_v55, %v785_v37 }
 0x326   :  { %v1110_v57 = vmul.f32 %v4191_v33, %v1099_v29 }
 0x327   :  { %v1109_v39 = vmul.f32 %v1103_v48, %v4806_v38  ;;  %v800_v38 = vsel %vm795_vm15, %v5619_v56, %v784_v5  ;;  %v1108_v17 = vadd.f32 0.5, %v1107_v7  ;;  %v802_v48 = vsel %vm795_vm15, %v4657_v47, %v786_v6 }
 0x328   :  { %v787_v5 = vsel %vm779_vm14, %v4689_v22, %v4691_v42 }
 0x329   :  { %v4926_v51 = vadd.f32 %v1110_v57, %v1109_v39  ;;  %v803_v7 = vsel %vm795_vm15, %v4693_v62, %v787_v5  ;;  %v5632_v5 = vld [vmem:[#allocation12_spill] sm:$0xff] }
 0x32b   :  { %4194 = vtanh.f32 %v4926_v51 }
 0x332   :  { %v1016_v57 = vpop.f32.mrb[8].mxu0  ;;  %v1087_v61 = vpop.f32.mrb[8].mxu1 }
 0x333   :  { %v1092_v13 = vadd.f32 %v1016_v57, %v800_v38  ;;  %v1018_v12 = vpop.f32.mrb[9].mxu0  ;;  %v1089_v0 = vpop.f32.mrb[9].mxu1  ;;  %v1094_v35 = vadd.f32 %v1087_v61, %v802_v48  ;;  %v5630_v48 = vld [vmem:[#allocation18_spill] sm:$0xff] }
 0x334   :  { %v1093_v26 = vadd.f32 %v1018_v12, %v801_v9  ;;  %v1095_v37 = vadd.f32 %v1089_v0, %v803_v7  ;;  %v4389_v7 = vmov 4  }
 0x335   :  { %v4195_v16 = vpop.eup %4194  ;;  %v1114_v29 = vmul.f32 0.5, %v1092_v13  ;;  %4136 = vset.pattern.permute.xlu1 %v4389_v7  ;;  %4137 = vset.pattern.permute.xlu0 %v4389_v7 }
 0x336   :  { %v1113_v33 = vmul.f32 %v4195_v16, %v1108_v17  ;;  %v1118_v39 = vmul.f32 0.5, %v1093_v26  ;;  %v1123_v60 = vmul.f32 0.5, %v1095_v37  ;;  %v5633_v37 = vld [vmem:[#allocation13_spill] sm:$0xff] }
 0x337   :  { %4196 = vtanh.f32 %v1114_v29  ;;  %1493 = vperm.xlu1 %4136, %v5633_v37  }
 0x338   :  { %4198 = vtanh.f32 %v1118_v39  ;;  %1229 = vmatmul.mubr.f32.vlgmr.msra.gmra.mrb[10].mxu0 %v1113_v33  ;;  %1300 = vmatmul.mubr.f32.vlgmr.msra.gmra.mrb[10].mxu1 %v1113_v33  ;;  %v5629_v33 = vld [vmem:[#allocation17_spill] sm:$0xff] }
 0x339   :  { %3507 = vmatpush1.bf16.msra.mxu0 %v4464_v10  ;;  %3539 = vmatpush1.bf16.msra.mxu1 %v4467_v14  ;;  %4200 = vtanh.f32 %v1094_v35  ;;  %v5631_v35 = vld [vmem:[#allocation11_spill] sm:$0xff] }
 0x33a   :  { %3509 = vmatprep.subr.bf16.mxu0 %v4471_v18  ;;  %3541 = vmatprep.subr.bf16.mxu1 %v4473_v19  ;;  %4202 = vtanh.f32 %v1123_v60  ;;  %v5634_v60 = vld [vmem:[#allocation15_spill] sm:$0xff] }
 0x33b   :  { %1374 = vmatprep.mubr.f32.mxu0 %v5611_v30  ;;  %1445 = vmatprep.mubr.f32.mxu1 %v5611_v30 }
 0x33c   :  { %1509 = vperm.xlu0 %4137, %v5634_v60  }
 0x33d   :  { %3511 = vmatpush1.bf16.msra.mxu0 %v4476_v23  ;;  %3543 = vmatpush1.bf16.msra.mxu1 %v4480_v27 }
 0x33e   :  { %3513 = vmatprep.subr.bf16.mxu0 %v4482_v28  ;;  %3545 = vmatprep.subr.bf16.mxu1 %v4484_v32 }
 0x341   :  { %v4197_v59 = vpop.eup %4196  ;;  %3515 = vmatpush1.bf16.msra.mxu0 %v4487_v36  ;;  %3547 = vmatpush1.bf16.msra.mxu1 %v4491_v40 }
 0x342   :  { %v4199_v38 = vpop.eup %4198  ;;  %v1116_v57 = vmul.f32 0.5, %v4197_v59  ;;  %3517 = vmatprep.subr.bf16.mxu0 %v4493_v41  ;;  %3549 = vmatprep.subr.bf16.mxu1 %v4496_v45  ;;  %v5635_v59 = vld [vmem:[#allocation14_spill] sm:$0xff] }
 0x343   :  { %v1120_v61 = vmul.f32 0.5, %v4199_v38  ;;  %v4201_v6 = vpop.eup %4200  ;;  %1496 = vperm.xlu1 %4136, %v5635_v59   ;;  %v5636_v38 = vld [vmem:[#allocation16_spill] sm:$0xff] }
 0x344   :  { %v1117_v13 = vadd.f32 0.5, %v1116_v57  ;;  %v4203_v26 = vpop.eup %4202  ;;  %v1134_v57 = vpop.permute.xlu0 %1133 }
 0x345   :  { %v1121_v9 = vadd.f32 0.5, %v1120_v61  ;;  %3519 = vmatpush1.bf16.msra.mxu0 %v4499_v52  ;;  %3551 = vmatpush1.bf16.msra.mxu1 %v4503_v53  ;;  %vm1138_vm0 = vcmp.eq.s32.totalorder %v1134_v57, 1  ;;  %v1150_v61 = vpop.permute.xlu1 %1149 }
 0x346   :  { %v1128_v12 = vmul.f32 %v4201_v6, %v1117_v13  ;;  %3521 = vmatprep.subr.bf16.mxu0 %v4505_v54  ;;  %3553 = vmatprep.subr.bf16.mxu1 %v4508_v58  ;;  %vm1154_vm1 = vcmp.eq.s32.totalorder %v1150_v61, 1  ;;  %v1140_v13 = vsel %vm1138_vm0, %v5616_v8, %v5615_v34  ;;  %v1141_v6 = vsel %vm1138_vm0, %v5618_v15, %v5617_v1 }
 0x347   :  { %v1127_v0 = vmul.f32 %v1121_v9, %v4848_v63  ;;  %v1125_v63 = vmul.f32 0.5, %v4203_v26  ;;  %1512 = vperm.xlu1 %4136, %v5636_v38   ;;  %v1156_v9 = vsel %vm1154_vm1, %v5619_v56, %v1140_v13  ;;  %v1143_v13 = vsel %vm1138_vm0, %v4689_v22, %v4691_v42 }
 0x349   :  { %v4968_v17 = vadd.f32 %v1128_v12, %v1127_v0  ;;  %3523 = vmatpush1.bf16.msra.mxu0 %v4511_v2  ;;  %3555 = vmatpush1.bf16.msra.mxu1 %v4515_v3  ;;  %v1126_v16 = vadd.f32 0.5, %v1125_v63  ;;  %v1142_v12 = vsel %vm1138_vm0, %v5621_v49, %v5620_v21  ;;  %v1157_v0 = vsel %vm1154_vm1, %v4666_v55, %v1141_v6 }
 0x34a   :  { %3525 = vmatprep.subr.bf16.mxu0 %v4517_v4  ;;  %3557 = vmatprep.subr.bf16.mxu1 %v4520_v11  ;;  %v1158_v7 = vsel %vm1154_vm1, %v4657_v47, %v1142_v12  ;;  %v1159_v6 = vsel %vm1154_vm1, %v4693_v62, %v1143_v13 }
 0x34b   :  { %4204 = vtanh.f32 %v4968_v17 }
 0x34d   :  { %3527 = vmatpush1.bf16.msra.mxu0 %v4523_v20  ;;  %3559 = vmatpush1.bf16.msra.mxu1 %v4527_v24 }
 0x34e   :  { %3529 = vmatprep.subr.bf16.mxu0 %v4529_v25  ;;  %3561 = vmatprep.subr.bf16.mxu1 %v4538_v31 }
 0x351   :  { %3531 = vmatpush1.bf16.msra.mxu0 %v4547_v43  ;;  %3563 = vmatpush1.bf16.msra.mxu1 %v4552_v44 }
 0x352   :  { %3533 = vmatprep.subr.bf16.mxu0 %v4554_v46  ;;  %3565 = vmatprep.subr.bf16.mxu1 %v4560_v50 }
 0x355   :  { %v4205_v29 = vpop.eup %4204  ;;  %3535 = vmatpush1.bf16.msra.mxu0 %v5629_v33  ;;  %3567 = vmatpush1.bf16.msra.mxu1 %v5630_v48 }
 0x356   :  { %v1131_v39 = vmul.f32 %v4205_v29, %v1126_v16  ;;  %3569 = vmatprep.subr.bf16.mxu0 %v5631_v35  ;;  %3601 = vmatprep.subr.bf16.mxu1 %v5632_v5 }
 0x358   :  { %1375 = vmatmul.mubr.f32.vlgmr.msra.gmra.mrb[12].mxu0 %v1131_v39  ;;  %1446 = vmatmul.mubr.f32.vlgmr.msra.gmra.mrb[12].mxu1 %v1131_v39 }
 0x359   :  { %3571 = vmatpush1.bf16.msra.mxu0 %v4464_v10  ;;  %3603 = vmatpush1.bf16.msra.mxu1 %v4467_v14 }
 0x35a   :  { %3573 = vmatprep.subr.bf16.mxu0 %v4471_v18  ;;  %3605 = vmatprep.subr.bf16.mxu1 %v4473_v19 }
 0x35b   :  { %1588 = vmatprep.mubr.f32.mxu0 %v5611_v30  ;;  %1659 = vmatprep.mubr.f32.mxu1 %v5611_v30 }
 0x35d   :  { %3575 = vmatpush1.bf16.msra.mxu0 %v4476_v23  ;;  %3607 = vmatpush1.bf16.msra.mxu1 %v4480_v27 }
 0x35e   :  { %3577 = vmatprep.subr.bf16.mxu0 %v4482_v28  ;;  %3609 = vmatprep.subr.bf16.mxu1 %v4484_v32 }
 0x361   :  { %3579 = vmatpush1.bf16.msra.mxu0 %v4487_v36  ;;  %3611 = vmatpush1.bf16.msra.mxu1 %v4491_v40 }
 0x362   :  { %3581 = vmatprep.subr.bf16.mxu0 %v4493_v41  ;;  %3613 = vmatprep.subr.bf16.mxu1 %v4496_v45 }
 0x365   :  { %3583 = vmatpush1.bf16.msra.mxu0 %v4499_v52  ;;  %3615 = vmatpush1.bf16.msra.mxu1 %v4503_v53 }
 0x366   :  { %3585 = vmatprep.subr.bf16.mxu0 %v4505_v54  ;;  %3617 = vmatprep.subr.bf16.mxu1 %v4508_v58 }
 0x369   :  { %3587 = vmatpush1.bf16.msra.mxu0 %v4511_v2  ;;  %3619 = vmatpush1.bf16.msra.mxu1 %v4515_v3 }
 0x36a   :  { %3589 = vmatprep.subr.bf16.mxu0 %v4517_v4  ;;  %3621 = vmatprep.subr.bf16.mxu1 %v4520_v11 }
 0x36d   :  { %3591 = vmatpush1.bf16.msra.mxu0 %v4523_v20  ;;  %3623 = vmatpush1.bf16.msra.mxu1 %v4527_v24 }
 0x36e   :  { %3593 = vmatprep.subr.bf16.mxu0 %v4529_v25  ;;  %3625 = vmatprep.subr.bf16.mxu1 %v4538_v31 }
 0x371   :  { %3595 = vmatpush1.bf16.msra.mxu0 %v4547_v43  ;;  %3627 = vmatpush1.bf16.msra.mxu1 %v4552_v44 }
 0x372   :  { %3597 = vmatprep.subr.bf16.mxu0 %v4554_v46  ;;  %3629 = vmatprep.subr.bf16.mxu1 %v4560_v50 }
 0x375   :  { %3599 = vmatpush1.bf16.msra.mxu0 %v5629_v33  ;;  %3631 = vmatpush1.bf16.msra.mxu1 %v5630_v48 }
 0x376   :  { %3633 = vmatprep.subr.bf16.mxu0 %v5631_v35  ;;  %3665 = vmatprep.subr.bf16.mxu1 %v5632_v5 }
 0x40b   :  { %v1230_v26 = vpop.f32.mrb[10].mxu0  ;;  %v1301_v63 = vpop.f32.mrb[10].mxu1 }
 0x40c   :  { %v1306_v16 = vadd.f32 %v1230_v26, %v1156_v9  ;;  %v1232_v29 = vpop.f32.mrb[11].mxu0  ;;  %v1303_v39 = vpop.f32.mrb[11].mxu1  ;;  %v1308_v60 = vadd.f32 %v1301_v63, %v1158_v7 }
 0x40d   :  { %v1307_v38 = vadd.f32 %v1232_v29, %v1157_v0  ;;  %v1309_v9 = vadd.f32 %v1303_v39, %v1159_v6 }
 0x40e   :  { %v1456_v59 = vmul.f32 0.5, %v1306_v16 }
 0x40f   :  { %v1460_v37 = vmul.f32 0.5, %v1307_v38  ;;  %v1465_v26 = vmul.f32 0.5, %v1309_v9 }
 0x410   :  { %4206 = vtanh.f32 %v1456_v59  ;;  %v1137_v59 = vpop.permute.xlu1 %1136 }
 0x411   :  { %4208 = vtanh.f32 %v1460_v37  ;;  %vm1139_vm2 = vcmp.eq.s32.totalorder %v1137_v59, 1  ;;  %v1153_v37 = vpop.permute.xlu0 %1152 }
 0x412   :  { %4210 = vtanh.f32 %v1308_v60  ;;  %vm1155_vm3 = vcmp.eq.s32.totalorder %v1153_v37, 1  ;;  %v1146_v13 = vsel %vm1139_vm2, %v5621_v49, %v5620_v21 }
 0x413   :  { %4212 = vtanh.f32 %v1465_v26 }
 0x41a   :  { %v4207_v5 = vpop.eup %4206 }
 0x41b   :  { %v4209_v35 = vpop.eup %4208  ;;  %v1458_v48 = vmul.f32 0.5, %v4207_v5 }
 0x41c   :  { %v1462_v12 = vmul.f32 0.5, %v4209_v35  ;;  %v4211_v16 = vpop.eup %4210  ;;  %v1144_v35 = vsel %vm1139_vm2, %v5616_v8, %v5615_v34 }
 0x41d   :  { %v1459_v0 = vadd.f32 0.5, %v1458_v48  ;;  %v4213_v60 = vpop.eup %4212  ;;  %v1145_v48 = vsel %vm1139_vm2, %v5618_v15, %v5617_v1 }
 0x41e   :  { %v1463_v29 = vadd.f32 0.5, %v1462_v12  ;;  %v1467_v5 = vmul.f32 0.5, %v4213_v60  ;;  %v1161_v6 = vsel %vm1155_vm3, %v4666_v55, %v1145_v48 }
 0x41f   :  { %v1470_v57 = vmul.f32 %v4211_v16, %v1459_v0 }
 0x420   :  { %v1469_v38 = vmul.f32 %v1463_v29, %v4926_v51  ;;  %v1160_v51 = vsel %vm1155_vm3, %v5619_v56, %v1144_v35  ;;  %v1468_v12 = vadd.f32 0.5, %v1467_v5 }
 0x422   :  { %v5046_v63 = vadd.f32 %v1470_v57, %v1469_v38  ;;  %v1162_v38 = vsel %vm1155_vm3, %v4657_v47, %v1146_v13 }
 0x424   :  { %4214 = vtanh.f32 %v5046_v63 }
 0x42b   :  { %v1376_v61 = vpop.f32.mrb[12].mxu0  ;;  %v1447_v39 = vpop.f32.mrb[12].mxu1 }
 0x42c   :  { %v1452_v7 = vadd.f32 %v1376_v61, %v1160_v51  ;;  %v1378_v9 = vpop.f32.mrb[13].mxu0  ;;  %v1449_v26 = vpop.f32.mrb[13].mxu1  ;;  %v1454_v35 = vadd.f32 %v1447_v39, %v1162_v38  ;;  %v1147_v51 = vsel %vm1139_vm2, %v4689_v22, %v4691_v42  ;;  %v5637_v38 = vld [vmem:[#allocation18_spill] sm:$0xff] }
 0x42d   :  { %v1453_v0 = vadd.f32 %v1378_v9, %v1161_v6  ;;  %v1163_v5 = vsel %vm1155_vm3, %v4693_v62, %v1147_v51  ;;  %v5639_v51 = vld [vmem:[#allocation12_spill] sm:$0xff] }
 0x42e   :  { %v4215_v16 = vpop.eup %4214  ;;  %v1474_v29 = vmul.f32 0.5, %v1452_v7  ;;  %v1455_v48 = vadd.f32 %v1449_v26, %v1163_v5  ;;  %v4390_v5 = vmov 5  }
 0x42f   :  { %v1473_v57 = vmul.f32 %v4215_v16, %v1468_v12  ;;  %v1478_v60 = vmul.f32 0.5, %v1453_v0  ;;  %4139 = vset.pattern.permute.xlu1 %v4390_v5  ;;  %4138 = vset.pattern.permute.xlu0 %v4390_v5 }
 0x430   :  { %4216 = vtanh.f32 %v1474_v29  ;;  %v1483_v59 = vmul.f32 0.5, %v1455_v48  ;;  %v5640_v48 = vld [vmem:[#allocation15_spill] sm:$0xff] }
 0x431   :  { %4218 = vtanh.f32 %v1478_v60  ;;  %1589 = vmatmul.mubr.f32.vlgmr.msra.gmra.mrb[14].mxu0 %v1473_v57  ;;  %1660 = vmatmul.mubr.f32.vlgmr.msra.gmra.mrb[14].mxu1 %v1473_v57 }
 0x432   :  { %3635 = vmatpush1.bf16.msra.mxu0 %v4464_v10  ;;  %3667 = vmatpush1.bf16.msra.mxu1 %v4467_v14  ;;  %4220 = vtanh.f32 %v1454_v35  ;;  %v5638_v35 = vld [vmem:[#allocation11_spill] sm:$0xff] }
 0x433   :  { %3637 = vmatprep.subr.bf16.mxu0 %v4471_v18  ;;  %3669 = vmatprep.subr.bf16.mxu1 %v4473_v19  ;;  %4222 = vtanh.f32 %v1483_v59  ;;  %v5641_v59 = vld [vmem:[#allocation13_spill] sm:$0xff] }
 0x434   :  { %1734 = vmatprep.mubr.f32.mxu0 %v5611_v30  ;;  %1805 = vmatprep.mubr.f32.mxu1 %v5611_v30 }
 0x435   :  { %1869 = vperm.xlu1 %4139, %v5640_v48   ;;  %1853 = vperm.xlu0 %4138, %v5641_v59  }
 0x436   :  { %3639 = vmatpush1.bf16.msra.mxu0 %v4476_v23  ;;  %3671 = vmatpush1.bf16.msra.mxu1 %v4480_v27 }
 0x437   :  { %3641 = vmatprep.subr.bf16.mxu0 %v4482_v28  ;;  %3673 = vmatprep.subr.bf16.mxu1 %v4484_v32 }
 0x43a   :  { %v4217_v37 = vpop.eup %4216  ;;  %3643 = vmatpush1.bf16.msra.mxu0 %v4487_v36  ;;  %3675 = vmatpush1.bf16.msra.mxu1 %v4491_v40 }
 0x43b   :  { %v4219_v61 = vpop.eup %4218  ;;  %v1476_v39 = vmul.f32 0.5, %v4217_v37  ;;  %3645 = vmatprep.subr.bf16.mxu0 %v4493_v41  ;;  %3677 = vmatprep.subr.bf16.mxu1 %v4496_v45  ;;  %v5642_v37 = vld [vmem:[#allocation14_spill] sm:$0xff] }
 0x43c   :  { %v1480_v7 = vmul.f32 0.5, %v4219_v61  ;;  %v4221_v6 = vpop.eup %4220  ;;  %1856 = vperm.xlu1 %4139, %v5642_v37   ;;  %v5643_v61 = vld [vmem:[#allocation16_spill] sm:$0xff] }
 0x43d   :  { %v1477_v13 = vadd.f32 0.5, %v1476_v39  ;;  %v4223_v16 = vpop.eup %4222  ;;  %1872 = vperm.xlu0 %4138, %v5643_v61   ;;  %v1494_v39 = vpop.permute.xlu1 %1493 }
 0x43e   :  { %v1481_v9 = vadd.f32 0.5, %v1480_v7  ;;  %3647 = vmatpush1.bf16.msra.mxu0 %v4499_v52  ;;  %3679 = vmatpush1.bf16.msra.mxu1 %v4503_v53  ;;  %vm1498_vm4 = vcmp.eq.s32.totalorder %v1494_v39, 1  ;;  %v1510_v7 = vpop.permute.xlu0 %1509 }
 0x43f   :  { %v1488_v26 = vmul.f32 %v4221_v6, %v1477_v13  ;;  %3649 = vmatprep.subr.bf16.mxu0 %v4505_v54  ;;  %3681 = vmatprep.subr.bf16.mxu1 %v4508_v58  ;;  %vm1514_vm5 = vcmp.eq.s32.totalorder %v1510_v7, 1  ;;  %v1500_v13 = vsel %vm1498_vm4, %v5616_v8, %v5615_v34  ;;  %v1501_v6 = vsel %vm1498_vm4, %v5618_v15, %v5617_v1 }
 0x440   :  { %v1487_v12 = vmul.f32 %v1481_v9, %v4968_v17  ;;  %v1485_v17 = vmul.f32 0.5, %v4223_v16  ;;  %v1516_v9 = vsel %vm1514_vm5, %v5619_v56, %v1500_v13  ;;  %v1503_v13 = vsel %vm1498_vm4, %v4689_v22, %v4691_v42 }
 0x441   :  { %v1497_v39 = vpop.permute.xlu1 %1496 }
 0x442   :  { %v5088_v0 = vadd.f32 %v1488_v26, %v1487_v12  ;;  %3651 = vmatpush1.bf16.msra.mxu0 %v4511_v2  ;;  %3683 = vmatpush1.bf16.msra.mxu1 %v4515_v3  ;;  %v1486_v29 = vadd.f32 0.5, %v1485_v17  ;;  %v1502_v26 = vsel %vm1498_vm4, %v5621_v49, %v5620_v21  ;;  %v1517_v12 = vsel %vm1514_vm5, %v4666_v55, %v1501_v6 }
 0x443   :  { %3653 = vmatprep.subr.bf16.mxu0 %v4517_v4  ;;  %3685 = vmatprep.subr.bf16.mxu1 %v4520_v11  ;;  %v1518_v5 = vsel %vm1514_vm5, %v4657_v47, %v1502_v26  ;;  %v1519_v6 = vsel %vm1514_vm5, %v4693_v62, %v1503_v13  ;;  %vm1499_vm6 = vcmp.eq.s32.totalorder %v1497_v39, 1 }
 0x444   :  { %4224 = vtanh.f32 %v5088_v0 }
 0x446   :  { %3655 = vmatpush1.bf16.msra.mxu0 %v4523_v20  ;;  %3687 = vmatpush1.bf16.msra.mxu1 %v4527_v24 }
 0x447   :  { %3657 = vmatprep.subr.bf16.mxu0 %v4529_v25  ;;  %3689 = vmatprep.subr.bf16.mxu1 %v4538_v31 }
 0x44a   :  { %3659 = vmatpush1.bf16.msra.mxu0 %v4547_v43  ;;  %3691 = vmatpush1.bf16.msra.mxu1 %v4552_v44 }
 0x44b   :  { %3661 = vmatprep.subr.bf16.mxu0 %v4554_v46  ;;  %3693 = vmatprep.subr.bf16.mxu1 %v4560_v50 }
 0x44e   :  { %v4225_v57 = vpop.eup %4224  ;;  %3663 = vmatpush1.bf16.msra.mxu0 %v5629_v33  ;;  %3695 = vmatpush1.bf16.msra.mxu1 %v5637_v38 }
 0x44f   :  { %v1491_v60 = vmul.f32 %v4225_v57, %v1486_v29  ;;  %3697 = vmatprep.subr.bf16.mxu0 %v5638_v35  ;;  %3729 = vmatprep.subr.bf16.mxu1 %v5639_v51 }
 0x451   :  { %1735 = vmatmul.mubr.f32.vlgmr.msra.gmra.mrb[16].mxu0 %v1491_v60  ;;  %1806 = vmatmul.mubr.f32.vlgmr.msra.gmra.mrb[16].mxu1 %v1491_v60 }
 0x452   :  { %3699 = vmatpush1.bf16.msra.mxu0 %v4464_v10  ;;  %3731 = vmatpush1.bf16.msra.mxu1 %v4467_v14 }
 0x453   :  { %3701 = vmatprep.subr.bf16.mxu0 %v4471_v18  ;;  %3733 = vmatprep.subr.bf16.mxu1 %v4473_v19 }
 0x454   :  { %1948 = vmatprep.mubr.f32.mxu0 %v5611_v30  ;;  %2019 = vmatprep.mubr.f32.mxu1 %v5611_v30 }
 0x456   :  { %3703 = vmatpush1.bf16.msra.mxu0 %v4476_v23  ;;  %3735 = vmatpush1.bf16.msra.mxu1 %v4480_v27 }
 0x457   :  { %3705 = vmatprep.subr.bf16.mxu0 %v4482_v28  ;;  %3737 = vmatprep.subr.bf16.mxu1 %v4484_v32 }
 0x45a   :  { %3707 = vmatpush1.bf16.msra.mxu0 %v4487_v36  ;;  %3739 = vmatpush1.bf16.msra.mxu1 %v4491_v40 }
 0x45b   :  { %3709 = vmatprep.subr.bf16.mxu0 %v4493_v41  ;;  %3741 = vmatprep.subr.bf16.mxu1 %v4496_v45 }
 0x45e   :  { %3711 = vmatpush1.bf16.msra.mxu0 %v4499_v52  ;;  %3743 = vmatpush1.bf16.msra.mxu1 %v4503_v53 }
 0x45f   :  { %3713 = vmatprep.subr.bf16.mxu0 %v4505_v54  ;;  %3745 = vmatprep.subr.bf16.mxu1 %v4508_v58 }
 0x462   :  { %3715 = vmatpush1.bf16.msra.mxu0 %v4511_v2  ;;  %3747 = vmatpush1.bf16.msra.mxu1 %v4515_v3 }
 0x463   :  { %3717 = vmatprep.subr.bf16.mxu0 %v4517_v4  ;;  %3749 = vmatprep.subr.bf16.mxu1 %v4520_v11 }
 0x466   :  { %3719 = vmatpush1.bf16.msra.mxu0 %v4523_v20  ;;  %3751 = vmatpush1.bf16.msra.mxu1 %v4527_v24 }
 0x467   :  { %3721 = vmatprep.subr.bf16.mxu0 %v4529_v25  ;;  %3753 = vmatprep.subr.bf16.mxu1 %v4538_v31 }
 0x46a   :  { %3723 = vmatpush1.bf16.msra.mxu0 %v4547_v43  ;;  %3755 = vmatpush1.bf16.msra.mxu1 %v4552_v44 }
 0x46b   :  { %3725 = vmatprep.subr.bf16.mxu0 %v4554_v46  ;;  %3757 = vmatprep.subr.bf16.mxu1 %v4560_v50 }
 0x46e   :  { %3727 = vmatpush1.bf16.msra.mxu0 %v5629_v33  ;;  %3759 = vmatpush1.bf16.msra.mxu1 %v5637_v38 }
 0x46f   :  { %3761 = vmatprep.subr.bf16.mxu0 %v5638_v35  ;;  %3793 = vmatprep.subr.bf16.mxu1 %v5639_v51 }
 0x504   :  { %v1590_v16 = vpop.f32.mrb[14].mxu0  ;;  %v1661_v17 = vpop.f32.mrb[14].mxu1 }
 0x505   :  { %v1666_v29 = vadd.f32 %v1590_v16, %v1516_v9  ;;  %v1592_v57 = vpop.f32.mrb[15].mxu0  ;;  %v1663_v60 = vpop.f32.mrb[15].mxu1  ;;  %v1668_v59 = vadd.f32 %v1661_v17, %v1518_v5 }
 0x506   :  { %v1667_v61 = vadd.f32 %v1592_v57, %v1517_v12  ;;  %v1669_v9 = vadd.f32 %v1663_v60, %v1519_v6  ;;  %v1506_v60 = vsel %vm1499_vm6, %v5621_v49, %v5620_v21 }
 0x507   :  { %v1816_v37 = vmul.f32 0.5, %v1666_v29 }
 0x508   :  { %v1820_v48 = vmul.f32 0.5, %v1667_v61  ;;  %v1825_v16 = vmul.f32 0.5, %v1669_v9 }
 0x509   :  { %4226 = vtanh.f32 %v1816_v37 }
 0x50a   :  { %4228 = vtanh.f32 %v1820_v48  ;;  %v1513_v48 = vpop.permute.xlu1 %1512 }
 0x50b   :  { %4230 = vtanh.f32 %v1668_v59  ;;  %vm1515_vm7 = vcmp.eq.s32.totalorder %v1513_v48, 1 }
 0x50c   :  { %4232 = vtanh.f32 %v1825_v16 }
 0x513   :  { %v4227_v51 = vpop.eup %4226 }
 0x514   :  { %v4229_v35 = vpop.eup %4228  ;;  %v1818_v38 = vmul.f32 0.5, %v4227_v51 }
 0x515   :  { %v1822_v26 = vmul.f32 0.5, %v4229_v35  ;;  %v4231_v29 = vpop.eup %4230  ;;  %v1504_v35 = vsel %vm1499_vm6, %v5616_v8, %v5615_v34 }
 0x516   :  { %v1819_v12 = vadd.f32 0.5, %v1818_v38  ;;  %v4233_v59 = vpop.eup %4232  ;;  %v1505_v38 = vsel %vm1499_vm6, %v5618_v15, %v5617_v1 }
 0x517   :  { %v1823_v57 = vadd.f32 0.5, %v1822_v26  ;;  %v1827_v51 = vmul.f32 0.5, %v4233_v59  ;;  %v1521_v5 = vsel %vm1515_vm7, %v4666_v55, %v1505_v38 }
 0x518   :  { %v1830_v33 = vmul.f32 %v4231_v29, %v1819_v12 }
 0x519   :  { %v1829_v37 = vmul.f32 %v1823_v57, %v5046_v63  ;;  %v1520_v63 = vsel %vm1515_vm7, %v5619_v56, %v1504_v35  ;;  %v1828_v9 = vadd.f32 0.5, %v1827_v51  ;;  %v1522_v57 = vsel %vm1515_vm7, %v4657_v47, %v1506_v60 }
 0x51a   :  { %v1507_v35 = vsel %vm1499_vm6, %v4689_v22, %v4691_v42 }
 0x51b   :  { %v5166_v61 = vadd.f32 %v1830_v33, %v1829_v37  ;;  %v1523_v51 = vsel %vm1515_vm7, %v4693_v62, %v1507_v35  ;;  %v5647_v35 = vld [vmem:[#allocation12_spill] sm:$0xff] }
 0x51d   :  { %4234 = vtanh.f32 %v5166_v61 }
 0x524   :  { %v1736_v33 = vpop.f32.mrb[16].mxu0  ;;  %v1807_v7 = vpop.f32.mrb[16].mxu1 }
 0x525   :  { %v1812_v17 = vadd.f32 %v1736_v33, %v1520_v63  ;;  %v1738_v13 = vpop.f32.mrb[17].mxu0  ;;  %v1809_v6 = vpop.f32.mrb[17].mxu1  ;;  %v1814_v59 = vadd.f32 %v1807_v7, %v1522_v57  ;;  %v5645_v57 = vld [vmem:[#allocation18_spill] sm:$0xff] }
 0x526   :  { %v1813_v16 = vadd.f32 %v1738_v13, %v1521_v5  ;;  %v1815_v38 = vadd.f32 %v1809_v6, %v1523_v51  ;;  %v4391_v51 = vmov 6  }
 0x527   :  { %v4235_v26 = vpop.eup %4234  ;;  %v1834_v12 = vmul.f32 0.5, %v1812_v17  ;;  %4140 = vset.pattern.permute.xlu1 %v4391_v51  ;;  %4141 = vset.pattern.permute.xlu0 %v4391_v51 }
 0x528   :  { %v1833_v29 = vmul.f32 %v4235_v26, %v1828_v9  ;;  %v1838_v37 = vmul.f32 0.5, %v1813_v16  ;;  %v1843_v39 = vmul.f32 0.5, %v1815_v38  ;;  %v5648_v38 = vld [vmem:[#allocation13_spill] sm:$0xff] }
 0x529   :  { %4236 = vtanh.f32 %v1834_v12  ;;  %2213 = vperm.xlu1 %4140, %v5648_v38  }
 0x52a   :  { %4238 = vtanh.f32 %v1838_v37  ;;  %1949 = vmatmul.mubr.f32.vlgmr.msra.gmra.mrb[18].mxu0 %v1833_v29  ;;  %2020 = vmatmul.mubr.f32.vlgmr.msra.gmra.mrb[18].mxu1 %v1833_v29  ;;  %v5644_v29 = vld [vmem:[#allocation17_spill] sm:$0xff] }
 0x52b   :  { %3763 = vmatpush1.bf16.msra.mxu0 %v4464_v10  ;;  %3795 = vmatpush1.bf16.msra.mxu1 %v4467_v14  ;;  %4240 = vtanh.f32 %v1814_v59  ;;  %v5646_v59 = vld [vmem:[#allocation11_spill] sm:$0xff] }
 0x52c   :  { %3765 = vmatprep.subr.bf16.mxu0 %v4471_v18  ;;  %3797 = vmatprep.subr.bf16.mxu1 %v4473_v19  ;;  %4242 = vtanh.f32 %v1843_v39  ;;  %v5649_v39 = vld [vmem:[#allocation15_spill] sm:$0xff] }
 0x52d   :  { %2094 = vmatprep.mubr.f32.mxu0 %v5611_v30  ;;  %2165 = vmatprep.mubr.f32.mxu1 %v5611_v30 }
 0x52e   :  { %2229 = vperm.xlu0 %4141, %v5649_v39  }
 0x52f   :  { %3767 = vmatpush1.bf16.msra.mxu0 %v4476_v23  ;;  %3799 = vmatpush1.bf16.msra.mxu1 %v4480_v27 }
 0x530   :  { %3769 = vmatprep.subr.bf16.mxu0 %v4482_v28  ;;  %3801 = vmatprep.subr.bf16.mxu1 %v4484_v32 }
 0x533   :  { %v4237_v48 = vpop.eup %4236  ;;  %3771 = vmatpush1.bf16.msra.mxu0 %v4487_v36  ;;  %3803 = vmatpush1.bf16.msra.mxu1 %v4491_v40 }
 0x534   :  { %v4239_v63 = vpop.eup %4238  ;;  %v1836_v33 = vmul.f32 0.5, %v4237_v48  ;;  %3773 = vmatprep.subr.bf16.mxu0 %v4493_v41  ;;  %3805 = vmatprep.subr.bf16.mxu1 %v4496_v45  ;;  %v5650_v48 = vld [vmem:[#allocation14_spill] sm:$0xff] }
 0x535   :  { %v1840_v7 = vmul.f32 0.5, %v4239_v63  ;;  %v4241_v60 = vpop.eup %4240  ;;  %2216 = vperm.xlu1 %4140, %v5650_v48   ;;  %v5651_v63 = vld [vmem:[#allocation16_spill] sm:$0xff] }
 0x536   :  { %v1837_v17 = vadd.f32 0.5, %v1836_v33  ;;  %v4243_v16 = vpop.eup %4242  ;;  %v1854_v33 = vpop.permute.xlu0 %1853 }
 0x537   :  { %v1841_v5 = vadd.f32 0.5, %v1840_v7  ;;  %3775 = vmatpush1.bf16.msra.mxu0 %v4499_v52  ;;  %3807 = vmatpush1.bf16.msra.mxu1 %v4503_v53  ;;  %vm1858_vm8 = vcmp.eq.s32.totalorder %v1854_v33, 1  ;;  %v1870_v7 = vpop.permute.xlu1 %1869 }
 0x538   :  { %v1848_v13 = vmul.f32 %v4241_v60, %v1837_v17  ;;  %3777 = vmatprep.subr.bf16.mxu0 %v4505_v54  ;;  %3809 = vmatprep.subr.bf16.mxu1 %v4508_v58  ;;  %vm1874_vm9 = vcmp.eq.s32.totalorder %v1870_v7, 1  ;;  %v1860_v17 = vsel %vm1858_vm8, %v5616_v8, %v5615_v34  ;;  %v1861_v60 = vsel %vm1858_vm8, %v5618_v15, %v5617_v1 }
 0x539   :  { %v1847_v6 = vmul.f32 %v1841_v5, %v5088_v0  ;;  %v1845_v0 = vmul.f32 0.5, %v4243_v16  ;;  %2232 = vperm.xlu1 %4140, %v5651_v63   ;;  %v1876_v5 = vsel %vm1874_vm9, %v5619_v56, %v1860_v17  ;;  %v1863_v17 = vsel %vm1858_vm8, %v4689_v22, %v4691_v42 }
 0x53b   :  { %v5208_v9 = vadd.f32 %v1848_v13, %v1847_v6  ;;  %3779 = vmatpush1.bf16.msra.mxu0 %v4511_v2  ;;  %3811 = vmatpush1.bf16.msra.mxu1 %v4515_v3  ;;  %v1846_v26 = vadd.f32 0.5, %v1845_v0  ;;  %v1862_v13 = vsel %vm1858_vm8, %v5621_v49, %v5620_v21  ;;  %v1877_v6 = vsel %vm1874_vm9, %v4666_v55, %v1861_v60 }
 0x53c   :  { %3781 = vmatprep.subr.bf16.mxu0 %v4517_v4  ;;  %3813 = vmatprep.subr.bf16.mxu1 %v4520_v11  ;;  %v1878_v51 = vsel %vm1874_vm9, %v4657_v47, %v1862_v13  ;;  %v1879_v60 = vsel %vm1874_vm9, %v4693_v62, %v1863_v17 }
 0x53d   :  { %4244 = vtanh.f32 %v5208_v9 }
 0x53f   :  { %3783 = vmatpush1.bf16.msra.mxu0 %v4523_v20  ;;  %3815 = vmatpush1.bf16.msra.mxu1 %v4527_v24 }
 0x540   :  { %3785 = vmatprep.subr.bf16.mxu0 %v4529_v25  ;;  %3817 = vmatprep.subr.bf16.mxu1 %v4538_v31 }
 0x543   :  { %3787 = vmatpush1.bf16.msra.mxu0 %v4547_v43  ;;  %3819 = vmatpush1.bf16.msra.mxu1 %v4552_v44 }
 0x544   :  { %3789 = vmatprep.subr.bf16.mxu0 %v4554_v46  ;;  %3821 = vmatprep.subr.bf16.mxu1 %v4560_v50 }
 0x547   :  { %v4245_v12 = vpop.eup %4244  ;;  %3791 = vmatpush1.bf16.msra.mxu0 %v5644_v29  ;;  %3823 = vmatpush1.bf16.msra.mxu1 %v5645_v57 }
 0x548   :  { %v1851_v37 = vmul.f32 %v4245_v12, %v1846_v26  ;;  %3825 = vmatprep.subr.bf16.mxu0 %v5646_v59  ;;  %3857 = vmatprep.subr.bf16.mxu1 %v5647_v35 }
 0x54a   :  { %2095 = vmatmul.mubr.f32.vlgmr.msra.gmra.mrb[20].mxu0 %v1851_v37  ;;  %2166 = vmatmul.mubr.f32.vlgmr.msra.gmra.mrb[20].mxu1 %v1851_v37 }
 0x54b   :  { %3827 = vmatpush1.bf16.msra.mxu0 %v4464_v10  ;;  %3859 = vmatpush1.bf16.msra.mxu1 %v4467_v14 }
 0x54c   :  { %3829 = vmatprep.subr.bf16.mxu0 %v4471_v18  ;;  %3861 = vmatprep.subr.bf16.mxu1 %v4473_v19 }
 0x54d   :  { %2308 = vmatprep.mubr.f32.mxu0 %v5611_v30  ;;  %2379 = vmatprep.mubr.f32.mxu1 %v5611_v30 }
 0x54f   :  { %3831 = vmatpush1.bf16.msra.mxu0 %v4476_v23  ;;  %3863 = vmatpush1.bf16.msra.mxu1 %v4480_v27 }
 0x550   :  { %3833 = vmatprep.subr.bf16.mxu0 %v4482_v28  ;;  %3865 = vmatprep.subr.bf16.mxu1 %v4484_v32 }
 0x553   :  { %3835 = vmatpush1.bf16.msra.mxu0 %v4487_v36  ;;  %3867 = vmatpush1.bf16.msra.mxu1 %v4491_v40 }
 0x554   :  { %3837 = vmatprep.subr.bf16.mxu0 %v4493_v41  ;;  %3869 = vmatprep.subr.bf16.mxu1 %v4496_v45 }
 0x557   :  { %3839 = vmatpush1.bf16.msra.mxu0 %v4499_v52  ;;  %3871 = vmatpush1.bf16.msra.mxu1 %v4503_v53 }
 0x558   :  { %3841 = vmatprep.subr.bf16.mxu0 %v4505_v54  ;;  %3873 = vmatprep.subr.bf16.mxu1 %v4508_v58 }
 0x55b   :  { %3843 = vmatpush1.bf16.msra.mxu0 %v4511_v2  ;;  %3875 = vmatpush1.bf16.msra.mxu1 %v4515_v3 }
 0x55c   :  { %3845 = vmatprep.subr.bf16.mxu0 %v4517_v4  ;;  %3877 = vmatprep.subr.bf16.mxu1 %v4520_v11 }
 0x55f   :  { %3847 = vmatpush1.bf16.msra.mxu0 %v4523_v20  ;;  %3879 = vmatpush1.bf16.msra.mxu1 %v4527_v24 }
 0x560   :  { %3849 = vmatprep.subr.bf16.mxu0 %v4529_v25  ;;  %3881 = vmatprep.subr.bf16.mxu1 %v4538_v31 }
 0x563   :  { %3851 = vmatpush1.bf16.msra.mxu0 %v4547_v43  ;;  %3883 = vmatpush1.bf16.msra.mxu1 %v4552_v44 }
 0x564   :  { %3853 = vmatprep.subr.bf16.mxu0 %v4554_v46  ;;  %3885 = vmatprep.subr.bf16.mxu1 %v4560_v50 }
 0x567   :  { %3855 = vmatpush1.bf16.msra.mxu0 %v5644_v29  ;;  %3887 = vmatpush1.bf16.msra.mxu1 %v5645_v57 }
 0x568   :  { %3889 = vmatprep.subr.bf16.mxu0 %v5646_v59  ;;  %3921 = vmatprep.subr.bf16.mxu1 %v5647_v35 }
 0x5fd   :  { %v1950_v16 = vpop.f32.mrb[18].mxu0  ;;  %v2021_v0 = vpop.f32.mrb[18].mxu1 }
 0x5fe   :  { %v2026_v26 = vadd.f32 %v1950_v16, %v1876_v5  ;;  %v1952_v12 = vpop.f32.mrb[19].mxu0  ;;  %v2023_v37 = vpop.f32.mrb[19].mxu1  ;;  %v2028_v48 = vadd.f32 %v2021_v0, %v1878_v51 }
 0x5ff   :  { %v2027_v63 = vadd.f32 %v1952_v12, %v1877_v6  ;;  %v2029_v5 = vadd.f32 %v2023_v37, %v1879_v60 }
 0x600   :  { %v2176_v39 = vmul.f32 0.5, %v2026_v26 }
 0x601   :  { %v2180_v38 = vmul.f32 0.5, %v2027_v63  ;;  %v2185_v16 = vmul.f32 0.5, %v2029_v5 }
 0x602   :  { %4246 = vtanh.f32 %v2176_v39  ;;  %v1857_v39 = vpop.permute.xlu1 %1856 }
 0x603   :  { %4248 = vtanh.f32 %v2180_v38  ;;  %vm1859_vm10 = vcmp.eq.s32.totalorder %v1857_v39, 1  ;;  %v1873_v38 = vpop.permute.xlu0 %1872 }
 0x604   :  { %4250 = vtanh.f32 %v2028_v48  ;;  %vm1875_vm11 = vcmp.eq.s32.totalorder %v1873_v38, 1  ;;  %v1866_v17 = vsel %vm1859_vm10, %v5621_v49, %v5620_v21 }
 0x605   :  { %4252 = vtanh.f32 %v2185_v16 }
 0x60c   :  { %v4247_v35 = vpop.eup %4246 }
 0x60d   :  { %v4249_v59 = vpop.eup %4248  ;;  %v2178_v57 = vmul.f32 0.5, %v4247_v35 }
 0x60e   :  { %v2182_v13 = vmul.f32 0.5, %v4249_v59  ;;  %v4251_v26 = vpop.eup %4250  ;;  %v1864_v59 = vsel %vm1859_vm10, %v5616_v8, %v5615_v34 }
 0x60f   :  { %v2179_v6 = vadd.f32 0.5, %v2178_v57  ;;  %v4253_v48 = vpop.eup %4252  ;;  %v1865_v57 = vsel %vm1859_vm10, %v5618_v15, %v5617_v1 }
 0x610   :  { %v2183_v12 = vadd.f32 0.5, %v2182_v13  ;;  %v2187_v35 = vmul.f32 0.5, %v4253_v48  ;;  %v1881_v60 = vsel %vm1875_vm11, %v4666_v55, %v1865_v57 }
 0x611   :  { %v2190_v33 = vmul.f32 %v4251_v26, %v2179_v6 }
 0x612   :  { %v2189_v63 = vmul.f32 %v2183_v12, %v5166_v61  ;;  %v1880_v61 = vsel %vm1875_vm11, %v5619_v56, %v1864_v59  ;;  %v2188_v13 = vadd.f32 0.5, %v2187_v35 }
 0x614   :  { %v5286_v0 = vadd.f32 %v2190_v33, %v2189_v63  ;;  %v1882_v63 = vsel %vm1875_vm11, %v4657_v47, %v1866_v17 }
 0x616   :  { %4254 = vtanh.f32 %v5286_v0 }
 0x61d   :  { %v2096_v7 = vpop.f32.mrb[20].mxu0  ;;  %v2167_v37 = vpop.f32.mrb[20].mxu1 }
 0x61e   :  { %v2172_v51 = vadd.f32 %v2096_v7, %v1880_v61  ;;  %v2098_v5 = vpop.f32.mrb[21].mxu0  ;;  %v2169_v16 = vpop.f32.mrb[21].mxu1  ;;  %v2174_v59 = vadd.f32 %v2167_v37, %v1882_v63  ;;  %v1867_v61 = vsel %vm1859_vm10, %v4689_v22, %v4691_v42  ;;  %v5652_v63 = vld [vmem:[#allocation18_spill] sm:$0xff] }
 0x61f   :  { %v2173_v6 = vadd.f32 %v2098_v5, %v1881_v60  ;;  %v1883_v35 = vsel %vm1875_vm11, %v4693_v62, %v1867_v61  ;;  %v5654_v61 = vld [vmem:[#allocation12_spill] sm:$0xff] }
 0x620   :  { %v4255_v26 = vpop.eup %4254  ;;  %v2194_v12 = vmul.f32 0.5, %v2172_v51  ;;  %v2175_v57 = vadd.f32 %v2169_v16, %v1883_v35  ;;  %v4392_v35 = vmov 7  }
 0x621   :  { %v2193_v33 = vmul.f32 %v4255_v26, %v2188_v13  ;;  %v2198_v48 = vmul.f32 0.5, %v2173_v6  ;;  %4143 = vset.pattern.permute.xlu1 %v4392_v35  ;;  %4142 = vset.pattern.permute.xlu0 %v4392_v35 }
 0x622   :  { %4256 = vtanh.f32 %v2194_v12  ;;  %v2203_v39 = vmul.f32 0.5, %v2175_v57  ;;  %v5655_v57 = vld [vmem:[#allocation14_spill] sm:$0xff] }
 0x623   :  { %4258 = vtanh.f32 %v2198_v48  ;;  %2309 = vmatmul.mubr.f32.vlgmr.msra.gmra.mrb[22].mxu0 %v2193_v33  ;;  %2380 = vmatmul.mubr.f32.vlgmr.msra.gmra.mrb[22].mxu1 %v2193_v33 }
 0x624   :  { %3891 = vmatpush1.bf16.msra.mxu0 %v4464_v10  ;;  %3923 = vmatpush1.bf16.msra.mxu1 %v4467_v14  ;;  %4260 = vtanh.f32 %v2174_v59  ;;  %v5653_v59 = vld [vmem:[#allocation11_spill] sm:$0xff] }
 0x625   :  { %3893 = vmatprep.subr.bf16.mxu0 %v4471_v18  ;;  %3925 = vmatprep.subr.bf16.mxu1 %v4473_v19  ;;  %4262 = vtanh.f32 %v2203_v39  ;;  %v5656_v39 = vld [vmem:[#allocation13_spill] sm:$0xff] }
 0x626   :  { %2454 = vmatprep.mubr.f32.mxu0 %v5611_v30  ;;  %2525 = vmatprep.mubr.f32.mxu1 %v5611_v30 }
 0x627   :  { %2576 = vperm.xlu1 %4143, %v5655_v57   ;;  %2573 = vperm.xlu0 %4142, %v5656_v39  }
 0x628   :  { %3895 = vmatpush1.bf16.msra.mxu0 %v4476_v23  ;;  %3927 = vmatpush1.bf16.msra.mxu1 %v4480_v27 }
 0x629   :  { %3897 = vmatprep.subr.bf16.mxu0 %v4482_v28  ;;  %3929 = vmatprep.subr.bf16.mxu1 %v4484_v32 }
 0x62c   :  { %v4257_v38 = vpop.eup %4256  ;;  %3899 = vmatpush1.bf16.msra.mxu0 %v4487_v36  ;;  %3931 = vmatpush1.bf16.msra.mxu1 %v4491_v40 }
 0x62d   :  { %v4259_v7 = vpop.eup %4258  ;;  %v2196_v37 = vmul.f32 0.5, %v4257_v38  ;;  %3901 = vmatprep.subr.bf16.mxu0 %v4493_v41  ;;  %3933 = vmatprep.subr.bf16.mxu1 %v4496_v45  ;;  %v5657_v38 = vld [vmem:[#allocation15_spill] sm:$0xff] }
 0x62e   :  { %v2200_v51 = vmul.f32 0.5, %v4259_v7  ;;  %v4261_v60 = vpop.eup %4260  ;;  %2589 = vperm.xlu1 %4143, %v5657_v38   ;;  %v5658_v7 = vld [vmem:[#allocation16_spill] sm:$0xff] }
 0x62f   :  { %v2197_v17 = vadd.f32 0.5, %v2196_v37  ;;  %v4263_v26 = vpop.eup %4262  ;;  %2592 = vperm.xlu0 %4142, %v5658_v7   ;;  %v2932_v37 = vld [vmem:[%s5541_s1] sm:$0xff] }
 0x630   :  { %v2201_v5 = vadd.f32 0.5, %v2200_v51  ;;  %3903 = vmatpush1.bf16.msra.mxu0 %v4499_v52  ;;  %3935 = vmatpush1.bf16.msra.mxu1 %v4503_v53  ;;  %v2933_v51 = vld [vmem:[%s5541_s1 + $0x8] sm:$0xff] }
 0x631   :  { %v2208_v16 = vmul.f32 %v4261_v60, %v2197_v17  ;;  %3905 = vmatprep.subr.bf16.mxu0 %v4505_v54  ;;  %3937 = vmatprep.subr.bf16.mxu1 %v4508_v58  ;;  %v5659_v17 = vmov 0   ;;  %v2214_v60 = vpop.permute.xlu1 %2213 }
 0x632   :  { %v2207_v13 = vmul.f32 %v2201_v5, %v5208_v9  ;;  %v2205_v9 = vmul.f32 0.5, %v4263_v26  ;;  %4144 = vset.pattern.permute.xlu1 %v5659_v17  ;;  %vm2218_vm12 = vcmp.eq.s32.totalorder %v2214_v60, 1  ;;  %v2230_v5 = vpop.permute.xlu0 %2229 }
 0x633   :  { %4145 = vset.pattern.permute.xlu0 %v5659_v17  ;;  %2936 = vperm.xlu1 %4144, %v2932_v37   ;;  %vm2234_vm13 = vcmp.eq.s32.totalorder %v2230_v5, 1  ;;  %v2223_v7 = vsel %vm2218_vm12, %v4689_v22, %v4691_v42 }
 0x634   :  { %v5328_v6 = vadd.f32 %v2208_v16, %v2207_v13  ;;  %3907 = vmatpush1.bf16.msra.mxu0 %v4511_v2  ;;  %3939 = vmatpush1.bf16.msra.mxu1 %v4515_v3  ;;  %v2206_v12 = vadd.f32 0.5, %v2205_v9  ;;  %v2220_v16 = vsel %vm2218_vm12, %v5616_v8, %v5615_v34  ;;  %v2221_v13 = vsel %vm2218_vm12, %v5618_v15, %v5617_v1 }
 0x635   :  { %3909 = vmatprep.subr.bf16.mxu0 %v4517_v4  ;;  %3941 = vmatprep.subr.bf16.mxu1 %v4520_v11  ;;  %v2236_v26 = vsel %vm2234_vm13, %v5619_v56, %v2220_v16  ;;  %v2222_v9 = vsel %vm2218_vm12, %v5621_v49, %v5620_v21  ;;  %v2239_v17 = vsel %vm2234_vm13, %v4693_v62, %v2223_v7  ;;  %v2217_v60 = vpop.permute.xlu1 %2216 }
 0x636   :  { %4264 = vtanh.f32 %v5328_v6  ;;  %2941 = vperm.xlu0 %4145, %v2933_v51   ;;  %v2238_v57 = vsel %vm2234_vm13, %v4657_v47, %v2222_v9  ;;  %vm2219_vm14 = vcmp.eq.s32.totalorder %v2217_v60, 1 }
 0x638   :  { %3911 = vmatpush1.bf16.msra.mxu0 %v4523_v20  ;;  %3943 = vmatpush1.bf16.msra.mxu1 %v4527_v24 }
 0x639   :  { %3913 = vmatprep.subr.bf16.mxu0 %v4529_v25  ;;  %3945 = vmatprep.subr.bf16.mxu1 %v4538_v31  ;;  %v2233_v5 = vpop.permute.xlu1 %2232 }
 0x63a   :  { %vm2235_vm15 = vcmp.eq.s32.totalorder %v2233_v5, 1  ;;  %v2955_v5 = vld [vmem:[#allocation5 + $0x48] sm:$0xff] }
 0x63c   :  { %3915 = vmatpush1.bf16.msra.mxu0 %v4547_v43  ;;  %3947 = vmatpush1.bf16.msra.mxu1 %v4552_v44 }
 0x63d   :  { %3917 = vmatprep.subr.bf16.mxu0 %v4554_v46  ;;  %3949 = vmatprep.subr.bf16.mxu1 %v4560_v50 }
 0x640   :  { %v4265_v33 = vpop.eup %4264  ;;  %3919 = vmatpush1.bf16.msra.mxu0 %v5644_v29  ;;  %3951 = vmatpush1.bf16.msra.mxu1 %v5652_v63 }
 0x641   :  { %v2211_v48 = vmul.f32 %v4265_v33, %v2206_v12  ;;  %3953 = vmatprep.subr.bf16.mxu0 %v5653_v59  ;;  %3985 = vmatprep.subr.bf16.mxu1 %v5654_v61  ;;  %v2237_v12 = vsel %vm2234_vm13, %v4666_v55, %v2221_v13 }
 0x643   :  { %2455 = vmatmul.mubr.f32.vlgmr.msra.gmra.mrb[24].mxu0 %v2211_v48  ;;  %2526 = vmatmul.mubr.f32.vlgmr.msra.gmra.mrb[24].mxu1 %v2211_v48 }
 0x644   :  { %3955 = vmatpush1.bf16.msra.mxu0 %v4464_v10  ;;  %3987 = vmatpush1.bf16.msra.mxu1 %v4467_v14 }
 0x645   :  { %3957 = vmatprep.subr.bf16.mxu0 %v4471_v18  ;;  %3989 = vmatprep.subr.bf16.mxu1 %v4473_v19 }
 0x646   :  { %2668 = vmatprep.mubr.f32.mxu0 %v5611_v30  ;;  %2739 = vmatprep.mubr.f32.mxu1 %v5611_v30 }
 0x648   :  { %3959 = vmatpush1.bf16.msra.mxu0 %v4476_v23  ;;  %3991 = vmatpush1.bf16.msra.mxu1 %v4480_v27 }
 0x649   :  { %3961 = vmatprep.subr.bf16.mxu0 %v4482_v28  ;;  %3993 = vmatprep.subr.bf16.mxu1 %v4484_v32 }
 0x64c   :  { %3963 = vmatpush1.bf16.msra.mxu0 %v4487_v36  ;;  %3995 = vmatpush1.bf16.msra.mxu1 %v4491_v40 }
 0x64d   :  { %3965 = vmatprep.subr.bf16.mxu0 %v4493_v41  ;;  %3997 = vmatprep.subr.bf16.mxu1 %v4496_v45 }
 0x650   :  { %3967 = vmatpush1.bf16.msra.mxu0 %v4499_v52  ;;  %3999 = vmatpush1.bf16.msra.mxu1 %v4503_v53 }
 0x651   :  { %3969 = vmatprep.subr.bf16.mxu0 %v4505_v54  ;;  %4001 = vmatprep.subr.bf16.mxu1 %v4508_v58 }
 0x654   :  { %3971 = vmatpush1.bf16.msra.mxu0 %v4511_v2  ;;  %4003 = vmatpush1.bf16.msra.mxu1 %v4515_v3 }
 0x655   :  { %3973 = vmatprep.subr.bf16.mxu0 %v4517_v4  ;;  %4005 = vmatprep.subr.bf16.mxu1 %v4520_v11 }
 0x658   :  { %3975 = vmatpush1.bf16.msra.mxu0 %v4523_v20  ;;  %4007 = vmatpush1.bf16.msra.mxu1 %v4527_v24 }
 0x659   :  { %3977 = vmatprep.subr.bf16.mxu0 %v4529_v25  ;;  %4009 = vmatprep.subr.bf16.mxu1 %v4538_v31 }
 0x65c   :  { %3979 = vmatpush1.bf16.msra.mxu0 %v4547_v43  ;;  %4011 = vmatpush1.bf16.msra.mxu1 %v4552_v44 }
 0x65d   :  { %3981 = vmatprep.subr.bf16.mxu0 %v4554_v46  ;;  %4013 = vmatprep.subr.bf16.mxu1 %v4560_v50 }
 0x660   :  { %3983 = vmatpush1.bf16.msra.mxu0 %v5644_v29  ;;  %4015 = vmatpush1.bf16.msra.mxu1 %v5652_v63 }
 0x661   :  { %4017 = vmatprep.subr.bf16.mxu0 %v5653_v59  ;;  %4049 = vmatprep.subr.bf16.mxu1 %v5654_v61 }
 0x6f6   :  { %v2310_v33 = vpop.f32.mrb[22].mxu0  ;;  %v2381_v48 = vpop.f32.mrb[22].mxu1 }
 0x6f7   :  { %v2386_v59 = vadd.f32 %v2310_v33, %v2236_v26  ;;  %v2312_v61 = vpop.f32.mrb[23].mxu0  ;;  %v2383_v35 = vpop.f32.mrb[23].mxu1  ;;  %v2388_v51 = vadd.f32 %v2381_v48, %v2238_v57  ;;  %v2224_v57 = vsel %vm2219_vm14, %v5616_v8, %v5615_v34 }
 0x6f8   :  { %v2387_v39 = vadd.f32 %v2312_v61, %v2237_v12  ;;  %v2389_v16 = vadd.f32 %v2383_v35, %v2239_v17 }
 0x6f9   :  { %v2536_v38 = vmul.f32 0.5, %v2386_v59 }
 0x6fa   :  { %v2540_v37 = vmul.f32 0.5, %v2387_v39  ;;  %v2545_v13 = vmul.f32 0.5, %v2389_v16 }
 0x6fb   :  { %4266 = vtanh.f32 %v2536_v38 }
 0x6fc   :  { %4268 = vtanh.f32 %v2540_v37 }
 0x6fd   :  { %4270 = vtanh.f32 %v2388_v51  ;;  %v2226_v51 = vsel %vm2219_vm14, %v5621_v49, %v5620_v21 }
 0x6fe   :  { %4272 = vtanh.f32 %v2545_v13 }
 0x705   :  { %v4267_v26 = vpop.eup %4266 }
 0x706   :  { %v4269_v33 = vpop.eup %4268  ;;  %v2538_v63 = vmul.f32 0.5, %v4267_v26 }
 0x707   :  { %v2542_v9 = vmul.f32 0.5, %v4269_v33  ;;  %v4271_v59 = vpop.eup %4270 }
 0x708   :  { %v2539_v12 = vadd.f32 0.5, %v2538_v63  ;;  %v4273_v35 = vpop.eup %4272  ;;  %v2225_v63 = vsel %vm2219_vm14, %v5618_v15, %v5617_v1 }
 0x709   :  { %v2543_v61 = vadd.f32 0.5, %v2542_v9  ;;  %v2547_v38 = vmul.f32 0.5, %v4273_v35  ;;  %v2241_v17 = vsel %vm2235_vm15, %v4666_v55, %v2225_v63 }
 0x70a   :  { %v2550_v29 = vmul.f32 %v4271_v59, %v2539_v12 }
 0x70b   :  { %v2549_v39 = vmul.f32 %v2543_v61, %v5286_v0  ;;  %v2240_v0 = vsel %vm2235_vm15, %v5619_v56, %v2224_v57  ;;  %v2548_v26 = vadd.f32 0.5, %v2547_v38  ;;  %v2242_v61 = vsel %vm2235_vm15, %v4657_v47, %v2226_v51 }
 0x70c   :  { %v2227_v57 = vsel %vm2219_vm14, %v4689_v22, %v4691_v42 }
 0x70d   :  { %v5414_v48 = vadd.f32 %v2550_v29, %v2549_v39  ;;  %v2243_v38 = vsel %vm2235_vm15, %v4693_v62, %v2227_v57 }
 0x70f   :  { %4274 = vtanh.f32 %v5414_v48 }
 0x716   :  { %v2456_v29 = vpop.f32.mrb[24].mxu0  ;;  %v2527_v7 = vpop.f32.mrb[24].mxu1 }
 0x717   :  { %v2532_v37 = vadd.f32 %v2456_v29, %v2240_v0  ;;  %v2458_v16 = vpop.f32.mrb[25].mxu0  ;;  %v2529_v13 = vpop.f32.mrb[25].mxu1  ;;  %v2534_v35 = vadd.f32 %v2527_v7, %v2242_v61  ;;  %v2956_v29 = vld [vmem:[#allocation5 + $0x50] sm:$0xff]  ;;  %v2957_v7 = vld [vmem:[#allocation5 + $0x58] sm:$0xff] }
 0x718   :  { %v2533_v33 = vadd.f32 %v2458_v16, %v2241_v17  ;;  %v2535_v63 = vadd.f32 %v2529_v13, %v2243_v38  ;;  %v4100_v51 = vpack.c.bf16 %v2957_v7, %v2956_v29  ;;  %v2959_v17 = vld [vmem:[#allocation5 + $0x68] sm:$0xff]  ;;  %v2960_v13 = vld [vmem:[#allocation5 + $0x70] sm:$0xff] }
 0x719   :  { %v4275_v9 = vpop.eup %4274  ;;  %v2554_v12 = vmul.f32 0.5, %v2532_v37  ;;  %v2958_v37 = vld [vmem:[#allocation5 + $0x60] sm:$0xff] }
 0x71a   :  { %v2553_v59 = vmul.f32 %v4275_v9, %v2548_v26  ;;  %v2558_v39 = vmul.f32 0.5, %v2533_v33  ;;  %v4104_v16 = vpack.c.bf16 %v2959_v17, %v2958_v37  ;;  %v2961_v26 = vld [vmem:[#allocation5 + $0x78] sm:$0xff]  ;;  %v5473_v9 = vpop.permute.xlu1 %2576 }
 0x71b   :  { %4276 = vtanh.f32 %v2554_v12  ;;  %v4108_v33 = vpack.c.bf16 %v2961_v26, %v2960_v13  ;;  %v2574_v12 = vpop.permute.xlu0 %2573  ;;  %vm2579_vm2 = vcmp.eq.s32.totalorder %v5473_v9, 1 }
 0x71c   :  { %4278 = vtanh.f32 %v2558_v39  ;;  %2669 = vmatmul.mubr.f32.vlgmr.msra.gmra.mrb[26].mxu0 %v2553_v59  ;;  %2740 = vmatmul.mubr.f32.vlgmr.msra.gmra.mrb[26].mxu1 %v2553_v59  ;;  %vm2578_vm0 = vcmp.eq.s32.totalorder %v2574_v12, 1 }
 0x71d   :  { %4019 = vmatpush1.bf16.msra.mxu0 %v4464_v10  ;;  %4051 = vmatpush1.bf16.msra.mxu1 %v4467_v14  ;;  %4280 = vtanh.f32 %v2534_v35  ;;  %v2563_v10 = vmul.f32 0.5, %v2535_v63  ;;  %v2580_v61 = vsel %vm2578_vm0, %v5616_v8, %v5615_v34  ;;  %v2581_v39 = vsel %vm2578_vm0, %v5618_v15, %v5617_v1 }
 0x71e   :  { %4021 = vmatprep.subr.bf16.mxu0 %v4471_v18  ;;  %4053 = vmatprep.subr.bf16.mxu1 %v4473_v19  ;;  %v2590_v59 = vpop.permute.xlu1 %2589  ;;  %v2582_v57 = vsel %vm2578_vm0, %v5621_v49, %v5620_v21 }
 0x71f   :  { %2814 = vmatprep.mubr.f32.mxu0 %v5611_v30  ;;  %2885 = vmatprep.mubr.f32.mxu1 %v5611_v30  ;;  %4282 = vtanh.f32 %v2563_v10  ;;  %vm2594_vm1 = vcmp.eq.s32.totalorder %v2590_v59, 1 }
 0x720   :  { %v2596_v35 = vsel %vm2594_vm1, %v5619_v56, %v2580_v61  ;;  %v2597_v38 = vsel %vm2594_vm1, %v4666_v55, %v2581_v39 }
 0x721   :  { %4023 = vmatpush1.bf16.msra.mxu0 %v4476_v23  ;;  %4055 = vmatpush1.bf16.msra.mxu1 %v4480_v27 }
 0x722   :  { %4025 = vmatprep.subr.bf16.mxu0 %v4482_v28  ;;  %4057 = vmatprep.subr.bf16.mxu1 %v4484_v32 }
 0x725   :  { %v4277_v14 = vpop.eup %4276  ;;  %4027 = vmatpush1.bf16.msra.mxu0 %v4487_v36  ;;  %4059 = vmatpush1.bf16.msra.mxu1 %v4491_v40 }
 0x726   :  { %v4279_v18 = vpop.eup %4278  ;;  %v2556_v19 = vmul.f32 0.5, %v4277_v14  ;;  %4029 = vmatprep.subr.bf16.mxu0 %v4493_v41  ;;  %4061 = vmatprep.subr.bf16.mxu1 %v4496_v45 }
 0x727   :  { %v2560_v30 = vmul.f32 0.5, %v4279_v18  ;;  %v4281_v27 = vpop.eup %4280 }
 0x728   :  { %v2557_v23 = vadd.f32 0.5, %v2556_v19 }
 0x729   :  { %v2561_v60 = vadd.f32 0.5, %v2560_v30  ;;  %4031 = vmatpush1.bf16.msra.mxu0 %v4499_v52  ;;  %4063 = vmatpush1.bf16.msra.mxu1 %v4503_v53  ;;  %v4283_v40 = vpop.eup %4282  ;;  %v5660_v53 = vld [vmem:[#allocation17_spill] sm:$0xff]  ;;  %v2598_v30 = vsel %vm2594_vm1, %v4657_v47, %v2582_v57 }
 0x72a   :  { %v2568_v28 = vmul.f32 %v4281_v27, %v2557_v23  ;;  %4033 = vmatprep.subr.bf16.mxu0 %v4505_v54  ;;  %4065 = vmatprep.subr.bf16.mxu1 %v4508_v58  ;;  %v2565_v41 = vmul.f32 0.5, %v4283_v40  ;;  %v5661_v54 = vld [vmem:[#allocation18_spill] sm:$0xff] }
 0x72b   :  { %v2567_v32 = vmul.f32 %v2561_v60, %v5328_v6  ;;  %v2954_v6 = vld [vmem:[#allocation5 + $0x40] sm:$0xff]  ;;  %v2583_v60 = vsel %vm2578_vm0, %v4689_v22, %v4691_v42 }
 0x72c   :  { %v2566_v45 = vadd.f32 0.5, %v2565_v41  ;;  %v4096_v0 = vpack.c.bf16 %v2955_v5, %v2954_v6  ;;  %v2599_v40 = vsel %vm2594_vm1, %v4693_v62, %v2583_v60 }
 0x72d   :  { %v5456_v36 = vadd.f32 %v2568_v28, %v2567_v32  ;;  %4035 = vmatpush1.bf16.msra.mxu0 %v4511_v2  ;;  %4067 = vmatpush1.bf16.msra.mxu1 %v4515_v3  ;;  %v2946_v2 = vld [vmem:[#allocation5] sm:$0xff]  ;;  %v2947_v3 = vld [vmem:[#allocation5 + $0x8] sm:$0xff] }
 0x72e   :  { %4037 = vmatprep.subr.bf16.mxu0 %v4517_v4  ;;  %4069 = vmatprep.subr.bf16.mxu1 %v4520_v11  ;;  %v4080_v4 = vpack.c.bf16 %v2947_v3, %v2946_v2  ;;  %v2948_v11 = vld [vmem:[#allocation5 + $0x10] sm:$0xff] }
 0x72f   :  { %4284 = vtanh.f32 %v5456_v36 }
 0x731   :  { %4039 = vmatpush1.bf16.msra.mxu0 %v4523_v20  ;;  %4071 = vmatpush1.bf16.msra.mxu1 %v4527_v24  ;;  %v2949_v20 = vld [vmem:[#allocation5 + $0x18] sm:$0xff] }
 0x732   :  { %4041 = vmatprep.subr.bf16.mxu0 %v4529_v25  ;;  %4073 = vmatprep.subr.bf16.mxu1 %v4538_v31  ;;  %v4084_v24 = vpack.c.bf16 %v2949_v20, %v2948_v11  ;;  %v2950_v25 = vld [vmem:[#allocation5 + $0x20] sm:$0xff]  ;;  %v2951_v31 = vld [vmem:[#allocation5 + $0x28] sm:$0xff] }
 0x735   :  { %4043 = vmatpush1.bf16.msra.mxu0 %v4547_v43  ;;  %4075 = vmatpush1.bf16.msra.mxu1 %v4552_v44  ;;  %v4088_v43 = vpack.c.bf16 %v2951_v31, %v2950_v25  ;;  %v2952_v44 = vld [vmem:[#allocation5 + $0x30] sm:$0xff]  ;;  %v2593_v25 = vpop.permute.xlu0 %2592 }
 0x736   :  { %4045 = vmatprep.subr.bf16.mxu0 %v4554_v46  ;;  %4077 = vmatprep.subr.bf16.mxu1 %v4560_v50  ;;  %v2953_v46 = vld [vmem:[#allocation5 + $0x38] sm:$0xff]  ;;  %vm2595_vm3 = vcmp.eq.s32.totalorder %v2593_v25, 1 }
 0x737   :  { %v4092_v50 = vpack.c.bf16 %v2953_v46, %v2952_v44  ;;  %v2585_v46 = vsel %vm2579_vm2, %v5618_v15, %v5617_v1  ;;  %v2937_v15 = vpop.permute.xlu1 %2936 }
 0x739   :  { %v4285_v52 = vpop.eup %4284  ;;  %4047 = vmatpush1.bf16.msra.mxu0 %v5660_v53  ;;  %4079 = vmatpush1.bf16.msra.mxu1 %v5661_v54 }
 0x73a   :  { %v2571_v58 = vmul.f32 %v4285_v52, %v2566_v45  ;;  %4081 = vmatprep.subr.bf16.mxu0 %v4080_v4 }
 0x73c   :  { %2815 = vmatmul.mubr.f32.vlgmr.msra.gmra.mrb[28].mxu0 %v2571_v58  ;;  %2886 = vmatmul.mubr.f32.vlgmr.msra.gmra.mrb[28].mxu1 %v2571_v58 }
 0x73d   :  { %4083 = vmatpush3.bf16.msra.mxu0 %v4080_v4 }
 0x73e   :  { %4085 = vmatprep.subr.bf16.mxu0 %v4084_v24 }
 0x741   :  { %4087 = vmatpush3.bf16.msra.mxu0 %v4084_v24 }
 0x742   :  { %4089 = vmatprep.subr.bf16.mxu0 %v4088_v43 }
 0x745   :  { %4091 = vmatpush3.bf16.msra.mxu0 %v4088_v43  ;;  %v2584_v43 = vsel %vm2579_vm2, %v5616_v8, %v5615_v34  ;;  %v2601_v34 = vsel %vm2595_vm3, %v4666_v55, %v2585_v46 }
 0x746   :  { %4093 = vmatprep.subr.bf16.mxu0 %v4092_v50 }
 0x749   :  { %4095 = vmatpush3.bf16.msra.mxu0 %v4092_v50 }
 0x74a   :  { %4097 = vmatprep.subr.bf16.mxu0 %v4096_v0 }
 0x74d   :  { %4099 = vmatpush3.bf16.msra.mxu0 %v4096_v0  ;;  %v2586_v0 = vsel %vm2579_vm2, %v5621_v49, %v5620_v21  ;;  %v2587_v21 = vsel %vm2579_vm2, %v4689_v22, %v4691_v42 }
 0x74e   :  { %4101 = vmatprep.subr.bf16.mxu0 %v4100_v51  ;;  %v2603_v49 = vsel %vm2595_vm3, %v4693_v62, %v2587_v21 }
 0x751   :  { %4103 = vmatpush3.bf16.msra.mxu0 %v4100_v51 }
 0x752   :  { %4105 = vmatprep.subr.bf16.mxu0 %v4104_v16 }
 0x755   :  { %4107 = vmatpush3.bf16.msra.mxu0 %v4104_v16 }
 0x756   :  { %4109 = vmatprep.subr.bf16.mxu0 %v4108_v33 }
 0x759   :  { %4111 = vmatpush3.bf16.msra.mxu0 %v4108_v33 }
 0x7ef   :  { %v2670_v63 = vpop.f32.mrb[26].mxu0  ;;  %v2741_v10 = vpop.f32.mrb[26].mxu1 }
 0x7f0   :  { %v2746_v14 = vadd.f32 %v2670_v63, %v2596_v35  ;;  %v2672_v18 = vpop.f32.mrb[27].mxu0  ;;  %v2743_v19 = vpop.f32.mrb[27].mxu1  ;;  %v2748_v32 = vadd.f32 %v2741_v10, %v2598_v30  ;;  %v3066_v30 = vld [vmem:[%s5545_s5] ss:$0 sm:$0xff] }
 0x7f1   :  { %v2747_v23 = vadd.f32 %v2672_v18, %v2597_v38  ;;  %v2749_v41 = vadd.f32 %v2743_v19, %v2599_v40 }
 0x7f2   :  { %v2896_v27 = vmul.f32 0.5, %v2746_v14  ;;  %v2942_v14 = vpop.permute.xlu0 %2941 }
 0x7f3   :  { %v2900_v28 = vmul.f32 0.5, %v2747_v23  ;;  %v2905_v45 = vmul.f32 0.5, %v2749_v41 }
 0x7f4   :  { %4286 = vtanh.f32 %v2896_v27 }
 0x7f5   :  { %4288 = vtanh.f32 %v2900_v28 }
 0x7f6   :  { %4290 = vtanh.f32 %v2748_v32 }
 0x7f7   :  { %4292 = vtanh.f32 %v2905_v45 }
 0x7fe   :  { %v4287_v52 = vpop.eup %4286 }
 0x7ff   :  { %v4289_v53 = vpop.eup %4288  ;;  %v2898_v54 = vmul.f32 0.5, %v4287_v52 }
 0x800   :  { %v2902_v58 = vmul.f32 0.5, %v4289_v53  ;;  %v4291_v3 = vpop.eup %4290 }
 0x801   :  { %v2899_v2 = vadd.f32 0.5, %v2898_v54  ;;  %v4293_v31 = vpop.eup %4292 }
 0x802   :  { %v2903_v4 = vadd.f32 0.5, %v2902_v58  ;;  %v2907_v44 = vmul.f32 0.5, %v4293_v31 }
 0x803   :  { %v2910_v11 = vmul.f32 %v4291_v3, %v2899_v2 }
 0x804   :  { %v2909_v20 = vmul.f32 %v2903_v4, %v5414_v48  ;;  %v2600_v48 = vsel %vm2595_vm3, %v5619_v56, %v2584_v43  ;;  %v2908_v37 = vadd.f32 0.5, %v2907_v44  ;;  %v2602_v56 = vsel %vm2595_vm3, %v4657_v47, %v2586_v0 }
 0x806   :  { %v2911_v24 = vadd.f32 %v2910_v11, %v2909_v20 }
 0x808   :  { %4294 = vtanh.f32 %v2911_v24 }
 0x80f   :  { %v2816_v50 = vpop.f32.mrb[28].mxu0  ;;  %v2887_v6 = vpop.f32.mrb[28].mxu1 }
 0x810   :  { %v2892_v5 = vadd.f32 %v2816_v50, %v2600_v48  ;;  %v2818_v8 = vpop.f32.mrb[29].mxu0  ;;  %v2889_v29 = vpop.f32.mrb[29].mxu1  ;;  %v2894_v13 = vadd.f32 %v2887_v6, %v2602_v56 }
 0x811   :  { %v2893_v7 = vadd.f32 %v2818_v8, %v2601_v34  ;;  %v2895_v26 = vadd.f32 %v2889_v29, %v2603_v49 }
 0x812   :  { %v4295_v51 = vpop.eup %4294  ;;  %v2914_v1 = vmul.f32 0.5, %v2892_v5 }
 0x813   :  { %v2918_v17 = vmul.f32 0.5, %v2893_v7  ;;  %v2913_v16 = vmul.f32 %v4295_v51, %v2908_v37  ;;  %v2923_v33 = vmul.f32 0.5, %v2895_v26 }
 0x814   :  { %4296 = vtanh.f32 %v2914_v1 }
 0x815   :  { %4298 = vtanh.f32 %v2918_v17  ;;  %v2944_v55 = vmul.f32 %v2937_v15, %v2913_v16 }
 0x816   :  { %4300 = vtanh.f32 %v2894_v13 }
 0x817   :  { %3117 = vmatprep.mubr.f32.mxu0 %v2944_v55  ;;  %4302 = vtanh.f32 %v2923_v33 }
 0x81e   :  { %v4297_v12 = vpop.eup %4296 }
 0x81f   :  { %v4299_v47 = vpop.eup %4298  ;;  %v2916_v59 = vmul.f32 0.5, %v4297_v12 }
 0x820   :  { %v2920_v61 = vmul.f32 0.5, %v4299_v47  ;;  %v4301_v35 = vpop.eup %4300 }
 0x821   :  { %v2917_v39 = vadd.f32 0.5, %v2916_v59  ;;  %v4303_v9 = vpop.eup %4302 }
 0x822   :  { %v2921_v57 = vadd.f32 0.5, %v2920_v61  ;;  %v2925_v63 = vmul.f32 0.5, %v4303_v9 }
 0x823   :  { %v2928_v38 = vmul.f32 %v4301_v35, %v2917_v39 }
 0x824   :  { %v2927_v42 = vmul.f32 %v2921_v57, %v5456_v36  ;;  %v2926_v62 = vadd.f32 0.5, %v2925_v63 }
 0x826   :  { %v2929_v22 = vadd.f32 %v2928_v38, %v2927_v42 }
 0x828   :  { %4304 = vtanh.f32 %v2929_v22 }
 0x832   :  { %v4305_v10 = vpop.eup %4304 }
 0x833   :  { %v2931_v18 = vmul.f32 %v4305_v10, %v2926_v62 }
 0x835   :  { %v2945_v19 = vmul.f32 %v2942_v14, %v2931_v18 }
 0x837   :  { %3118 = vmatmul.mubr.f32.vlgmr.msra.gmra.mrb[30].mxu0 %v2945_v19 }
 0x90a   :  { %v3119_v23 = vpop.f32.mrb[30].mxu0 }
 0x90b   :  { %v3041_v27 = vadd.f32 %v3119_v23, %v3066_v30  ;;  %v3035_v60 = vpop.f32.mrb[31].mxu0 }
 0x90c   :  { %v3036_v36 = vadd.f32 %v3066_v30, %v3035_v60 }
 0x90d   :  { %3045 = vst [vmem:[#allocation7 + $0x8] sm:$0xff] %v3041_v27 }
 0x90e   :  { %3044 = vst [vmem:[#allocation7] sm:$0xff] %v3036_v36 }
 0x90f   :  { %4361 = shalt.err (!%p4358_p6)
}
 0x910   :  { %s4362_s5 = scalar_lea.hbm %s5546_s6, 256 }
 0x911   :  { %p4363_p7 = scmp.ne.s32.totalorder %s5546_s6, %s4362_s5  ;;  %p4366_p8 = scmp.lt.u32.totalorder %s4362_s5, %s5546_s6 }
 0x913   :  { %p4368_p9 = pnand %p4366_p8, %p4363_p7 }
 0x915   :  { %4371 = shalt.err (!%p4368_p9)
}
 0x916   :  { %3057 = dma.vmem_to_hbm [thread:$0]  %s3052_s13, 256, %s5546_s6, [#allocation4], %s4382_s3, %s4382_s3, %s4383_s21  }
 0x917   :  { %4376 = dma.done.wait [#allocation4], 256  }
 0x918   :  { %4377 = vsyncadd [#allocation4], 4294967040 }
 0x919   :  { %3061 = vsyncpa [#allocation3], 1 }
 0x91a   :  { %3062 = vsyncpa [#allocation6], 1 }
 0x91b   :  { %3063 = vsyncpa [#allocation4], 1 }

</bundles_post_ra>
